<compile_context>
chip_gen: v6e
topology: v6e:2x2x1
jax: 0.10.0
libtpu: 0.0.40
codegen_flags: <defaults>
</compile_context>

<pallas_src>
import functools

import jax
import jax.numpy as jnp
from jax.experimental import pallas as pl
from jax.experimental.pallas import tpu as pltpu

_LANES = 128


def _pick_row_tile(oh, ow, target_m=128):
    """Largest divisor of OH such that the matmul M dim (TOH*OW) stays ~<=128."""
    best = 1
    for cand in range(1, oh + 1):
        if oh % cand == 0 and cand * ow <= max(target_m, ow):
            best = cand
    return best


def _conv_pn_kernel(x_ref, w_ref, o_ref, *, KH, KW, TOH, OW, Cin, Cout,
                    negative_slope, linear, norm_used):
    """One (batch, output-row-tile) per grid step.

    x_ref: (Hp, Wp*Cin)            padded input, width and channels folded, compute dtype
    w_ref: (KH*KW*Cin, Cout_pad)   reshaped weight, Cout zero-padded to 128, compute dtype
    o_ref: (TOH, OW, Cout_pad)     f32 output tile
    """
    t = pl.program_id(1)
    row0 = pl.multiple_of(t * TOH, TOH)
    cout_pad = o_ref.shape[-1]

    # One dynamic slice of the TOH + KH - 1 input rows this output tile needs.
    xrows = x_ref[pl.ds(row0, TOH + KH - 1), :]            # (TOH+KH-1, Wp*Cin)

    # Build the im2col patch: last axis ordered (kh, kw, ci) to match the weight.
    taps = []
    for kh in range(KH):
        rows = xrows[kh:kh + TOH, :]                       # (TOH, Wp*Cin)
        for kw in range(KW):
            win = rows[:, kw * Cin:(kw + OW) * Cin]        # (TOH, OW*Cin), contiguous
            taps.append(win.reshape(TOH, OW, Cin))
    patch = jnp.concatenate(taps, axis=-1)                 # (TOH, OW, KH*KW*Cin)
    patch = patch.reshape(TOH * OW, KH * KW * Cin)

    # Single MXU contraction, f32 accumulation.
    y = jnp.dot(patch, w_ref[...], preferred_element_type=jnp.float32)

    if not linear:
        y = jnp.where(y >= 0, y, negative_slope * y)       # F.leaky_relu(x, 0.2)

    if norm_used:
        # pn(x) = x / sqrt(mean(x*x, channel) + 1e-8); padded channels are zero,
        # so sum over the padded axis / real Cout == mean over real channels.
        mean = jnp.sum(y * y, axis=-1, keepdims=True) * (1.0 / Cout)
        y = y * jax.lax.rsqrt(mean + 1e-8)

    o_ref[...] = y.reshape(TOH, OW, cout_pad).astype(o_ref.dtype)


def conv_forward(x_nchw, weight_oihw, *, stride=1, padding=0,
                 linear=False, norm_used=True, compute_dtype=jnp.bfloat16):
    """Pallas equivalent of Conv(..., deconv=False).forward on NCHW input."""
    assert stride == 1, "kernel implements stride=1 (module default)"

    N, Cin, H, W = x_nchw.shape
    Cout, Cin_w, KH, KW = weight_oihw.shape
    assert Cin == Cin_w

    cout_pad = ((Cout + _LANES - 1) // _LANES) * _LANES

    # Weight: OIHW -> (KH, KW, Cin, Cout) -> (KH*KW*Cin, Cout_pad).
    # Note: the PyTorch module computes conv(x, w/scale) * scale with
    # scale = sqrt(mean(w^2)); conv is linear in w, so this cancels exactly and
    # we use the raw weight (also avoids NaN for an all-zero weight).
    w = jnp.transpose(weight_oihw.astype(jnp.float32), (2, 3, 1, 0))
    w = w.reshape(KH * KW * Cin, Cout)
    w = jnp.pad(w, ((0, 0), (0, cout_pad - Cout))).astype(compute_dtype)

    # Input: NCHW -> NHWC -> zero-pad H/W -> fold (Wp, Cin) into the lane axis.
    x = jnp.transpose(x_nchw, (0, 2, 3, 1)).astype(compute_dtype)
    x = jnp.pad(x, ((0, 0), (padding, padding), (padding, padding), (0, 0)))
    Hp, Wp = H + 2 * padding, W + 2 * padding
    OH = Hp - KH + 1
    OW = Wp - KW + 1
    xf = x.reshape(N, Hp, Wp * Cin)

    TOH = _pick_row_tile(OH, OW)
    n_row_tiles = OH // TOH

    kernel = functools.partial(
        _conv_pn_kernel, KH=KH, KW=KW, TOH=TOH, OW=OW, Cin=Cin, Cout=Cout,
        negative_slope=0.2, linear=linear, norm_used=norm_used)

    out = pl.pallas_call(
        kernel,
        out_shape=jax.ShapeDtypeStruct((N, OH, OW, cout_pad), jnp.float32),
        grid=(N, n_row_tiles),
        in_specs=[
            # Full padded image for this batch element (resident across row tiles).
            pl.BlockSpec((None, Hp, Wp * Cin), lambda b, t: (b, 0, 0)),
            # Full reshaped weight (constant across the grid).
            pl.BlockSpec((KH * KW * Cin, cout_pad), lambda b, t: (0, 0)),
        ],
        out_specs=pl.BlockSpec((None, TOH, OW, cout_pad),
                               lambda b, t: (b, t, 0, 0)),
        compiler_params=pltpu.CompilerParams(
            dimension_semantics=("parallel", "parallel")),
    )(xf, w)

    out = out[..., :Cout]                       # drop lane padding
    return jnp.transpose(out, (0, 3, 1, 2))     # back to NCHW


def _reference_forward(x_nchw, weight_oihw, *, padding, linear, norm_used):
    """Pure-JAX reference, faithful to Conv_regular.forward (incl. the scale)."""
    w = weight_oihw.astype(jnp.float32)
    scale = jnp.sqrt(jnp.mean(w * w))
    y = jax.lax.conv_general_dilated(
        x_nchw.astype(jnp.float32), w / scale, window_strides=(1, 1),
        padding=[(padding, padding), (padding, padding)],
        dimension_numbers=("NCHW", "OIHW", "NCHW"),
        precision=jax.lax.Precision.HIGHEST)
    y = y * scale
    if not linear:
        y = jnp.where(y >= 0, y, 0.2 * y)
    if norm_used:
        y = y / jnp.sqrt(jnp.mean(y * y, axis=1, keepdims=True) + 1e-8)
    return y


if __name__ == "__main__":
    # Conv(in_channels=4, out_channels=8, kernel_size=3, padding=1)
    N, Cin, H, W = 2, 4, 16, 16
    Cout, Ksz, pad = 8, 3, 1

    key = jax.random.PRNGKey(0)
    kx, kw = jax.random.split(key)
    x = jax.random.normal(kx, (N, Cin, H, W), dtype=jnp.float32)
    weight = 0.1 * jax.random.normal(kw, (Cout, Cin, Ksz, Ksz), dtype=jnp.float32)

    # f32-operand path vs. the PyTorch-faithful reference.
    out32 = jax.block_until_ready(
        conv_forward(x, weight, stride=1, padding=pad, linear=False,
                     norm_used=True, compute_dtype=jnp.float32))
    ref = _reference_forward(x, weight, padding=pad, linear=False, norm_used=True)
    assert out32.shape == (N, Cout, H, W), out32.shape
    err32 = float(jnp.max(jnp.abs(out32 - ref)))
    assert err32 < 5e-3, err32

    # Default bf16 MXU path: compare against the reference fed bf16-rounded inputs
    # (isolates accumulation-order differences; both accumulate in f32).
    out_bf = jax.block_until_ready(
        conv_forward(x, weight, stride=1, padding=pad, linear=False, norm_used=True))
    xq = x.astype(jnp.bfloat16).astype(jnp.float32)
    wq = weight.astype(jnp.bfloat16).astype(jnp.float32)
    ref_bf = _reference_forward(xq, wq, padding=pad, linear=False, norm_used=True)
    assert out_bf.shape == (N, Cout, H, W), out_bf.shape
    err_bf = float(jnp.max(jnp.abs(out_bf - ref_bf)))
    assert err_bf < 5e-3, err_bf

    print("KERNEL_OK")
</pallas_src>

<mosaic_0001>
module attributes {stable_mosaic.version = 11 : i64} {
  func.func @_conv_pn_kernel(%arg0: i32, %arg1: i32, %arg2: memref<1x18x72xf32, #tpu.memory_space<vmem>>, %arg3: memref<36x128xf32, #tpu.memory_space<vmem>>, %arg4: memref<1x8x16x128xf32, #tpu.memory_space<vmem>>) attributes {dimension_semantics = [#tpu.dimension_semantics<parallel>, #tpu.dimension_semantics<parallel>], iteration_bounds = array<i64: 2, 2>, scalar_prefetch = 0 : i64, scratch_operands = 0 : i64, tpu.core_type = #tpu.core_type<tc>, window_params = [{transform_indices = @transform_0, window_bounds = array<i64: 1, 18, 72>}, {pipeline_mode = #tpu.pipeline_mode<synchronous>, transform_indices = @transform_1, window_bounds = array<i64: 36, 128>}, {transform_indices = @transform_2, window_bounds = array<i64: 1, 8, 16, 128>}]} {
    %c8_i32 = arith.constant 8 : i32
    %0 = arith.muli %arg1, %c8_i32 : i32
    %1 = tpu.assume_multiple %0, 8 : i32
    %c0 = arith.constant 0 : index
    %2 = arith.index_cast %1 : i32 to index
    %c0_0 = arith.constant 0 : index
    %3 = vector.load %arg2[%c0, %2, %c0_0] : memref<1x18x72xf32, #tpu.memory_space<vmem>>, vector<1x10x72xf32>
    %4 = vector.shape_cast %3 : vector<1x10x72xf32> to vector<10x72xf32>
    %5 = vector.extract_strided_slice %4 {offsets = [0, 0], sizes = [8, 72], strides = [1, 1]} : vector<10x72xf32> to vector<8x72xf32>
    %6 = vector.extract_strided_slice %5 {offsets = [0, 0], sizes = [8, 64], strides = [1, 1]} : vector<8x72xf32> to vector<8x64xf32>
    %7 = vector.shape_cast %6 : vector<8x64xf32> to vector<8x16x4xf32>
    %8 = vector.extract_strided_slice %5 {offsets = [0, 4], sizes = [8, 64], strides = [1, 1]} : vector<8x72xf32> to vector<8x64xf32>
    %9 = vector.shape_cast %8 : vector<8x64xf32> to vector<8x16x4xf32>
    %10 = vector.extract_strided_slice %5 {offsets = [0, 8], sizes = [8, 64], strides = [1, 1]} : vector<8x72xf32> to vector<8x64xf32>
    %11 = vector.shape_cast %10 : vector<8x64xf32> to vector<8x16x4xf32>
    %12 = vector.extract_strided_slice %4 {offsets = [1, 0], sizes = [8, 72], strides = [1, 1]} : vector<10x72xf32> to vector<8x72xf32>
    %13 = vector.extract_strided_slice %12 {offsets = [0, 0], sizes = [8, 64], strides = [1, 1]} : vector<8x72xf32> to vector<8x64xf32>
    %14 = vector.shape_cast %13 : vector<8x64xf32> to vector<8x16x4xf32>
    %15 = vector.extract_strided_slice %12 {offsets = [0, 4], sizes = [8, 64], strides = [1, 1]} : vector<8x72xf32> to vector<8x64xf32>
    %16 = vector.shape_cast %15 : vector<8x64xf32> to vector<8x16x4xf32>
    %17 = vector.extract_strided_slice %12 {offsets = [0, 8], sizes = [8, 64], strides = [1, 1]} : vector<8x72xf32> to vector<8x64xf32>
    %18 = vector.shape_cast %17 : vector<8x64xf32> to vector<8x16x4xf32>
    %19 = vector.extract_strided_slice %4 {offsets = [2, 0], sizes = [8, 72], strides = [1, 1]} : vector<10x72xf32> to vector<8x72xf32>
    %20 = vector.extract_strided_slice %19 {offsets = [0, 0], sizes = [8, 64], strides = [1, 1]} : vector<8x72xf32> to vector<8x64xf32>
    %21 = vector.shape_cast %20 : vector<8x64xf32> to vector<8x16x4xf32>
    %22 = vector.extract_strided_slice %19 {offsets = [0, 4], sizes = [8, 64], strides = [1, 1]} : vector<8x72xf32> to vector<8x64xf32>
    %23 = vector.shape_cast %22 : vector<8x64xf32> to vector<8x16x4xf32>
    %24 = vector.extract_strided_slice %19 {offsets = [0, 8], sizes = [8, 64], strides = [1, 1]} : vector<8x72xf32> to vector<8x64xf32>
    %25 = vector.shape_cast %24 : vector<8x64xf32> to vector<8x16x4xf32>
    %26 = tpu.concatenate %7, %9, %11, %14, %16, %18, %21, %23, %25 in 2 : vector<8x16x4xf32>, vector<8x16x4xf32>, vector<8x16x4xf32>, vector<8x16x4xf32>, vector<8x16x4xf32>, vector<8x16x4xf32>, vector<8x16x4xf32>, vector<8x16x4xf32>, vector<8x16x4xf32> -> vector<8x16x36xf32>
    %27 = vector.shape_cast %26 : vector<8x16x36xf32> to vector<128x36xf32>
    %c0_1 = arith.constant 0 : index
    %c0_2 = arith.constant 0 : index
    %28 = vector.load %arg3[%c0_1, %c0_2] : memref<36x128xf32, #tpu.memory_space<vmem>>, vector<36x128xf32>
    %cst = arith.constant dense<0.000000e+00> : vector<128x128xf32>
    %29 = tpu.matmul %27, %28, %cst {dimension_numbers = #tpu.dot_dimension_numbers<[1], [0], [0], [1], [0, 0, 1, 1], [], []>} : vector<128x36xf32>, vector<36x128xf32>, vector<128x128xf32> -> vector<128x128xf32>
    %cst_3 = arith.constant 0.000000e+00 : f32
    %30 = vector.broadcast %cst_3 : f32 to vector<128x128xf32>
    %31 = arith.cmpf oge, %29, %30 : vector<128x128xf32>
    %cst_4 = arith.constant 2.000000e-01 : f32
    %32 = vector.broadcast %cst_4 : f32 to vector<128x128xf32>
    %33 = arith.mulf %32, %29 : vector<128x128xf32>
    %34 = arith.select %31, %29, %33 : vector<128x128xi1>, vector<128x128xf32>
    %35 = arith.mulf %34, %34 : vector<128x128xf32>
    %cst_5 = arith.constant dense<0.000000e+00> : vector<128xf32>
    %36 = vector.multi_reduction <add>, %35, %cst_5 [1] : vector<128x128xf32> to vector<128xf32>
    %37 = vector.shape_cast %36 : vector<128xf32> to vector<128x1xf32>
    %cst_6 = arith.constant 1.250000e-01 : f32
    %38 = vector.broadcast %cst_6 : f32 to vector<128x1xf32>
    %39 = arith.mulf %37, %38 : vector<128x1xf32>
    %cst_7 = arith.constant 9.99999993E-9 : f32
    %40 = vector.broadcast %cst_7 : f32 to vector<128x1xf32>
    %41 = arith.addf %39, %40 : vector<128x1xf32>
    %42 = math.rsqrt %41 : vector<128x1xf32>
    %43 = vector.broadcast %42 : vector<128x1xf32> to vector<128x128xf32>
    %44 = arith.mulf %34, %43 : vector<128x128xf32>
    %45 = vector.shape_cast %44 : vector<128x128xf32> to vector<8x16x128xf32>
    %c0_8 = arith.constant 0 : index
    %c0_9 = arith.constant 0 : index
    %c0_10 = arith.constant 0 : index
    %c0_11 = arith.constant 0 : index
    %46 = vector.load %arg4[%c0_8, %c0_9, %c0_10, %c0_11] : memref<1x8x16x128xf32, #tpu.memory_space<vmem>>, vector<1x8x16x128xf32>
    %47 = vector.shape_cast %46 : vector<1x8x16x128xf32> to vector<8x16x128xf32>
    %48 = vector.shape_cast %45 : vector<8x16x128xf32> to vector<1x8x16x128xf32>
    tpu.vector_store %arg4[%c0_8, %c0_9, %c0_10, %c0_11], %48 {strides = array<i32>} : memref<1x8x16x128xf32, #tpu.memory_space<vmem>>, vector<1x8x16x128xf32>,
    return
  }
  func.func @transform_0(%arg0: i32, %arg1: i32) -> (i32, i32, i32) {
    %c0_i32 = arith.constant 0 : i32
    %c0_i32_0 = arith.constant 0 : i32
    %c0_i32_1 = arith.constant 0 : i32
    return %arg0, %c0_i32, %c0_i32_0 : i32, i32, i32
  }
  func.func @transform_1(%arg0: i32, %arg1: i32) -> (i32, i32) {
    %c0_i32 = arith.constant 0 : i32
    %c0_i32_0 = arith.constant 0 : i32
    %c0_i32_1 = arith.constant 0 : i32
    return %c0_i32, %c0_i32_0 : i32, i32
  }
  func.func @transform_2(%arg0: i32, %arg1: i32) -> (i32, i32, i32, i32) {
    %c0_i32 = arith.constant 0 : i32
    %c0_i32_0 = arith.constant 0 : i32
    %c0_i32_1 = arith.constant 0 : i32
    return %arg0, %arg1, %c0_i32, %c0_i32_0 : i32, i32, i32, i32
  }
}

</mosaic_0001>

<bundles_post_ra>
// kernel: tpu_custom_call.1
= control target key start
LH: loop header
LB: loop body
LE: loop exit
PB: predicated region body
PF: predicated region fallthrough
CT: control target
= control target key end

     0   :  { %s7349_s0 = inlined_call_operand.vmem [shape: f32[2,18,72], index: 0, kind: input, shape index: {}]   ;;  %s7350_s1 = inlined_call_operand.vmem [shape: f32[36,128], index: 1, kind: input, shape index: {}]   ;;  %s7351_s2 = inlined_call_operand.hbm [shape: f32[2,16,16,128], index: 2, kind: output, shape index: {}]  }
   0x1   :  { %7576 = sst [smem:[#allocation76_spill]] %s7349_s0 }
   0x2   :  { %7 = vsyncpa [#allocation3], 0 }
   0x3   :  { %9 = vsyncpa [#allocation3 + $0x1], 0  ;;  %s4584_s9 = smov 0   ;;  %s4586_s10 = smov 0  }
   0x4   :  { %s4588_s11 = smov 0   ;;  %s4590_s12 = smov 0  }
   0x5   :  { %s4592_s13 = smov 0   ;;  %s4594_s14 = smov 0  }
   0x6   :  { %s4596_s15 = smov 0   ;;  %s4598_s16 = smov 0  }
   0x7 LB: > { %s4220_s17 = sadd.s32 4294967295, %s4540_s16   ;;  %s4221_s18 = sadd.s32 4294967294, %s4540_s16   ;;  %s4540_s16 = sphi %s4598_s16, %s15_s16   ;;  %s4536_s15 = sphi %s4596_s15, %s7978_s15   ;;  %s4532_s14 = sphi %s4594_s14, %s7977_s14   ;;  %s4528_s13 = sphi %s4592_s13, %s7976_s13   ;;  %s4524_s12 = sphi %s4590_s12, %s7975_s12   ;;  %s4520_s11 = sphi %s4588_s11, %s7974_s11   ;;  %s4516_s10 = sphi %s4586_s10, %s7973_s10   ;;  %s4512_s9 = sphi %s4584_s9, %s7972_s9  }
   0x8   : > { %s24_s19 = sadd.s32 1, %s4532_s14  ;;  %s27_s20 = sadd.s32 1, %s4536_s15 }
   0x9   : > { %p25_p0 = scmp.ge.s32.totalorder %s24_s19, 2  ;;  %p93_p1 = scmp.ne.s32.totalorder %s4520_s11, %s4516_s10 }
   0xa   : > { %p94_p2 = scmp.eq.s32.totalorder %s4220_s17, 3  ;;  %p99_p5 = scmp.ne.s32.totalorder %s4516_s10, %s4512_s9 }
   0xb   : > { %s7980_s19 = smov (%p25_p0, %s24_s19), 0  ;;  %s7982_s20 = smov (!%p25_p0, %s27_s20), %s4536_s15 }
   0xc   : > { %s79_s21 = ssub.s32 %s4532_s14, %s7980_s19  ;;  %p4635_p3 = por %p94_p2, %p93_p1 }
   0xd   : > { %p29_p4 = scmp.ge.s32.totalorder %s7982_s20, 2  ;;  %p100_p6 = scmp.eq.s32.totalorder %s4221_s18, 3 }
   0xe   : > { %p4224_p7 = scmp.ge.s32.totalorder %s4540_s16, 1  ;;  %p129_p9 = scmp.lt.s32.totalorder %s4540_s16, 5 }
   0xf   : > { %s7984_s20 = smov (%p29_p4, %s7982_s20), 0  ;;  %p4644_p8 = por %p100_p6, %p99_p5 }
  0x10   : > { %s78_s24 = ssub.s32 %s4536_s15, %s7984_s20  ;;  %s83_s25 = sadd.s32 1, %s4520_s11 }
  0x11   : > { %s80_s26 = sor.u32 %s79_s21, %s78_s24  ;;  %p130_p10 = pnand %p4224_p7, %p129_p9 }
  0x12   : > { %p81_p11 = scmp.eq.s32.totalorder %s80_s26, 0 }
  0x13   : > { %133 = sbr.rel (%p130_p10) target bundleno = 1108 (0x454), region = 28 }
  0x14   : > { %s4653_s27 = scalar_select %p81_p11, %s4520_s11, %s83_s25  }
  0x18   : > { %p151_p12 = scmp.lt.s32.totalorder %s4528_s13, 1  ;;  %s4227_s30 = sshll.u32 %s4524_s12, 3  ;;  %vm1144_vm0 = vcmask 1046528   ;;  %v4557_v5 = vmov 1983009808   ;;  %v212_v7 = vlaneseq  ;;  %vm2121_vm1 = vcmask 1045504  }
  0x19   : > { %s7579_s0 = sld [smem:[#allocation76_spill]]  ;;  %s4542_s7 = smov 116   ;;  %v210_v6 = vunpack.c.l.s4 %v4557_v5  ;;  %v4558_v14 = vmov 1934713408   ;;  %vm3800_vm2 = vcmask 1043456   ;;  %vm3610_vm3 = vcmask 31744  }
  0x1a   : > { %s152_s28 = scalar_select %p151_p12, %s4528_s13, 1  ;;  %v213_v11 = vshrl.u32 %v212_v7, 7  ;;  %v274_v15 = vunpack.c.l.s4 %v4558_v14  ;;  %vm3627_vm4 = vcmask 64512   ;;  %vm3644_vm5 = vcmask 97280  }
  0x1b   : > { %s4543_s8 = smov 124   ;;  %s7352_s17 = smov 112   ;;  %v211_v10 = vunpack.c.0.s8 %v210_v6  ;;  %vm3661_vm6 = vcmask 130048   ;;  %vm3678_vm7 = vcmask 162816   ;;  %vm3695_vm8 = vcmask 195584  }
  0x1c   : > { %s4318_s29 = smul.u32 24, %s152_s28  ;;  %s4545_s18 = smov 120   ;;  %v275_v23 = vunpack.c.0.s8 %v274_v15  ;;  %vm3712_vm9 = vcmask 228352   ;;  %vm3729_vm10 = vcmask 261120   ;;  %vm3751_vm11 = vcmask 293888  }
  0x1d   : > { %s4546_s21 = smov 104   ;;  %s4547_s24 = smov 108   ;;  %v4728_v16 = vsub.s32 %v211_v10, %v213_v11 }
  0x1e   : > { %s4548_s25 = smov 96   ;;  %s4549_s26 = smov 100   ;;  %v4775_v39 = vsub.s32 %v275_v23, %v213_v11 }
  0x1f   : > { %s155_s5 = scalar_lea.vmem %s7579_s0, %s4318_s29  ;;  %s4550_s28 = smov 88   ;;  %7584 = vst [vmem:[#allocation8_spill] sm:$0xff] %v4728_v16 }
  0x20   : > { %s4661_s6 = scalar_lea.vmem %s155_s5, %s4227_s30  ;;  %s4551_s29 = smov 92  }
  0x21   : > { %v4664_v0 = vld [vmem:[%s4661_s6] sm:$0xff]  ;;  %s4552_s30 = smov 80   ;;  %s4553_s3 = smov 84   ;;  %v4685_v1 = vld [vmem:[%s4661_s6 + $0x8] sm:$0x3] }
  0x22   : > { %168 = vrot.lane.b32.xlu1 %v4664_v0, %s4542_s7  ;;  %162 = vrot.lane.b32.xlu0 %v4664_v0, %s4543_s8  ;;  %s4554_s4 = smov 72   ;;  %s4555_s5 = smov 76   ;;  %v1145_v2 = vrot.slane %v4664_v0, 1  ;;  %v1146_v3 = vrot.slane %v4685_v1, 1  ;;  %v2122_v26 = vrot.slane %v4664_v0, 2  ;;  %v2123_v27 = vrot.slane %v4685_v1, 2 }
  0x23   : > { %s7580_s0 = smov 112   ;;  %s4560_s6 = smov 8  }
  0x24   : > { %v4710_v4 = vsel %vm1144_vm0, %v1145_v2, %v1146_v3  ;;  %v4773_v38 = vsel %vm2121_vm1, %v2122_v26, %v2123_v27 }
  0x25   : > { %7581 = vst [vmem:[#allocation5_spill] sm:$0xff] %v4710_v4  ;;  %7585 = vst [vmem:[#allocation9_spill] sm:$0xff] %v4773_v38 }
  0x26   : > { %171 = vrot.lane.b32.xlu1 %v4664_v0, %s7352_s17  ;;  %165 = vrot.lane.b32.xlu0 %v4664_v0, %s4545_s18  ;;  %s4556_s17 = smov 68  }
  0x2a   : > { %177 = vrot.lane.b32.xlu1 %v4664_v0, %s4546_s21  ;;  %174 = vrot.lane.b32.xlu0 %v4664_v0, %s4547_s24 }
  0x2e   : > { %183 = vrot.lane.b32.xlu1 %v4664_v0, %s4548_s25  ;;  %180 = vrot.lane.b32.xlu0 %v4664_v0, %s4549_s26 }
  0x32   : > { %189 = vrot.lane.b32.xlu1 %v4664_v0, %s4550_s28  ;;  %186 = vrot.lane.b32.xlu0 %v4664_v0, %s4551_s29 }
  0x36   : > { %195 = vrot.lane.b32.xlu1 %v4664_v0, %s4552_s30  ;;  %192 = vrot.lane.b32.xlu0 %v4664_v0, %s4553_s3 }
  0x3a   : > { %201 = vrot.lane.b32.xlu1 %v4664_v0, %s4554_s4  ;;  %198 = vrot.lane.b32.xlu0 %v4664_v0, %s4555_s5 }
  0x3e   : > { %1114 = vrot.lane.b32.xlu1 %v4685_v1, %s4543_s8  ;;  %204 = vrot.lane.b32.xlu0 %v4664_v0, %s4556_s17 }
  0x42   : > { %1118 = vrot.lane.b32.xlu1 %v4685_v1, %s4542_s7  ;;  %1116 = vrot.lane.b32.xlu0 %v4685_v1, %s4545_s18  ;;  %s4561_s7 = smov 12  }
  0x46   : > { %1122 = vrot.lane.b32.xlu1 %v4685_v1, %s4547_s24  ;;  %1120 = vrot.lane.b32.xlu0 %v4685_v1, %s7580_s0  ;;  %s4559_s0 = smov 4  }
  0x4a   : > { %1126 = vrot.lane.b32.xlu1 %v4685_v1, %s4549_s26  ;;  %1124 = vrot.lane.b32.xlu0 %v4685_v1, %s4546_s21  ;;  %s4565_s21 = smov 28  }
  0x4e   : > { %1130 = vrot.lane.b32.xlu1 %v4685_v1, %s4551_s29  ;;  %1128 = vrot.lane.b32.xlu0 %v4685_v1, %s4548_s25 }
  0x52   : > { %1134 = vrot.lane.b32.xlu1 %v4685_v1, %s4553_s3  ;;  %1132 = vrot.lane.b32.xlu0 %v4685_v1, %s4550_s28  ;;  %s4566_s3 = smov 32  }
  0x56   : > { %1138 = vrot.lane.b32.xlu1 %v4685_v1, %s4555_s5  ;;  %1136 = vrot.lane.b32.xlu0 %v4685_v1, %s4552_s30 }
  0x5a   : > { %1142 = vrot.lane.b32.xlu1 %v4685_v1, %s4556_s17  ;;  %1140 = vrot.lane.b32.xlu0 %v4685_v1, %s4554_s4  ;;  %s4563_s17 = smov 20   ;;  %s4567_s4 = smov [#allocation2]  }
  0x5b   : > { %s4452_s5 = sshll.u32 %s4567_s4, 4  ;;  %s4453_s5 = int_to_ptr.vmem [resolvable:$false] %s4452_s5 }
  0x5c   : > { %s4454_s24 = scalar_lea.vmem %s4453_s5, 4096 }
  0x5e   : > { %1481 = vrot.lane.b32.xlu0 %v4710_v4, %s4543_s8 }
  0x94   : > { %v4714_v8 = vpop.permute.xlu1 %168  ;;  %v4716_v9 = vpop.permute.xlu0 %162 }
  0x95   : > { %7582 = vst [vmem:[#allocation6_spill] sm:$0xff] %v4716_v9  ;;  %479 = vrot.lane.b32.xlu1 %v4716_v9, %s4543_s8  ;;  %v224_v17 = vcombine.high %v4716_v9, %v4714_v8  ;;  %v223_v18 = vcombine.low %v4716_v9, %v4714_v8  ;;  %v1148_v36 = vrot.slane %v4716_v9, 1  ;;  %v1154_v37 = vrot.slane %v4714_v8, 1 }
  0x96   : > { %v2125_v40 = vrot.slane %v4716_v9, 2  ;;  %v2131_v41 = vrot.slane %v4714_v8, 2 }
  0x97   : > { %v238_v28 = vrot.slane %v224_v17, %v4728_v16  ;;  %v231_v29 = vrot.slane %v223_v18, %v4728_v16 }
  0x98   : > { %v4720_v12 = vpop.permute.xlu1 %171  ;;  %v4722_v13 = vpop.permute.xlu0 %165 }
  0x99   : > { %7583 = vst [vmem:[#allocation7_spill] sm:$0xff] %v4722_v13  ;;  %483 = vrot.lane.b32.xlu1 %v4714_v8, %s4543_s8  ;;  %481 = vrot.lane.b32.xlu0 %v4722_v13, %s4543_s8  ;;  %v208_v19 = vcombine.high %v4664_v0, %v4722_v13  ;;  %v207_v20 = vcombine.low %v4664_v0, %v4722_v13  ;;  %v1151_v44 = vrot.slane %v4722_v13, 1  ;;  %v1157_v45 = vrot.slane %v4720_v12, 1 }
  0x9a   : > { %v2128_v56 = vrot.slane %v4722_v13, 2  ;;  %v2134_v57 = vrot.slane %v4720_v12, 2 }
  0x9b   : > { %v4743_v24 = vrot.slane %v208_v19, %v4728_v16  ;;  %v4746_v25 = vrot.slane %v207_v20, %v4728_v16 }
  0x9c   : > { %v4738_v21 = vpop.permute.xlu1 %177  ;;  %v4740_v22 = vpop.permute.xlu0 %174 }
  0x9d   : > { %487 = vrot.lane.b32.xlu1 %v4740_v22, %s4543_s8  ;;  %485 = vrot.lane.b32.xlu0 %v4720_v12, %s4543_s8  ;;  %v288_v30 = vcombine.high %v4743_v24, %v238_v28  ;;  %v272_v31 = vcombine.high %v4746_v25, %v231_v29  ;;  %v240_v34 = vcombine.high %v4720_v12, %v4738_v21  ;;  %v1160_v54 = vrot.slane %v4740_v22, 1 }
  0x9e   : > { %v239_v35 = vcombine.low %v4720_v12, %v4738_v21  ;;  %v287_v46 = vcombine.low %v4743_v24, %v238_v28  ;;  %v271_v47 = vcombine.low %v4746_v25, %v231_v29  ;;  %v2137_v58 = vrot.slane %v4740_v22, 2 }
  0x9f   : > { %v254_v50 = vrot.slane %v240_v34, %v4728_v16  ;;  %v4838_v20 = vrot.slane %v288_v30, %v4775_v39  ;;  %v4841_v23 = vrot.slane %v272_v31, %v4775_v39 }
  0xa0   : > { %v4758_v32 = vpop.permute.xlu1 %183  ;;  %v4760_v33 = vpop.permute.xlu0 %180  ;;  %v247_v52 = vrot.slane %v239_v35, %v4728_v16  ;;  %v4806_v62 = vrot.slane %v287_v46, %v4775_v39  ;;  %v4809_v63 = vrot.slane %v271_v47, %v4775_v39 }
  0xa1   : > { %491 = vrot.lane.b32.xlu1 %v4760_v33, %s4543_s8  ;;  %489 = vrot.lane.b32.xlu0 %v4738_v21, %s4543_s8  ;;  %v256_v42 = vcombine.high %v4740_v22, %v4760_v33  ;;  %v255_v43 = vcombine.low %v4740_v22, %v4760_v33  ;;  %7590 = vst [vmem:[#allocation14_spill] sm:$0xff] %v4838_v20  ;;  %7591 = vst [vmem:[#allocation15_spill] sm:$0xff] %v4841_v23 }
  0xa2   : > { %7586 = vst [vmem:[#allocation10_spill] sm:$0xff] %v4806_v62  ;;  %7587 = vst [vmem:[#allocation11_spill] sm:$0xff] %v4809_v63 }
  0xa3   : > { %v270_v51 = vrot.slane %v256_v42, %v4728_v16  ;;  %v263_v53 = vrot.slane %v255_v43, %v4728_v16 }
  0xa4   : > { %v4787_v48 = vpop.permute.xlu1 %189  ;;  %v4789_v49 = vpop.permute.xlu0 %186 }
  0xa5   : > { %495 = vrot.lane.b32.xlu1 %v4789_v49, %s4543_s8  ;;  %493 = vrot.lane.b32.xlu0 %v4758_v32, %s4543_s8  ;;  %v319_v60 = vcombine.low %v254_v50, %v270_v51  ;;  %v303_v61 = vcombine.low %v247_v52, %v263_v53  ;;  %v320_v0 = vcombine.high %v254_v50, %v270_v51 }
  0xa6   : > { %v304_v1 = vcombine.high %v247_v52, %v263_v53  ;;  %v344_v10 = vcombine.high %v4758_v32, %v4787_v48  ;;  %v343_v17 = vcombine.low %v4758_v32, %v4787_v48 }
  0xa7   : > { %v4817_v6 = vrot.slane %v319_v60, %v4775_v39  ;;  %v4820_v7 = vrot.slane %v303_v61, %v4775_v39  ;;  %v4848_v26 = vrot.slane %v320_v0, %v4775_v39 }
  0xa8   : > { %v4811_v2 = vpop.permute.xlu1 %195  ;;  %v4813_v3 = vpop.permute.xlu0 %192  ;;  %v4851_v27 = vrot.slane %v304_v1, %v4775_v39  ;;  %v4859_v31 = vrot.slane %v344_v10, %v4728_v16  ;;  %v4875_v47 = vrot.slane %v343_v17, %v4728_v16 }
  0xa9   : > { %7588 = vst [vmem:[#allocation12_spill] sm:$0xff] %v4817_v6  ;;  %7589 = vst [vmem:[#allocation13_spill] sm:$0xff] %v4820_v7  ;;  %499 = vrot.lane.b32.xlu1 %v4813_v3, %s4543_s8  ;;  %497 = vrot.lane.b32.xlu0 %v4787_v48, %s4543_s8  ;;  %v360_v18 = vcombine.high %v4789_v49, %v4813_v3  ;;  %v359_v19 = vcombine.low %v4789_v49, %v4813_v3  ;;  %v7613_v7 = vrot.slane %v4789_v49, 1 }
  0xaa   : > { %7592 = vst [vmem:[#allocation16_spill] sm:$0xff] %v4848_v26  ;;  %7593 = vst [vmem:[#allocation17_spill] sm:$0xff] %v4851_v27 }
  0xab   : > { %v4862_v34 = vrot.slane %v360_v18, %v4728_v16  ;;  %v4865_v35 = vrot.slane %v359_v19, %v4728_v16 }
  0xac   : > { %v4853_v28 = vpop.permute.xlu1 %201  ;;  %v4855_v29 = vpop.permute.xlu0 %198 }
  0xad   : > { %505 = vrot.lane.b32.xlu1 %v4853_v28, %s4543_s8  ;;  %501 = vrot.lane.b32.xlu0 %v4811_v2, %s4543_s8  ;;  %v376_v52 = vcombine.high %v4811_v2, %v4853_v28  ;;  %v423_v53 = vcombine.low %v4859_v31, %v4862_v34  ;;  %v375_v24 = vcombine.low %v4811_v2, %v4853_v28 }
  0xaf   : > { %v4908_v25 = vrot.slane %v376_v52, %v4728_v16  ;;  %v4915_v61 = vrot.slane %v423_v53, %v4775_v39  ;;  %v4926_v15 = vrot.slane %v375_v24, %v4728_v16 }
  0xb0   : > { %v1115_v10 = vpop.permute.xlu1 %1114  ;;  %v4891_v17 = vpop.permute.xlu0 %204 }
  0xb1   : > { %796 = vrot.lane.b32.xlu1 %v4716_v9, %s4545_s18  ;;  %503 = vrot.lane.b32.xlu0 %v4855_v29, %s4543_s8  ;;  %v1149_v51 = vrot.slane %v1115_v10, 1  ;;  %v392_v18 = vcombine.high %v4855_v29, %v4891_v17  ;;  %v391_v46 = vcombine.low %v4855_v29, %v4891_v17  ;;  %v2126_v19 = vrot.slane %v1115_v10, 2  ;;  %7594 = vst [vmem:[#allocation18_spill] sm:$0xff] %v4915_v61 }
  0xb2   : > { %v7628_v9 = vrot.slane %v4855_v29, 1 }
  0xb3   : > { %v4923_v50 = vrot.slane %v392_v18, %v4728_v16  ;;  %v4929_v10 = vrot.slane %v391_v46, %v4728_v16  ;;  %v4938_v18 = vsel %vm1144_vm0, %v1148_v36, %v1149_v51  ;;  %v4958_v36 = vsel %vm2121_vm1, %v2125_v40, %v2126_v19 }
  0xb4   : > { %v1119_v60 = vpop.permute.xlu1 %1118  ;;  %v1117_v42 = vpop.permute.xlu0 %1116  ;;  %7595 = vst [vmem:[#allocation19_spill] sm:$0xff] %v4938_v18  ;;  %7598 = vst [vmem:[#allocation22_spill] sm:$0xff] %v4958_v36 }
  0xb5   : > { %v1155_v53 = vrot.slane %v1119_v60, 1  ;;  %v2132_v43 = vrot.slane %v1119_v60, 2  ;;  %v1152_v11 = vrot.slane %v1117_v42, 1  ;;  %v2129_v1 = vrot.slane %v1117_v42, 2  ;;  %800 = vrot.lane.b32.xlu1 %v4714_v8, %s4545_s18  ;;  %507 = vrot.lane.b32.xlu0 %v4891_v17, %s4543_s8 }
  0xb7   : > { %v4948_v42 = vsel %vm1144_vm0, %v1154_v37, %v1155_v53  ;;  %v4953_v0 = vsel %vm1144_vm0, %v1151_v44, %v1152_v11  ;;  %v4963_v51 = vsel %vm2121_vm1, %v2131_v41, %v2132_v43  ;;  %v4980_v41 = vsel %vm2121_vm1, %v2128_v56, %v2129_v1 }
  0xb8   : > { %7596 = vst [vmem:[#allocation20_spill] sm:$0xff] %v4948_v42  ;;  %7597 = vst [vmem:[#allocation21_spill] sm:$0xff] %v4953_v0  ;;  %v1123_v60 = vpop.permute.xlu1 %1122  ;;  %v1121_v46 = vpop.permute.xlu0 %1120  ;;  %v1225_v37 = vcombine.low %v4938_v18, %v4948_v42  ;;  %v1226_v53 = vcombine.high %v4938_v18, %v4948_v42  ;;  %v1209_v44 = vcombine.low %v4710_v4, %v4953_v0 }
  0xb9   : > { %7599 = vst [vmem:[#allocation23_spill] sm:$0xff] %v4963_v51  ;;  %v1210_v40 = vcombine.high %v4710_v4, %v4953_v0  ;;  %v1161_v11 = vrot.slane %v1123_v60, 1  ;;  %v2138_v19 = vrot.slane %v1123_v60, 2  ;;  %v1158_v8 = vrot.slane %v1121_v46, 1  ;;  %804 = vrot.lane.b32.xlu1 %v4740_v22, %s4545_s18  ;;  %798 = vrot.lane.b32.xlu0 %v4722_v13, %s4545_s18  ;;  %7600 = vst [vmem:[#allocation24_spill] sm:$0xff] %v4980_v41 }
  0xba   : > { %v2135_v43 = vrot.slane %v1121_v46, 2  ;;  %v4983_v24 = vrot.slane %v1225_v37, %v4728_v16  ;;  %v4986_v52 = vrot.slane %v1226_v53, %v4728_v16  ;;  %v4989_v60 = vrot.slane %v1209_v44, %v4728_v16 }
  0xbb   : > { %v4992_v30 = vrot.slane %v1210_v40, %v4728_v16  ;;  %v4997_v59 = vsel %vm1144_vm0, %v1160_v54, %v1161_v11  ;;  %v2202_v56 = vcombine.low %v4958_v36, %v4963_v51  ;;  %v2203_v1 = vcombine.high %v4958_v36, %v4963_v51 }
  0xbc   : > { %7601 = vst [vmem:[#allocation25_spill] sm:$0xff] %v4997_v59  ;;  %v1127_v46 = vpop.permute.xlu1 %1126  ;;  %v1125_v37 = vpop.permute.xlu0 %1124  ;;  %v5006_v53 = vsel %vm1144_vm0, %v1157_v45, %v1158_v8  ;;  %v2186_v44 = vcombine.low %v4773_v38, %v4980_v41  ;;  %v2187_v54 = vcombine.high %v4773_v38, %v4980_v41  ;;  %v5015_v40 = vsel %vm2121_vm1, %v2137_v58, %v2138_v19 }
  0xbd   : > { %7602 = vst [vmem:[#allocation26_spill] sm:$0xff] %v5006_v53  ;;  %7603 = vst [vmem:[#allocation27_spill] sm:$0xff] %v5015_v40  ;;  %v1167_v11 = vrot.slane %v1127_v46, 1  ;;  %v2144_v14 = vrot.slane %v1127_v46, 2  ;;  %v1164_v55 = vrot.slane %v1125_v37, 1  ;;  %v2141_v5 = vrot.slane %v1125_v37, 2  ;;  %808 = vrot.lane.b32.xlu1 %v4760_v33, %s4545_s18  ;;  %802 = vrot.lane.b32.xlu0 %v4720_v12, %s4545_s18 }
  0xbe   : > { %v5022_v45 = vrot.slane %v2202_v56, %v4728_v16  ;;  %v5025_v8 = vrot.slane %v2203_v1, %v4728_v16  ;;  %v5028_v22 = vrot.slane %v2186_v44, %v4728_v16  ;;  %v5033_v58 = vsel %vm2121_vm1, %v2134_v57, %v2135_v43 }
  0xbf   : > { %7604 = vst [vmem:[#allocation28_spill] sm:$0xff] %v5033_v58  ;;  %v7605_v19 = vrot.slane %v4760_v33, 1  ;;  %v7607_v37 = vrot.slane %v4738_v21, 1  ;;  %v5046_v1 = vrot.slane %v2187_v54, %v4728_v16  ;;  %v7609_v44 = vrot.slane %v4760_v33, 2 }
  0xc0   : > { %v1131_v57 = vpop.permute.xlu1 %1130  ;;  %v1129_v43 = vpop.permute.xlu0 %1128 }
  0xc1   : > { %v5038_v46 = vsel %vm1144_vm0, %v7605_v19, %v1167_v11  ;;  %v5043_v56 = vsel %vm1144_vm0, %v7607_v37, %v1164_v55  ;;  %v5051_v12 = vsel %vm2121_vm1, %v7609_v44, %v2144_v14  ;;  %v1173_v19 = vrot.slane %v1131_v57, 1  ;;  %812 = vrot.lane.b32.xlu1 %v4789_v49, %s4545_s18  ;;  %806 = vrot.lane.b32.xlu0 %v4738_v21, %s4545_s18 }
  0xc2   : > { %7606 = vst [vmem:[#allocation29_spill] sm:$0xff] %v5038_v46  ;;  %7608 = vst [vmem:[#allocation30_spill] sm:$0xff] %v5043_v56  ;;  %v1257_v27 = vcombine.low %v4997_v59, %v5038_v46  ;;  %v1258_v11 = vcombine.high %v4997_v59, %v5038_v46  ;;  %v1241_v55 = vcombine.low %v5006_v53, %v5043_v56  ;;  %v2150_v37 = vrot.slane %v1131_v57, 2 }
  0xc3   : > { %7610 = vst [vmem:[#allocation31_spill] sm:$0xff] %v5051_v12  ;;  %v1242_v54 = vcombine.high %v5006_v53, %v5043_v56  ;;  %v1170_v33 = vrot.slane %v1129_v43, 1  ;;  %v7611_v14 = vrot.slane %v4738_v21, 2  ;;  %v2147_v23 = vrot.slane %v1129_v43, 2 }
  0xc4   : > { %v5071_v26 = vrot.slane %v1257_v27, %v4728_v16  ;;  %v5074_v20 = vrot.slane %v1258_v11, %v4728_v16  ;;  %v5077_v57 = vrot.slane %v1241_v55, %v4728_v16  ;;  %v5085_v21 = vsel %vm1144_vm0, %v7613_v7, %v1173_v19  ;;  %v1135_v43 = vpop.permute.xlu1 %1134  ;;  %v1133_v11 = vpop.permute.xlu0 %1132 }
  0xc5   : > { %v5068_v44 = vsel %vm2121_vm1, %v7611_v14, %v2141_v5  ;;  %v5080_v63 = vrot.slane %v1242_v54, %v4728_v16  ;;  %v2234_v5 = vcombine.low %v5015_v40, %v5051_v12  ;;  %v2235_v27 = vcombine.high %v5015_v40, %v5051_v12  ;;  %816 = vrot.lane.b32.xlu1 %v4813_v3, %s4545_s18 }
  0xc6   : > { %7612 = vst [vmem:[#allocation32_spill] sm:$0xff] %v5068_v44  ;;  %v7614_v14 = vrot.slane %v4758_v32, 1  ;;  %v2218_v54 = vcombine.low %v5033_v58, %v5068_v44  ;;  %v2219_v7 = vcombine.high %v5033_v58, %v5068_v44  ;;  %v7615_v19 = vrot.slane %v4789_v49, 2  ;;  %810 = vrot.lane.b32.xlu0 %v4758_v32, %s4545_s18 }
  0xc7   : > { %v1179_v6 = vrot.slane %v1135_v43, 1  ;;  %v2156_v13 = vrot.slane %v1135_v43, 2  ;;  %v1176_v12 = vrot.slane %v1133_v11, 1  ;;  %v2153_v40 = vrot.slane %v1133_v11, 2 }
  0xc8   : > { %v5094_v55 = vsel %vm1144_vm0, %v7614_v14, %v1170_v33  ;;  %v5103_v62 = vsel %vm2121_vm1, %v7615_v19, %v2150_v37  ;;  %v5110_v33 = vrot.slane %v2234_v5, %v4728_v16  ;;  %v5113_v14 = vrot.slane %v2235_v27, %v4728_v16 }
  0xc9   : > { %7616 = vst [vmem:[#allocation33_spill] sm:$0xff] %v5103_v62  ;;  %v5116_v49 = vrot.slane %v2218_v54, %v4728_v16  ;;  %v7619_v37 = vrot.slane %v4758_v32, 2  ;;  %v7621_v11 = vrot.slane %v4813_v3, 1  ;;  %v7622_v44 = vrot.slane %v4787_v48, 1  ;;  %820 = vrot.lane.b32.xlu1 %v4855_v29, %s4545_s18 }
  0xca   : > { %7617 = vst [vmem:[#allocation34_spill] sm:$0xff] %v5110_v33  ;;  %v5134_v27 = vrot.slane %v2219_v7, %v4728_v16  ;;  %v7624_v54 = vrot.slane %v4813_v3, 2  ;;  %814 = vrot.lane.b32.xlu0 %v4787_v48, %s4545_s18 }
  0xcb   : > { %7618 = vst [vmem:[#allocation35_spill] sm:$0xff] %v5116_v49  ;;  %v5121_v43 = vsel %vm2121_vm1, %v7619_v37, %v2147_v23  ;;  %v5126_v19 = vsel %vm1144_vm0, %v7621_v11, %v1179_v6  ;;  %v5131_v5 = vsel %vm1144_vm0, %v7622_v44, %v1176_v12  ;;  %v1139_v23 = vpop.permute.xlu1 %1138  ;;  %v1137_v37 = vpop.permute.xlu0 %1136 }
  0xcc   : > { %7620 = vst [vmem:[#allocation36_spill] sm:$0xff] %v5121_v43  ;;  %7623 = vst [vmem:[#allocation37_spill] sm:$0xff] %v5131_v5  ;;  %v5139_v32 = vsel %vm2121_vm1, %v7624_v54, %v2156_v13  ;;  %v1361_v58 = vcombine.low %v5085_v21, %v5126_v19  ;;  %v1362_v6 = vcombine.high %v5085_v21, %v5126_v19  ;;  %v1185_v7 = vrot.slane %v1139_v23, 1 }
  0xcd   : > { %7625 = vst [vmem:[#allocation38_spill] sm:$0xff] %v5139_v32  ;;  %v1345_v12 = vcombine.low %v5094_v55, %v5131_v5  ;;  %v1346_v44 = vcombine.high %v5094_v55, %v5131_v5  ;;  %v2162_v11 = vrot.slane %v1139_v23, 2  ;;  %v1182_v3 = vrot.slane %v1137_v37, 1  ;;  %824 = vrot.lane.b32.xlu1 %v4891_v17, %s4545_s18 }
  0xce   : > { %v7626_v13 = vrot.slane %v4787_v48, 2  ;;  %v2159_v41 = vrot.slane %v1137_v37, 2  ;;  %v5159_v51 = vrot.slane %v1361_v58, %v4728_v16  ;;  %v5162_v38 = vrot.slane %v1362_v6, %v4728_v16  ;;  %818 = vrot.lane.b32.xlu0 %v4811_v2, %s4545_s18 }
  0xcf   : > { %v5165_v23 = vrot.slane %v1345_v12, %v4728_v16  ;;  %v5168_v36 = vrot.slane %v1346_v44, %v4728_v16  ;;  %v5173_v48 = vsel %vm1144_vm0, %v7628_v9, %v1185_v7  ;;  %v2339_v58 = vcombine.high %v5103_v62, %v5139_v32  ;;  %v1143_v37 = vpop.permute.xlu1 %1142  ;;  %v1141_v6 = vpop.permute.xlu0 %1140 }
  0xd0   : > { %v5156_v54 = vsel %vm2121_vm1, %v7626_v13, %v2153_v40  ;;  %7629 = vst [vmem:[#allocation40_spill] sm:$0xff] %v5173_v48  ;;  %v2338_v40 = vcombine.low %v5103_v62, %v5139_v32  ;;  %v7630_v13 = vrot.slane %v4811_v2, 1  ;;  %v7632_v7 = vrot.slane %v4855_v29, 2 }
  0xd1   : > { %7627 = vst [vmem:[#allocation39_spill] sm:$0xff] %v5156_v54  ;;  %v2322_v44 = vcombine.low %v5121_v43, %v5156_v54  ;;  %v2323_v9 = vcombine.high %v5121_v43, %v5156_v54  ;;  %v1191_v61 = vrot.slane %v1143_v37, 1  ;;  %v2168_v32 = vrot.slane %v1143_v37, 2  ;;  %1483 = vrot.lane.b32.xlu1 %v4938_v18, %s4543_s8 }
  0xd2   : > { %v5182_v12 = vsel %vm1144_vm0, %v7630_v13, %v1182_v3  ;;  %v5191_v4 = vsel %vm2121_vm1, %v7632_v7, %v2162_v11  ;;  %v1188_v62 = vrot.slane %v1141_v6, 1  ;;  %v2165_v5 = vrot.slane %v1141_v6, 2  ;;  %822 = vrot.lane.b32.xlu0 %v4853_v28, %s4545_s18 }
  0xd3   : > { %7631 = vst [vmem:[#allocation41_spill] sm:$0xff] %v5182_v12  ;;  %7633 = vst [vmem:[#allocation42_spill] sm:$0xff] %v5191_v4  ;;  %v5198_v3 = vrot.slane %v2338_v40, %v4728_v16  ;;  %v5201_v13 = vrot.slane %v2339_v58, %v4728_v16  ;;  %v5204_v29 = vrot.slane %v2322_v44, %v4728_v16  ;;  %v7634_v11 = vrot.slane %v4811_v2, 2 }
  0xd4   : > { %v7636_v6 = vrot.slane %v4891_v17, 1  ;;  %v7638_v54 = vrot.slane %v4853_v28, 1  ;;  %v7640_v58 = vrot.slane %v4891_v17, 2  ;;  %v7642_v2 = vrot.slane %v4853_v28, 2 }
  0xd5   : > { %v5209_v37 = vsel %vm2121_vm1, %v7634_v11, %v2159_v41  ;;  %v5259_v28 = vrot.slane %v2323_v9, %v4728_v16  ;;  %v1273_v9 = vcombine.low %v4989_v60, %v4983_v24  ;;  %1487 = vrot.lane.b32.xlu1 %v4948_v42, %s4543_s8 }
  0xd6   : > { %7635 = vst [vmem:[#allocation43_spill] sm:$0xff] %v5209_v37  ;;  %v5214_v7 = vsel %vm1144_vm0, %v7636_v6, %v1191_v61  ;;  %v5219_v40 = vsel %vm1144_vm0, %v7638_v54, %v1188_v62  ;;  %v5224_v44 = vsel %vm2121_vm1, %v7640_v58, %v2168_v32  ;;  %v5229_v41 = vsel %vm2121_vm1, %v7642_v2, %v2165_v5 }
  0xd7   : > { %7637 = vst [vmem:[#allocation44_spill] sm:$0xff] %v5214_v7  ;;  %7639 = vst [vmem:[#allocation45_spill] sm:$0xff] %v5219_v40  ;;  %v1393_v11 = vcombine.low %v5173_v48, %v5214_v7  ;;  %v1394_v61 = vcombine.high %v5173_v48, %v5214_v7  ;;  %v1377_v62 = vcombine.low %v5182_v12, %v5219_v40  ;;  %1485 = vrot.lane.b32.xlu0 %v4953_v0, %s4543_s8 }
  0xd8   : > { %7641 = vst [vmem:[#allocation46_spill] sm:$0xff] %v5224_v44  ;;  %7643 = vst [vmem:[#allocation47_spill] sm:$0xff] %v5229_v41  ;;  %v1378_v17 = vcombine.high %v5182_v12, %v5219_v40  ;;  %v2370_v5 = vcombine.low %v5191_v4, %v5224_v44  ;;  %v2371_v32 = vcombine.high %v5191_v4, %v5224_v44 }
  0xd9   : > { %v2354_v54 = vcombine.low %v5209_v37, %v5229_v41  ;;  %v5250_v6 = vrot.slane %v1393_v11, %v4728_v16  ;;  %v5253_v58 = vrot.slane %v1394_v61, %v4728_v16  ;;  %v5262_v43 = vrot.slane %v1377_v62, %v4728_v16  ;;  %1491 = vrot.lane.b32.xlu1 %v4997_v59, %s4543_s8 }
  0xda   : > { %v5256_v2 = vrot.slane %v1378_v17, %v4728_v16  ;;  %v5265_v44 = vrot.slane %v2370_v5, %v4728_v16  ;;  %v5268_v4 = vrot.slane %v2371_v32, %v4728_v16  ;;  %v2355_v11 = vcombine.high %v5209_v37, %v5229_v41 }
  0xdb   : > { %v1289_v61 = vcombine.low %v4992_v30, %v4986_v52  ;;  %v1321_v17 = vcombine.low %v5080_v63, %v5074_v20  ;;  %v1305_v62 = vcombine.low %v5077_v57, %v5071_v26  ;;  %v5285_v5 = vrot.slane %v2354_v54, %v4728_v16  ;;  %1489 = vrot.lane.b32.xlu0 %v5006_v53, %s4543_s8 }
  0xdc   : > { %v1425_v32 = vcombine.low %v5168_v36, %v5162_v38  ;;  %v1457_v41 = vcombine.low %v5256_v2, %v5253_v58  ;;  %v5298_v42 = vrot.slane %v1273_v9, %v4775_v39  ;;  %v1409_v7 = vcombine.low %v5165_v23, %v5159_v51 }
  0xdd   : > { %v5292_v37 = vrot.slane %v1289_v61, %v4775_v39  ;;  %v5295_v18 = vrot.slane %v1321_v17, %v4775_v39  ;;  %v5301_v0 = vrot.slane %v1305_v62, %v4775_v39  ;;  %v1441_v61 = vcombine.low %v5262_v43, %v5250_v6  ;;  %1495 = vrot.lane.b32.xlu1 %v5038_v46, %s4543_s8 }
  0xde   : > { %7646 = vst [vmem:[#allocation50_spill] sm:$0xff] %v5298_v42  ;;  %v5304_v54 = vrot.slane %v1425_v32, %v4775_v39  ;;  %v5307_v40 = vrot.slane %v1457_v41, %v4775_v39  ;;  %v5314_v17 = vrot.slane %v2355_v11, %v4728_v16  ;;  %v2298_v32 = vcombine.low %v5134_v27, %v5113_v14 }
  0xdf   : > { %7644 = vst [vmem:[#allocation48_spill] sm:$0xff] %v5292_v37  ;;  %7645 = vst [vmem:[#allocation49_spill] sm:$0xff] %v5295_v18  ;;  %v5329_v11 = vrot.slane %v1409_v7, %v4775_v39  ;;  %v5332_v9 = vrot.slane %v1441_v61, %v4775_v39  ;;  %v2266_v62 = vcombine.low %v5046_v1, %v5025_v8  ;;  %1493 = vrot.lane.b32.xlu0 %v5043_v56, %s4543_s8 }
  0xe0   : > { %7647 = vst [vmem:[#allocation51_spill] sm:$0xff] %v5301_v0  ;;  %v2250_v16 = vcombine.low %v5028_v22, %v5022_v45  ;;  %v2282_v59 = vcombine.low %v5116_v49, %v5110_v33  ;;  %v7648_v53 = vcombine.low %v4875_v47, %v4865_v35  ;;  %v455_v48 = vcombine.low %v4908_v25, %v4923_v50 }
  0xe1   : > { %v5355_v49 = vrot.slane %v2298_v32, %v4775_v39  ;;  %v2434_v7 = vcombine.low %v5314_v17, %v5268_v4  ;;  %v2386_v12 = vcombine.low %v5204_v29, %v5198_v3  ;;  %v2418_v32 = vcombine.low %v5285_v5, %v5265_v44  ;;  %1499 = vrot.lane.b32.xlu1 %v5085_v21, %s4543_s8 }
  0xe2   : > { %v5344_v41 = vrot.slane %v7648_v53, %v4775_v39  ;;  %v5358_v33 = vrot.slane %v2282_v59, %v4775_v39  ;;  %v2402_v53 = vcombine.low %v5259_v28, %v5201_v13  ;;  %v439_v59 = vcombine.low %v4926_v15, %v4929_v10 }
  0xe3   : > { %v5375_v61 = vrot.slane %v2266_v62, %v4775_v39  ;;  %v5378_v0 = vrot.slane %v2250_v16, %v4775_v39  ;;  %v5385_v37 = vrot.slane %v2434_v7, %v4775_v39  ;;  %v5388_v56 = vrot.slane %v2418_v32, %v4775_v39  ;;  %1497 = vrot.lane.b32.xlu0 %v5094_v55, %s4543_s8 }
  0xe4   : > { %7649 = vst [vmem:[#allocation52_spill] sm:$0xff] %v5344_v41  ;;  %v7653_v62 = vcombine.high %v4859_v31, %v4862_v34  ;;  %v7655_v16 = vcombine.high %v4875_v47, %v4865_v35  ;;  %v5403_v18 = vrot.slane %v2402_v53, %v4775_v39  ;;  %v1290_v31 = vcombine.high %v4992_v30, %v4986_v52  ;;  %v7708_v41 = vld [vmem:[#allocation32_spill] sm:$0xff] }
  0xe5   : > { %7650 = vst [vmem:[#allocation53_spill] sm:$0xff] %v5378_v0  ;;  %7651 = vst [vmem:[#allocation54_spill] sm:$0xff] %v5385_v37  ;;  %v5416_v34 = vrot.slane %v2386_v12, %v4775_v39  ;;  %v5419_v35 = vrot.slane %v455_v48, %v4775_v39  ;;  %v5422_v47 = vrot.slane %v439_v59, %v4775_v39  ;;  %1503 = vrot.lane.b32.xlu1 %v5126_v19, %s4543_s8 }
  0xe6   : > { %7652 = vst [vmem:[#allocation55_spill] sm:$0xff] %v5388_v56  ;;  %v5394_v46 = vrot.slane %v7653_v62, %v4775_v39  ;;  %v5400_v42 = vrot.slane %v7655_v16, %v4775_v39  ;;  %7657 = vst [vmem:[#allocation58_spill] sm:$0xff] %v5403_v18  ;;  %v5425_v53 = vrot.slane %v1290_v31, %v4775_v39 }
  0xe7   : > { %7658 = vst [vmem:[#allocation59_spill] sm:$0xff] %v5416_v34  ;;  %7659 = vst [vmem:[#allocation60_spill] sm:$0xff] %v5419_v35  ;;  %v1322_v30 = vcombine.high %v5080_v63, %v5074_v20  ;;  %v1274_v52 = vcombine.high %v4989_v60, %v4983_v24  ;;  %v1306_v62 = vcombine.high %v5077_v57, %v5071_v26 }
  0xe8   : > { %7654 = vst [vmem:[#allocation56_spill] sm:$0xff] %v5394_v46  ;;  %7656 = vst [vmem:[#allocation57_spill] sm:$0xff] %v5400_v42  ;;  %v1426_v59 = vcombine.high %v5168_v36, %v5162_v38  ;;  %v1458_v16 = vcombine.high %v5256_v2, %v5253_v58  ;;  %v1410_v24 = vcombine.high %v5165_v23, %v5159_v51  ;;  %v7665_v38 = vld [vmem:[#allocation37_spill] sm:$0xff]  ;;  %v7707_v46 = vld [vmem:[#allocation31_spill] sm:$0xff] }
  0xe9   : > { %7660 = vst [vmem:[#allocation61_spill] sm:$0xff] %v5422_v47  ;;  %7661 = vst [vmem:[#allocation62_spill] sm:$0xff] %v5425_v53  ;;  %v5442_v63 = vrot.slane %v1322_v30, %v4775_v39  ;;  %v5445_v20 = vrot.slane %v1274_v52, %v4775_v39  ;;  %v5448_v26 = vrot.slane %v1306_v62, %v4775_v39  ;;  %1501 = vrot.lane.b32.xlu0 %v7665_v38, %s4543_s8  ;;  %v7712_v2 = vld [vmem:[#allocation36_spill] sm:$0xff] }
  0xea   : > { %v5457_v36 = vrot.slane %v1426_v59, %v4775_v39  ;;  %v5460_v60 = vrot.slane %v1458_v16, %v4775_v39  ;;  %v1442_v57 = vcombine.high %v5262_v43, %v5250_v6  ;;  %v5469_v23 = vrot.slane %v1410_v24, %v4775_v39  ;;  %v7671_v16 = vld [vmem:[#allocation34_spill] sm:$0xff]  ;;  %v7672_v24 = vld [vmem:[#allocation35_spill] sm:$0xff]  ;;  %v7674_v43 = vld [vmem:[#allocation41_spill] sm:$0xff] }
  0xeb   : > { %7662 = vst [vmem:[#allocation63_spill] sm:$0xff] %v5442_v63  ;;  %7663 = vst [vmem:[#allocation64_spill] sm:$0xff] %v5445_v20  ;;  %v2267_v6 = vcombine.high %v5046_v1, %v5025_v8  ;;  %v2299_v62 = vcombine.high %v5134_v27, %v5113_v14  ;;  %v2251_v59 = vcombine.high %v5028_v22, %v5022_v45  ;;  %v7717_v20 = vld [vmem:[#allocation7_spill] sm:$0xff] }
  0xec   : > { %7664 = vst [vmem:[#allocation65_spill] sm:$0xff] %v5448_v26  ;;  %7666 = vst [vmem:[#allocation37_spill] sm:$0xff] %v5457_v36  ;;  %v5476_v52 = vrot.slane %v1442_v57, %v4775_v39  ;;  %v2283_v31 = vcombine.high %v7672_v24, %v7671_v16  ;;  %v7673_v57 = vld [vmem:[#allocation40_spill] sm:$0xff]  ;;  %v2403_v16 = vcombine.high %v5259_v28, %v5201_v13 }
  0xed   : > { %7667 = vst [vmem:[#allocation66_spill] sm:$0xff] %v5460_v60  ;;  %7668 = vst [vmem:[#allocation67_spill] sm:$0xff] %v5469_v23  ;;  %1507 = vrot.lane.b32.xlu1 %v7673_v57, %s4543_s8  ;;  %1505 = vrot.lane.b32.xlu0 %v7674_v43, %s4543_s8  ;;  %v5497_v1 = vrot.slane %v2267_v6, %v4775_v39  ;;  %v5502_v22 = vrot.slane %v2299_v62, %v4775_v39 }
  0xee   : > { %7670 = vst [vmem:[#allocation68_spill] sm:$0xff] %v5476_v52  ;;  %v5505_v14 = vrot.slane %v2251_v59, %v4775_v39  ;;  %v5508_v27 = vrot.slane %v2283_v31, %v4775_v39  ;;  %v2435_v24 = vcombine.high %v5314_v17, %v5268_v4  ;;  %v2387_v6 = vcombine.high %v5204_v29, %v5198_v3  ;;  %v7680_v3 = vld [vmem:[#allocation44_spill] sm:$0xff]  ;;  %v7681_v29 = vld [vmem:[#allocation45_spill] sm:$0xff]  ;;  %v7701_v31 = vld [vmem:[#allocation23_spill] sm:$0xff] }
  0xef   : > { %7675 = vst [vmem:[#allocation34_spill] sm:$0xff] %v5497_v1  ;;  %7676 = vst [vmem:[#allocation35_spill] sm:$0xff] %v5502_v22  ;;  %v2419_v45 = vcombine.high %v5285_v5, %v5265_v44  ;;  %v5525_v13 = vrot.slane %v2403_v16, %v4775_v39  ;;  %v7685_v17 = vcombine.high %v4908_v25, %v4923_v50  ;;  %v7690_v50 = vld [vmem:[#allocation5_spill] sm:$0xff]  ;;  %v7702_v59 = vld [vmem:[#allocation24_spill] sm:$0xff] }
  0xf0   : > { %7677 = vst [vmem:[#allocation40_spill] sm:$0xff] %v5505_v14  ;;  %7678 = vst [vmem:[#allocation41_spill] sm:$0xff] %v5508_v27  ;;  %v5534_v44 = vrot.slane %v2435_v24, %v4775_v39  ;;  %v5537_v28 = vrot.slane %v2387_v6, %v4775_v39  ;;  %v7687_v4 = vcombine.high %v4926_v15, %v4929_v10  ;;  %v7689_v24 = vld [vmem:[#allocation19_spill] sm:$0xff]  ;;  %v7691_v15 = vld [vmem:[#allocation20_spill] sm:$0xff] }
  0xf1   : > { %7679 = vst [vmem:[#allocation69_spill] sm:$0xff] %v5525_v13  ;;  %1511 = vrot.lane.b32.xlu1 %v7680_v3, %s4543_s8  ;;  %1509 = vrot.lane.b32.xlu0 %v7681_v29, %s4543_s8  ;;  %v5540_v5 = vrot.slane %v2419_v45, %v4775_v39  ;;  %v5546_v16 = vrot.slane %v7685_v17, %v4775_v39  ;;  %v7692_v10 = vld [vmem:[#allocation21_spill] sm:$0xff]  ;;  %v7694_v17 = vld [vmem:[#allocation26_spill] sm:$0xff]  ;;  %v7714_v13 = vld [vmem:[#allocation39_spill] sm:$0xff] }
  0xf2   : > { %7682 = vst [vmem:[#allocation44_spill] sm:$0xff] %v5534_v44  ;;  %7683 = vst [vmem:[#allocation45_spill] sm:$0xff] %v5537_v28  ;;  %v5552_v62 = vrot.slane %v7687_v4, %v4775_v39  ;;  %v7693_v4 = vld [vmem:[#allocation25_spill] sm:$0xff] }
  0xf3   : > { %7684 = vst [vmem:[#allocation70_spill] sm:$0xff] %v5540_v5  ;;  %7686 = vst [vmem:[#allocation71_spill] sm:$0xff] %v5546_v16  ;;  %v7695_v6 = vld [vmem:[#allocation29_spill] sm:$0xff] }
  0xf4   : > { %7688 = vst [vmem:[#allocation72_spill] sm:$0xff] %v5552_v62 }
  0xf5   : > { %1803 = vrot.lane.b32.xlu1 %v7689_v24, %s4545_s18  ;;  %1801 = vrot.lane.b32.xlu0 %v7690_v50, %s4545_s18  ;;  %v7696_v24 = vld [vmem:[#allocation30_spill] sm:$0xff]  ;;  %v5598_v50 = vpop.permute.xlu0 %1481 }
  0xf9   : > { %1807 = vrot.lane.b32.xlu1 %v7691_v15, %s4545_s18  ;;  %1805 = vrot.lane.b32.xlu0 %v7692_v10, %s4545_s18 }
  0xfd   : > { %1811 = vrot.lane.b32.xlu1 %v7693_v4, %s4545_s18  ;;  %1809 = vrot.lane.b32.xlu0 %v7694_v17, %s4545_s18 }
 0x101   : > { %1815 = vrot.lane.b32.xlu1 %v7695_v6, %s4545_s18  ;;  %1813 = vrot.lane.b32.xlu0 %v7696_v24, %s4545_s18 }
 0x105   : > { %1819 = vrot.lane.b32.xlu1 %v5085_v21, %s4545_s18  ;;  %1817 = vrot.lane.b32.xlu0 %v5094_v55, %s4545_s18  ;;  %v7697_v55 = vld [vmem:[#allocation6_spill] sm:$0xff] }
 0x107   : > { %v480_v15 = vpop.permute.xlu1 %479 }
 0x109   : > { %1823 = vrot.lane.b32.xlu1 %v5126_v19, %s4545_s18  ;;  %1821 = vrot.lane.b32.xlu0 %v7665_v38, %s4545_s18  ;;  %v7698_v38 = vld [vmem:[#allocation8_spill] sm:$0xff] }
 0x10b   : > { %v484_v6 = vpop.permute.xlu1 %483  ;;  %v482_v21 = vpop.permute.xlu0 %481 }
 0x10c   : > { %v540_v10 = vcombine.low %v480_v15, %v484_v6  ;;  %v541_v4 = vcombine.high %v480_v15, %v484_v6  ;;  %v524_v17 = vcombine.low %v7697_v55, %v482_v21  ;;  %v525_v19 = vcombine.high %v7697_v55, %v482_v21 }
 0x10d   : > { %1827 = vrot.lane.b32.xlu1 %v7673_v57, %s4545_s18  ;;  %1825 = vrot.lane.b32.xlu0 %v7674_v43, %s4545_s18 }
 0x10e   : > { %v5611_v24 = vrot.slane %v540_v10, %v7698_v38  ;;  %v5614_v57 = vrot.slane %v541_v4, %v7698_v38  ;;  %v5617_v43 = vrot.slane %v524_v17, %v7698_v38  ;;  %v5620_v15 = vrot.slane %v525_v19, %v7698_v38  ;;  %v7699_v10 = vld [vmem:[#allocation22_spill] sm:$0xff]  ;;  %v7700_v4 = vld [vmem:[#allocation9_spill] sm:$0xff] }
 0x10f   : > { %v488_v6 = vpop.permute.xlu1 %487  ;;  %v486_v21 = vpop.permute.xlu0 %485 }
 0x111   : > { %1831 = vrot.lane.b32.xlu1 %v7680_v3, %s4545_s18  ;;  %1829 = vrot.lane.b32.xlu0 %v7681_v29, %s4545_s18  ;;  %v589_v3 = vcombine.high %v5617_v43, %v5611_v24  ;;  %v605_v29 = vcombine.high %v5620_v15, %v5614_v57 }
 0x113   : > { %v492_v55 = vpop.permute.xlu1 %491  ;;  %v490_v17 = vpop.permute.xlu0 %489  ;;  %v5665_v47 = vrot.slane %v605_v29, %v4775_v39  ;;  %v5668_v35 = vrot.slane %v589_v3, %v4775_v39  ;;  %v7715_v29 = vld [vmem:[#allocation42_spill] sm:$0xff] }
 0x114   : > { %v572_v25 = vcombine.low %v488_v6, %v492_v55  ;;  %v573_v45 = vcombine.high %v488_v6, %v492_v55  ;;  %v556_v19 = vcombine.low %v486_v21, %v490_v17  ;;  %v557_v30 = vcombine.high %v486_v21, %v490_v17 }
 0x115   : > { %2460 = vrot.lane.b32.xlu1 %v7699_v10, %s4543_s8  ;;  %2458 = vrot.lane.b32.xlu0 %v7700_v4, %s4543_s8  ;;  %7709 = vst [vmem:[#allocation20_spill] sm:$0xff] %v5665_v47  ;;  %7710 = vst [vmem:[#allocation21_spill] sm:$0xff] %v5668_v35 }
 0x116   : > { %v5635_v8 = vrot.slane %v572_v25, %v7698_v38  ;;  %v5638_v48 = vrot.slane %v573_v45, %v7698_v38  ;;  %v5641_v12 = vrot.slane %v556_v19, %v7698_v38  ;;  %v5644_v51 = vrot.slane %v557_v30, %v7698_v38  ;;  %v7703_v25 = vld [vmem:[#allocation27_spill] sm:$0xff]  ;;  %v7704_v45 = vld [vmem:[#allocation28_spill] sm:$0xff] }
 0x117   : > { %v496_v6 = vpop.permute.xlu1 %495  ;;  %v494_v21 = vpop.permute.xlu0 %493 }
 0x118   : > { %v621_v55 = vcombine.high %v5641_v12, %v5635_v8  ;;  %v637_v17 = vcombine.high %v5644_v51, %v5638_v48 }
 0x119   : > { %2464 = vrot.lane.b32.xlu1 %v7701_v31, %s4543_s8  ;;  %2462 = vrot.lane.b32.xlu0 %v7702_v59, %s4543_s8 }
 0x11a   : > { %v5655_v32 = vrot.slane %v637_v17, %v4775_v39  ;;  %v5658_v30 = vrot.slane %v621_v55, %v4775_v39 }
 0x11b   : > { %v500_v58 = vpop.permute.xlu1 %499  ;;  %v498_v19 = vpop.permute.xlu0 %497 }
 0x11c   : > { %7705 = vst [vmem:[#allocation19_spill] sm:$0xff] %v5655_v32  ;;  %7706 = vst [vmem:[#allocation5_spill] sm:$0xff] %v5658_v30  ;;  %v676_v7 = vcombine.low %v496_v6, %v500_v58  ;;  %v677_v62 = vcombine.high %v496_v6, %v500_v58  ;;  %v660_v42 = vcombine.low %v494_v21, %v498_v19 }
 0x11d   : > { %2468 = vrot.lane.b32.xlu1 %v7703_v25, %s4543_s8  ;;  %2466 = vrot.lane.b32.xlu0 %v7704_v45, %s4543_s8  ;;  %v661_v16 = vcombine.high %v494_v21, %v498_v19 }
 0x11e   : > { %v5671_v17 = vrot.slane %v676_v7, %v7698_v38  ;;  %v5674_v55 = vrot.slane %v677_v62, %v7698_v38  ;;  %v5677_v58 = vrot.slane %v660_v42, %v7698_v38  ;;  %v7713_v7 = vld [vmem:[#allocation38_spill] sm:$0xff] }
 0x11f   : > { %v5680_v6 = vrot.slane %v661_v16, %v7698_v38  ;;  %v506_v21 = vpop.permute.xlu1 %505  ;;  %v502_v19 = vpop.permute.xlu0 %501  ;;  %v7711_v16 = vld [vmem:[#allocation33_spill] sm:$0xff] }
 0x120   : > { %v725_v62 = vcombine.high %v5677_v58, %v5671_v17  ;;  %v692_v28 = vcombine.low %v502_v19, %v506_v21  ;;  %v693_v44 = vcombine.high %v502_v19, %v506_v21  ;;  %v7716_v21 = vld [vmem:[#allocation43_spill] sm:$0xff] }
 0x121   : > { %2472 = vrot.lane.b32.xlu1 %v7707_v46, %s4543_s8  ;;  %2470 = vrot.lane.b32.xlu0 %v7708_v41, %s4543_s8  ;;  %v741_v42 = vcombine.high %v5680_v6, %v5674_v55 }
 0x122   : > { %v5703_v52 = vrot.slane %v692_v28, %v7698_v38  ;;  %v5706_v23 = vrot.slane %v693_v44, %v7698_v38 }
 0x123   : > { %v797_v5 = vpop.permute.xlu1 %796  ;;  %v504_v3 = vpop.permute.xlu0 %503 }
 0x125   : > { %2476 = vrot.lane.b32.xlu1 %v7711_v16, %s4543_s8  ;;  %2474 = vrot.lane.b32.xlu0 %v7712_v2, %s4543_s8 }
 0x127   : > { %v801_v27 = vpop.permute.xlu1 %800  ;;  %v508_v14 = vpop.permute.xlu0 %507 }
 0x128   : > { %v708_v22 = vcombine.low %v504_v3, %v508_v14  ;;  %v709_v1 = vcombine.high %v504_v3, %v508_v14  ;;  %v857_v19 = vcombine.low %v797_v5, %v801_v27  ;;  %v858_v60 = vcombine.high %v797_v5, %v801_v27  ;;  %v7718_v27 = vld [vmem:[#allocation46_spill] sm:$0xff] }
 0x129   : > { %2480 = vrot.lane.b32.xlu1 %v7713_v7, %s4543_s8  ;;  %2478 = vrot.lane.b32.xlu0 %v7714_v13, %s4543_s8 }
 0x12a   : > { %v5713_v36 = vrot.slane %v708_v22, %v7698_v38  ;;  %v5716_v26 = vrot.slane %v709_v1, %v7698_v38  ;;  %v7719_v22 = vld [vmem:[#allocation47_spill] sm:$0xff]  ;;  %v5729_v1 = vrot.slane %v857_v19, %v7698_v38  ;;  %v5732_v5 = vrot.slane %v858_v60, %v7698_v38 }
 0x12b   : > { %v805_v14 = vpop.permute.xlu1 %804  ;;  %v799_v28 = vpop.permute.xlu0 %798 }
 0x12c   : > { %v757_v44 = vcombine.high %v5703_v52, %v5713_v36  ;;  %v773_v3 = vcombine.high %v5706_v23, %v5716_v26  ;;  %v841_v63 = vcombine.low %v7717_v20, %v799_v28  ;;  %v842_v53 = vcombine.high %v7717_v20, %v799_v28 }
 0x12d   : > { %2484 = vrot.lane.b32.xlu1 %v7715_v29, %s4543_s8  ;;  %2482 = vrot.lane.b32.xlu0 %v7716_v21, %s4543_s8 }
 0x12e   : > { %v5735_v30 = vrot.slane %v841_v63, %v7698_v38  ;;  %v5738_v35 = vrot.slane %v842_v53, %v7698_v38  ;;  %v5741_v28 = vrot.slane %v773_v3, %v4775_v39  ;;  %v5744_v47 = vrot.slane %v757_v44, %v4775_v39 }
 0x12f   : > { %v809_v32 = vpop.permute.xlu1 %808  ;;  %v803_v20 = vpop.permute.xlu0 %802  ;;  %v5753_v53 = vrot.slane %v741_v42, %v4775_v39  ;;  %v5756_v63 = vrot.slane %v725_v62, %v4775_v39 }
 0x130   : > { %7720 = vst [vmem:[#allocation25_spill] sm:$0xff] %v5744_v47  ;;  %v906_v19 = vcombine.high %v5735_v30, %v5729_v1  ;;  %v922_v60 = vcombine.high %v5738_v35, %v5732_v5  ;;  %v889_v3 = vcombine.low %v805_v14, %v809_v32  ;;  %v890_v34 = vcombine.high %v805_v14, %v809_v32 }
 0x131   : > { %2488 = vrot.lane.b32.xlu1 %v7718_v27, %s4543_s8  ;;  %2486 = vrot.lane.b32.xlu0 %v7719_v22, %s4543_s8  ;;  %s4562_s8 = smov 16  }
 0x132   : > { %v5774_v42 = vrot.slane %v890_v34, %v7698_v38  ;;  %v5799_v18 = vrot.slane %v922_v60, %v4775_v39  ;;  %v5802_v47 = vrot.slane %v906_v19, %v4775_v39 }
 0x133   : > { %v813_v44 = vpop.permute.xlu1 %812  ;;  %v807_v56 = vpop.permute.xlu0 %806 }
 0x134   : > { %v874_v0 = vcombine.high %v803_v20, %v807_v56  ;;  %7722 = vst [vmem:[#allocation29_spill] sm:$0xff] %v5802_v47 }
 0x135   : > { %2780 = vrot.lane.b32.xlu1 %v7699_v10, %s4545_s18  ;;  %2778 = vrot.lane.b32.xlu0 %v7700_v4, %s4545_s18  ;;  %v873_v10 = vcombine.low %v803_v20, %v807_v56  ;;  %v5771_v4 = vrot.slane %v889_v3, %v7698_v38 }
 0x136   : > { %v5780_v56 = vrot.slane %v874_v0, %v7698_v38 }
 0x137   : > { %v5777_v14 = vrot.slane %v873_v10, %v7698_v38 }
 0x138   : > { %v811_v20 = vpop.permute.xlu0 %810  ;;  %v954_v3 = vcombine.high %v5780_v56, %v5774_v42 }
 0x139   : > { %2784 = vrot.lane.b32.xlu1 %v7701_v31, %s4545_s18  ;;  %2782 = vrot.lane.b32.xlu0 %v7702_v59, %s4545_s18  ;;  %v817_v31 = vpop.permute.xlu1 %816  ;;  %v938_v32 = vcombine.high %v5777_v14, %v5771_v4 }
 0x13a   : > { %v993_v62 = vcombine.low %v813_v44, %v817_v31  ;;  %v994_v34 = vcombine.high %v813_v44, %v817_v31  ;;  %v5793_v0 = vrot.slane %v954_v3, %v4775_v39 }
 0x13b   : > { %v5796_v59 = vrot.slane %v938_v32, %v4775_v39 }
 0x13c   : > { %v815_v37 = vpop.permute.xlu0 %814 }
 0x13d   : > { %2788 = vrot.lane.b32.xlu1 %v7703_v25, %s4545_s18  ;;  %2786 = vrot.lane.b32.xlu0 %v7704_v45, %s4545_s18  ;;  %7721 = vst [vmem:[#allocation26_spill] sm:$0xff] %v5796_v59  ;;  %v821_v10 = vpop.permute.xlu1 %820  ;;  %v977_v44 = vcombine.low %v811_v20, %v815_v37  ;;  %v978_v31 = vcombine.high %v811_v20, %v815_v37 }
 0x13e   : > { %v5805_v25 = vrot.slane %v993_v62, %v7698_v38  ;;  %v5808_v45 = vrot.slane %v994_v34, %v7698_v38  ;;  %v636_v34 = vcombine.low %v5644_v51, %v5638_v48  ;;  %v588_v48 = vcombine.low %v5617_v43, %v5611_v24 }
 0x13f   : > { %v5817_v19 = vrot.slane %v977_v44, %v7698_v38  ;;  %v5820_v37 = vrot.slane %v978_v31, %v7698_v38  ;;  %v620_v51 = vcombine.low %v5641_v12, %v5635_v8 }
 0x140   : > { %v819_v3 = vpop.permute.xlu0 %818 }
 0x141   : > { %2792 = vrot.lane.b32.xlu1 %v7707_v46, %s4545_s18  ;;  %2790 = vrot.lane.b32.xlu0 %v7708_v41, %s4545_s18  ;;  %v825_v20 = vpop.permute.xlu1 %824  ;;  %v1042_v44 = vcombine.high %v5817_v19, %v5805_v25  ;;  %v1058_v31 = vcombine.high %v5820_v37, %v5808_v45  ;;  %v604_v41 = vcombine.low %v5620_v15, %v5614_v57 }
 0x142   : > { %v1025_v62 = vcombine.low %v821_v10, %v825_v20  ;;  %v1026_v60 = vcombine.high %v821_v10, %v825_v20  ;;  %v5845_v57 = vrot.slane %v636_v34, %v4775_v39  ;;  %v5870_v10 = vrot.slane %v620_v51, %v4775_v39 }
 0x143   : > { %v5850_v15 = vrot.slane %v604_v41, %v4775_v39  ;;  %v5916_v51 = vrot.slane %v1042_v44, %v4775_v39 }
 0x144   : > { %v823_v32 = vpop.permute.xlu0 %822  ;;  %v5856_v24 = vrot.slane %v1026_v60, %v7698_v38 }
 0x145   : > { %2796 = vrot.lane.b32.xlu1 %v7711_v16, %s4545_s18  ;;  %2794 = vrot.lane.b32.xlu0 %v7712_v2, %s4545_s18  ;;  %v1484_v46 = vpop.permute.xlu1 %1483  ;;  %v1009_v59 = vcombine.low %v819_v3, %v823_v32  ;;  %v1010_v47 = vcombine.high %v819_v3, %v823_v32  ;;  %v5853_v2 = vrot.slane %v1025_v62, %v7698_v38 }
 0x146   : > { %v5867_v16 = vrot.slane %v588_v48, %v4775_v39  ;;  %v740_v32 = vcombine.low %v5680_v6, %v5674_v55  ;;  %v756_v55 = vcombine.low %v5703_v52, %v5713_v36  ;;  %v772_v6 = vcombine.low %v5706_v23, %v5716_v26  ;;  %7725 = vst [vmem:[#allocation8_spill] sm:$0xff] %v5916_v51 }
 0x147   : > { %v5859_v12 = vrot.slane %v1009_v59, %v7698_v38  ;;  %v5862_v8 = vrot.slane %v1010_v47, %v7698_v38  ;;  %v5913_v48 = vrot.slane %v1058_v31, %v4775_v39 }
 0x148   : > { %v652_v41 = vcombine.low %v5867_v16, %v5870_v10  ;;  %v5944_v31 = vrot.slane %v772_v6, %v4775_v39 }
 0x149   : > { %2800 = vrot.lane.b32.xlu1 %v7713_v7, %s4545_s18  ;;  %2798 = vrot.lane.b32.xlu0 %v7714_v13, %s4545_s18  ;;  %v1488_v43 = vpop.permute.xlu1 %1487  ;;  %v1486_v7 = vpop.permute.xlu0 %1485  ;;  %v1074_v59 = vcombine.high %v5859_v12, %v5853_v2  ;;  %v1090_v47 = vcombine.high %v5862_v8, %v5856_v24  ;;  %v656_v13 = vcombine.low %v5850_v15, %v5845_v57 }
 0x14a   : > { %v1545_v60 = vcombine.low %v1484_v46, %v1488_v43  ;;  %v1546_v62 = vcombine.high %v1484_v46, %v1488_v43  ;;  %v1529_v20 = vcombine.low %v5598_v50, %v1486_v7  ;;  %v1530_v3 = vcombine.high %v5598_v50, %v1486_v7 }
 0x14b   : > { %v5891_v34 = vrot.slane %v1090_v47, %v4775_v39  ;;  %v5894_v46 = vrot.slane %v1074_v59, %v4775_v39  ;;  %v937_v43 = vcombine.low %v5777_v14, %v5771_v4  ;;  %v953_v7 = vcombine.low %v5780_v56, %v5774_v42 }
 0x14c   : > { %v5897_v50 = vrot.slane %v1545_v60, %v7698_v38  ;;  %v5903_v36 = vrot.slane %v1529_v20, %v7698_v38  ;;  %v5906_v26 = vrot.slane %v1530_v3, %v7698_v38  ;;  %v905_v56 = vcombine.low %v5735_v30, %v5729_v1 }
 0x14d   : > { %2804 = vrot.lane.b32.xlu1 %v7715_v29, %s4545_s18  ;;  %2802 = vrot.lane.b32.xlu0 %v7716_v21, %s4545_s18  ;;  %7723 = vst [vmem:[#allocation30_spill] sm:$0xff] %v5891_v34  ;;  %7724 = vst [vmem:[#allocation6_spill] sm:$0xff] %v5894_v46  ;;  %v5900_v29 = vrot.slane %v1546_v62, %v7698_v38  ;;  %v1492_v23 = vpop.permute.xlu1 %1491  ;;  %v1490_v52 = vpop.permute.xlu0 %1489  ;;  %v724_v21 = vcombine.low %v5677_v58, %v5671_v17 }
 0x14e   : > { %v1594_v59 = vcombine.high %v5903_v36, %v5897_v50  ;;  %v5931_v58 = vrot.slane %v740_v32, %v4775_v39  ;;  %v5947_v32 = vrot.slane %v756_v55, %v4775_v39  ;;  %v5957_v1 = vrot.slane %v937_v43, %v4775_v39 }
 0x14f   : > { %v1610_v17 = vcombine.high %v5906_v26, %v5900_v29  ;;  %v5951_v30 = vrot.slane %v724_v21, %v4775_v39  ;;  %v1593_v14 = vcombine.low %v5903_v36, %v5897_v50 }
 0x151   : > { %2808 = vrot.lane.b32.xlu1 %v7718_v27, %s4545_s18  ;;  %2806 = vrot.lane.b32.xlu0 %v7719_v22, %s4545_s18  ;;  %v921_v27 = vcombine.low %v5738_v35, %v5732_v5  ;;  %v1496_v44 = vpop.permute.xlu1 %1495  ;;  %v1494_v22 = vpop.permute.xlu0 %1493  ;;  %v5954_v35 = vrot.slane %v953_v7, %v4775_v39  ;;  %v792_v7 = vcombine.low %v5931_v58, %v5944_v31  ;;  %s4564_s18 = smov 24  }
 0x152   : > { %v1577_v47 = vcombine.low %v1492_v23, %v1496_v44  ;;  %v1578_v60 = vcombine.high %v1492_v23, %v1496_v44  ;;  %v1561_v62 = vcombine.low %v1490_v52, %v1494_v22  ;;  %v1562_v20 = vcombine.high %v1490_v52, %v1494_v22 }
 0x153   : > { %v1073_v23 = vcombine.low %v5859_v12, %v5853_v2  ;;  %v1089_v52 = vcombine.low %v5862_v8, %v5856_v24  ;;  %v788_v44 = vcombine.low %v5951_v30, %v5947_v32  ;;  %v5990_v2 = vrot.slane %v905_v56, %v4775_v39 }
 0x154   : > { %v5962_v3 = vrot.slane %v1577_v47, %v7698_v38  ;;  %v5965_v55 = vrot.slane %v1578_v60, %v7698_v38  ;;  %v5971_v6 = vrot.slane %v1562_v20, %v7698_v38  ;;  %v5987_v47 = vrot.slane %v921_v27, %v4775_v39 }
 0x155   : > { %3130 = vrot.lane.b32.xlu1 %v656_v13, %s4559_s0  ;;  %v5968_v13 = vrot.slane %v1561_v62, %v7698_v38  ;;  %3114 = vrot.lane.b32.xlu0 %v652_v41, %s4559_s0  ;;  %v1500_v21 = vpop.permute.xlu1 %1499  ;;  %v1498_v43 = vpop.permute.xlu0 %1497  ;;  %v1041_v24 = vcombine.low %v5817_v19, %v5805_v25  ;;  %v1057_v12 = vcombine.low %v5820_v37, %v5808_v45 }
 0x156   : > { %v1642_v41 = vcombine.high %v5971_v6, %v5965_v55  ;;  %v973_v8 = vcombine.low %v5987_v47, %v5954_v35  ;;  %v969_v27 = vcombine.low %v5990_v2, %v5957_v1  ;;  %v6003_v56 = vrot.slane %v1089_v52, %v4775_v39 }
 0x157   : > { %v1626_v22 = vcombine.high %v5968_v13, %v5962_v3  ;;  %v6006_v25 = vrot.slane %v1073_v23, %v4775_v39  ;;  %v6016_v5 = vrot.slane %v1057_v12, %v4775_v39  ;;  %v6019_v52 = vrot.slane %v1041_v24, %v4775_v39 }
 0x158   : > { %v6009_v45 = vrot.slane %v1642_v41, %v4775_v39  ;;  %v6022_v23 = vrot.slane %v1610_v17, %v4775_v39  ;;  %v6025_v41 = vrot.slane %v1594_v59, %v4775_v39 }
 0x159   : > { %3132 = vrot.lane.b32.xlu1 %v792_v7, %s4559_s0  ;;  %3116 = vrot.lane.b32.xlu0 %v788_v44, %s4559_s0  ;;  %v1504_v60 = vpop.permute.xlu1 %1503  ;;  %v6012_v19 = vrot.slane %v1626_v22, %v4775_v39  ;;  %v1109_v59 = vcombine.low %v6016_v5, %v6003_v56 }
 0x15a   : > { %7726 = vst [vmem:[#allocation22_spill] sm:$0xff] %v6009_v45  ;;  %v1681_v37 = vcombine.low %v1500_v21, %v1504_v60  ;;  %v1682_v20 = vcombine.high %v1500_v21, %v1504_v60  ;;  %7728 = vst [vmem:[#allocation23_spill] sm:$0xff] %v6022_v23  ;;  %v1609_v60 = vcombine.low %v5906_v26, %v5900_v29 }
 0x15b   : > { %v1502_v62 = vpop.permute.xlu0 %1501  ;;  %7727 = vst [vmem:[#allocation9_spill] sm:$0xff] %v6012_v19  ;;  %7729 = vst [vmem:[#allocation24_spill] sm:$0xff] %v6025_v41 }
 0x15c   : > { %v1665_v7 = vcombine.low %v1498_v43, %v1502_v62  ;;  %v1666_v44 = vcombine.high %v1498_v43, %v1502_v62  ;;  %v6028_v22 = vrot.slane %v1681_v37, %v7698_v38  ;;  %v6031_v21 = vrot.slane %v1682_v20, %v7698_v38 }
 0x15d   : > { %3194 = vrot.lane.b32.xlu1 %v973_v8, %s4560_s6  ;;  %3178 = vrot.lane.b32.xlu0 %v969_v27, %s4560_s6  ;;  %v1105_v20 = vcombine.low %v6019_v52, %v6006_v25 }
 0x15e   : > { %v6034_v43 = vrot.slane %v1665_v7, %v7698_v38  ;;  %v6037_v12 = vrot.slane %v1666_v44, %v7698_v38  ;;  %v1625_v7 = vcombine.low %v5968_v13, %v5962_v3  ;;  %v1641_v44 = vcombine.low %v5971_v6, %v5965_v55  ;;  %v7730_v55 = vld [vmem:[#allocation48_spill] sm:$0xff]  ;;  %v7731_v6 = vld [vmem:[#allocation49_spill] sm:$0xff] }
 0x15f   : > { %v1508_v24 = vpop.permute.xlu1 %1507  ;;  %v1506_v17 = vpop.permute.xlu0 %1505 }
 0x160   : > { %v1730_v37 = vcombine.high %v6034_v43, %v6028_v22  ;;  %v1746_v27 = vcombine.high %v6037_v12, %v6031_v21  ;;  %v6074_v50 = vrot.slane %v1625_v7, %v4775_v39  ;;  %v1745_v7 = vcombine.low %v6037_v12, %v6031_v21 }
 0x161   : > { %3196 = vrot.lane.b32.xlu1 %v1109_v59, %s4560_s6  ;;  %3180 = vrot.lane.b32.xlu0 %v1105_v20, %s4560_s6  ;;  %v7732_v59 = vcombine.low %v7730_v55, %v7731_v6  ;;  %v6071_v20 = vrot.slane %v1641_v44, %v4775_v39  ;;  %v1729_v44 = vcombine.low %v6034_v43, %v6028_v22 }
 0x162   : > { %v7737_v22 = vcombine.low %v5329_v11, %v5332_v9 }
 0x163   : > { %v1512_v8 = vpop.permute.xlu1 %1511  ;;  %v1510_v42 = vpop.permute.xlu0 %1509 }
 0x164   : > { %v1713_v4 = vcombine.low %v1508_v24, %v1512_v8  ;;  %v1714_v3 = vcombine.high %v1508_v24, %v1512_v8  ;;  %v1697_v13 = vcombine.low %v1506_v17, %v1510_v42  ;;  %v1698_v45 = vcombine.high %v1506_v17, %v1510_v42  ;;  %v7733_v24 = vld [vmem:[#allocation50_spill] sm:$0xff]  ;;  %v7734_v17 = vld [vmem:[#allocation51_spill] sm:$0xff] }
 0x165   : > { %3258 = vrot.lane.b32.xlu1 %v7732_v59, %s4561_s7  ;;  %v7735_v8 = vcombine.low %v7733_v24, %v7734_v17 }
 0x166   : > { %v1721_v29 = vrot.slane %v1713_v4, %v7698_v38  ;;  %v1728_v36 = vrot.slane %v1714_v3, %v7698_v38  ;;  %v1705_v26 = vrot.slane %v1697_v13, %v7698_v38  ;;  %v1712_v42 = vrot.slane %v1698_v45, %v7698_v38 }
 0x167   : > { %3242 = vrot.lane.b32.xlu0 %v7735_v8, %s4561_s7  ;;  %v1804_v59 = vpop.permute.xlu1 %1803  ;;  %v1802_v62 = vpop.permute.xlu0 %1801  ;;  %v6089_v4 = vrot.slane %v1609_v60, %v4775_v39  ;;  %v6092_v3 = vrot.slane %v1593_v14, %v4775_v39  ;;  %v7736_v8 = vcombine.low %v5304_v54, %v5307_v40 }
 0x168   : > { %v1761_v45 = vcombine.low %v1705_v26, %v1721_v29  ;;  %v1762_v13 = vcombine.high %v1705_v26, %v1721_v29  ;;  %v1777_v19 = vcombine.low %v1712_v42, %v1728_v36  ;;  %v1778_v41 = vcombine.high %v1712_v42, %v1728_v36 }
 0x169   : > { %3260 = vrot.lane.b32.xlu1 %v7736_v8, %s4561_s7  ;;  %v1661_v21 = vcombine.low %v6089_v4, %v6071_v20  ;;  %v1657_v14 = vcombine.low %v6092_v3, %v6074_v50  ;;  %v6113_v36 = vrot.slane %v1745_v7, %v4775_v39  ;;  %v6116_v26 = vrot.slane %v1729_v44, %v4775_v39 }
 0x16a   : > { %v6107_v43 = vrot.slane %v1777_v19, %v4775_v39  ;;  %v6110_v12 = vrot.slane %v1761_v45, %v4775_v39  ;;  %v6119_v42 = vrot.slane %v1778_v41, %v4775_v39  ;;  %v6122_v8 = vrot.slane %v1762_v13, %v4775_v39 }
 0x16b   : > { %3244 = vrot.lane.b32.xlu0 %v7737_v22, %s4561_s7  ;;  %v1808_v60 = vpop.permute.xlu1 %1807  ;;  %v1806_v29 = vpop.permute.xlu0 %1805  ;;  %v6130_v45 = vrot.slane %v1746_v27, %v4775_v39  ;;  %v6133_v41 = vrot.slane %v1730_v37, %v4775_v39  ;;  %v657_v44 = vcombine.high %v5850_v15, %v5845_v57 }
 0x16c   : > { %7738 = vst [vmem:[#allocation27_spill] sm:$0xff] %v6119_v42  ;;  %7739 = vst [vmem:[#allocation28_spill] sm:$0xff] %v6122_v8  ;;  %v1865_v22 = vcombine.low %v1804_v59, %v1808_v60  ;;  %v1866_v19 = vcombine.high %v1804_v59, %v1808_v60  ;;  %v1849_v23 = vcombine.low %v1802_v62, %v1806_v29 }
 0x16d   : > { %v1850_v46 = vcombine.high %v1802_v62, %v1806_v29  ;;  %3322 = vrot.lane.b32.xlu1 %v1661_v21, %s4562_s8  ;;  %7740 = vst [vmem:[#allocation31_spill] sm:$0xff] %v6130_v45  ;;  %7741 = vst [vmem:[#allocation32_spill] sm:$0xff] %v6133_v41  ;;  %v1797_v37 = vcombine.low %v6113_v36, %v6107_v43 }
 0x16e   : > { %v1873_v13 = vrot.slane %v1865_v22, %v7698_v38  ;;  %v1880_v59 = vrot.slane %v1866_v19, %v7698_v38  ;;  %v1857_v62 = vrot.slane %v1849_v23, %v7698_v38  ;;  %v1793_v22 = vcombine.low %v6116_v26, %v6110_v12 }
 0x16f   : > { %v1864_v21 = vrot.slane %v1850_v46, %v7698_v38  ;;  %3306 = vrot.lane.b32.xlu0 %v1657_v14, %s4562_s8  ;;  %v1812_v60 = vpop.permute.xlu1 %1811  ;;  %v1810_v29 = vpop.permute.xlu0 %1809  ;;  %v653_v46 = vcombine.high %v5867_v16, %v5870_v10 }
 0x170   : > { %v1914_v19 = vcombine.high %v1857_v62, %v1873_v13  ;;  %v1913_v16 = vcombine.low %v1857_v62, %v1873_v13 }
 0x171   : > { %v1930_v23 = vcombine.high %v1864_v21, %v1880_v59  ;;  %3134 = vrot.lane.b32.xlu1 %v657_v44, %s4559_s0  ;;  %v1929_v10 = vcombine.low %v1864_v21, %v1880_v59 }
 0x173   : > { %3118 = vrot.lane.b32.xlu0 %v653_v46, %s4559_s0  ;;  %v1816_v57 = vpop.permute.xlu1 %1815  ;;  %v1814_v15 = vpop.permute.xlu0 %1813  ;;  %v6165_v13 = vrot.slane %v1929_v10, %v4775_v39  ;;  %v6177_v21 = vrot.slane %v1930_v23, %v4775_v39 }
 0x174   : > { %v1897_v27 = vcombine.low %v1812_v60, %v1816_v57  ;;  %v1898_v7 = vcombine.high %v1812_v60, %v1816_v57  ;;  %v1881_v42 = vcombine.low %v1810_v29, %v1814_v15  ;;  %v1882_v45 = vcombine.high %v1810_v29, %v1814_v15 }
 0x175   : > { %3324 = vrot.lane.b32.xlu1 %v1797_v37, %s4562_s8  ;;  %7742 = vst [vmem:[#allocation33_spill] sm:$0xff] %v6177_v21 }
 0x176   : > { %v1905_v44 = vrot.slane %v1897_v27, %v7698_v38  ;;  %v1912_v46 = vrot.slane %v1898_v7, %v7698_v38  ;;  %v1889_v14 = vrot.slane %v1881_v42, %v7698_v38  ;;  %v1896_v8 = vrot.slane %v1882_v45, %v7698_v38 }
 0x177   : > { %3308 = vrot.lane.b32.xlu0 %v1793_v22, %s4562_s8  ;;  %v1820_v41 = vpop.permute.xlu1 %1819  ;;  %v1818_v51 = vpop.permute.xlu0 %1817  ;;  %v6171_v7 = vrot.slane %v1913_v16, %v4775_v39 }
 0x178   : > { %v1945_v34 = vcombine.low %v1889_v14, %v1905_v44  ;;  %v1946_v60 = vcombine.high %v1889_v14, %v1905_v44  ;;  %v1961_v57 = vcombine.low %v1896_v8, %v1912_v46  ;;  %v1962_v29 = vcombine.high %v1896_v8, %v1912_v46 }
 0x179   : > { %v6183_v8 = vrot.slane %v1914_v19, %v4775_v39 }
 0x17a   : > { %v6168_v59 = vrot.slane %v1961_v57, %v4775_v39  ;;  %v6174_v42 = vrot.slane %v1945_v34, %v4775_v39  ;;  %v6180_v27 = vrot.slane %v1962_v29, %v4775_v39  ;;  %v6186_v37 = vrot.slane %v1946_v60, %v4775_v39 }
 0x17b   : > { %v1824_v45 = vpop.permute.xlu1 %1823  ;;  %v1822_v62 = vpop.permute.xlu0 %1821  ;;  %7744 = vst [vmem:[#allocation38_spill] sm:$0xff] %v6183_v8 }
 0x17c   : > { %7743 = vst [vmem:[#allocation36_spill] sm:$0xff] %v6180_v27  ;;  %7745 = vst [vmem:[#allocation39_spill] sm:$0xff] %v6186_v37  ;;  %v2001_v22 = vcombine.low %v1820_v41, %v1824_v45  ;;  %v2002_v14 = vcombine.high %v1820_v41, %v1824_v45  ;;  %v1985_v15 = vcombine.low %v1818_v51, %v1822_v62 }
 0x17d   : > { %v1986_v16 = vcombine.high %v1818_v51, %v1822_v62  ;;  %v1981_v34 = vcombine.low %v6165_v13, %v6168_v59  ;;  %v1977_v23 = vcombine.low %v6171_v7, %v6174_v42 }
 0x17e   : > { %v2009_v44 = vrot.slane %v2001_v22, %v7698_v38  ;;  %v2016_v46 = vrot.slane %v2002_v14, %v7698_v38  ;;  %v1993_v41 = vrot.slane %v1985_v15, %v7698_v38  ;;  %v793_v15 = vcombine.high %v5931_v58, %v5944_v31 }
 0x17f   : > { %v2000_v51 = vrot.slane %v1986_v16, %v7698_v38  ;;  %3386 = vrot.lane.b32.xlu1 %v1981_v34, %s4563_s17  ;;  %3370 = vrot.lane.b32.xlu0 %v1977_v23, %s4563_s17  ;;  %v1828_v60 = vpop.permute.xlu1 %1827  ;;  %v1826_v57 = vpop.permute.xlu0 %1825  ;;  %v789_v16 = vcombine.high %v5951_v30, %v5947_v32  ;;  %v974_v58 = vcombine.high %v5987_v47, %v5954_v35 }
 0x180   : > { %v2050_v22 = vcombine.high %v1993_v41, %v2009_v44  ;;  %v2049_v27 = vcombine.low %v1993_v41, %v2009_v44  ;;  %v970_v31 = vcombine.high %v5990_v2, %v5957_v1 }
 0x181   : > { %v2066_v14 = vcombine.high %v2000_v51, %v2016_v46  ;;  %v2065_v21 = vcombine.low %v2000_v51, %v2016_v46 }
 0x183   : > { %3136 = vrot.lane.b32.xlu1 %v793_v15, %s4559_s0  ;;  %3120 = vrot.lane.b32.xlu0 %v789_v16, %s4559_s0  ;;  %v1832_v23 = vpop.permute.xlu1 %1831  ;;  %v1830_v45 = vpop.permute.xlu0 %1829  ;;  %v6227_v1 = vrot.slane %v2065_v21, %v4775_v39  ;;  %v6245_v21 = vrot.slane %v2050_v22, %v4775_v39 }
 0x184   : > { %v2033_v29 = vcombine.low %v1828_v60, %v1832_v23  ;;  %v2034_v19 = vcombine.high %v1828_v60, %v1832_v23  ;;  %v2017_v62 = vcombine.low %v1826_v57, %v1830_v45  ;;  %v2018_v10 = vcombine.high %v1826_v57, %v1830_v45 }
 0x185   : > { %7748 = vst [vmem:[#allocation7_spill] sm:$0xff] %v6245_v21 }
 0x186   : > { %v2041_v32 = vrot.slane %v2033_v29, %v7698_v38  ;;  %v2048_v30 = vrot.slane %v2034_v19, %v7698_v38  ;;  %v2025_v15 = vrot.slane %v2017_v62, %v7698_v38  ;;  %v2032_v16 = vrot.slane %v2018_v10, %v7698_v38 }
 0x187   : > { %3198 = vrot.lane.b32.xlu1 %v974_v58, %s4560_s6  ;;  %3182 = vrot.lane.b32.xlu0 %v970_v31, %s4560_s6  ;;  %v2461_v44 = vpop.permute.xlu1 %2460  ;;  %v2459_v46 = vpop.permute.xlu0 %2458  ;;  %v6233_v19 = vrot.slane %v2049_v27, %v4775_v39  ;;  %v6239_v29 = vrot.slane %v2066_v14, %v4775_v39 }
 0x188   : > { %v2081_v41 = vcombine.low %v2025_v15, %v2041_v32  ;;  %v2082_v51 = vcombine.high %v2025_v15, %v2041_v32  ;;  %v2097_v35 = vcombine.low %v2032_v16, %v2048_v30  ;;  %v2098_v47 = vcombine.high %v2032_v16, %v2048_v30 }
 0x189   : > { %7746 = vst [vmem:[#allocation42_spill] sm:$0xff] %v6239_v29  ;;  %v1106_v29 = vcombine.high %v6019_v52, %v6006_v25  ;;  %v7751_v25 = vld [vmem:[#allocation54_spill] sm:$0xff] }
 0x18a   : > { %v6230_v2 = vrot.slane %v2097_v35, %v4775_v39  ;;  %v6236_v10 = vrot.slane %v2081_v41, %v4775_v39  ;;  %v6242_v45 = vrot.slane %v2098_v47, %v4775_v39  ;;  %v6248_v62 = vrot.slane %v2082_v51, %v4775_v39  ;;  %v7752_v52 = vld [vmem:[#allocation58_spill] sm:$0xff] }
 0x18b   : > { %v2465_v60 = vpop.permute.xlu1 %2464  ;;  %v2463_v57 = vpop.permute.xlu0 %2462 }
 0x18c   : > { %7747 = vst [vmem:[#allocation43_spill] sm:$0xff] %v6242_v45  ;;  %7749 = vst [vmem:[#allocation46_spill] sm:$0xff] %v6248_v62  ;;  %v2522_v23 = vcombine.low %v2461_v44, %v2465_v60  ;;  %v2523_v27 = vcombine.high %v2461_v44, %v2465_v60  ;;  %v2506_v58 = vcombine.low %v2459_v46, %v2463_v57 }
 0x18d   : > { %v2507_v31 = vcombine.high %v2459_v46, %v2463_v57  ;;  %v2117_v32 = vcombine.low %v6227_v1, %v6230_v2  ;;  %v2113_v14 = vcombine.low %v6233_v19, %v6236_v10  ;;  %v1110_v45 = vcombine.high %v6016_v5, %v6003_v56 }
 0x18e   : > { %v2530_v15 = vrot.slane %v2522_v23, %v7698_v38  ;;  %v2537_v16 = vrot.slane %v2523_v27, %v7698_v38  ;;  %v2514_v44 = vrot.slane %v2506_v58, %v7698_v38  ;;  %v2318_v27 = vcombine.low %v5375_v61, %v5355_v49  ;;  %v7750_v58 = vld [vmem:[#allocation53_spill] sm:$0xff] }
 0x18f   : > { %v2521_v46 = vrot.slane %v2507_v31, %v7698_v38  ;;  %3388 = vrot.lane.b32.xlu1 %v2117_v32, %s4563_s17  ;;  %3372 = vrot.lane.b32.xlu0 %v2113_v14, %s4563_s17  ;;  %v2469_v41 = vpop.permute.xlu1 %2468  ;;  %v2467_v51 = vpop.permute.xlu0 %2466  ;;  %v2314_v31 = vcombine.low %v7750_v58, %v5358_v33 }
 0x190   : > { %v2571_v57 = vcombine.high %v2514_v44, %v2530_v15  ;;  %v2570_v21 = vcombine.low %v2514_v44, %v2530_v15 }
 0x191   : > { %v2587_v23 = vcombine.high %v2521_v46, %v2537_v16  ;;  %v2586_v30 = vcombine.low %v2521_v46, %v2537_v16 }
 0x193   : > { %3450 = vrot.lane.b32.xlu1 %v2318_v27, %s4564_s18  ;;  %3434 = vrot.lane.b32.xlu0 %v2314_v31, %s4564_s18  ;;  %v2473_v14 = vpop.permute.xlu1 %2472  ;;  %v2471_v34 = vpop.permute.xlu0 %2470 }
 0x194   : > { %v2554_v47 = vcombine.low %v2469_v41, %v2473_v14  ;;  %v2555_v60 = vcombine.high %v2469_v41, %v2473_v14  ;;  %v2538_v35 = vcombine.low %v2467_v51, %v2471_v34  ;;  %v2539_v22 = vcombine.high %v2467_v51, %v2471_v34 }
 0x195   : > { %v2454_v51 = vcombine.low %v7752_v52, %v7751_v25 }
 0x196   : > { %v2562_v32 = vrot.slane %v2554_v47, %v7698_v38  ;;  %v2569_v62 = vrot.slane %v2555_v60, %v7698_v38  ;;  %v2546_v27 = vrot.slane %v2538_v35, %v7698_v38  ;;  %v2553_v31 = vrot.slane %v2539_v22, %v7698_v38  ;;  %v7753_v47 = vld [vmem:[#allocation55_spill] sm:$0xff] }
 0x197   : > { %3200 = vrot.lane.b32.xlu1 %v1110_v45, %s4560_s6  ;;  %3184 = vrot.lane.b32.xlu0 %v1106_v29, %s4560_s6  ;;  %v2477_v34 = vpop.permute.xlu1 %2476  ;;  %v2475_v16 = vpop.permute.xlu0 %2474  ;;  %v7754_v60 = vld [vmem:[#allocation59_spill] sm:$0xff]  ;;  %v6293_v35 = vrot.slane %v2586_v30, %v4775_v39  ;;  %v7755_v45 = vcombine.high %v7730_v55, %v7731_v6  ;;  %v6310_v30 = vrot.slane %v2570_v21, %v4775_v39 }
 0x198   : > { %v2602_v46 = vcombine.low %v2546_v27, %v2562_v32  ;;  %v2603_v5 = vcombine.high %v2546_v27, %v2562_v32  ;;  %v2618_v56 = vcombine.low %v2553_v31, %v2569_v62  ;;  %v2619_v41 = vcombine.high %v2553_v31, %v2569_v62 }
 0x199   : > { %v2450_v14 = vcombine.low %v7754_v60, %v7753_v47  ;;  %v7756_v62 = vcombine.high %v7733_v24, %v7734_v17  ;;  %v6323_v17 = vrot.slane %v2587_v23, %v4775_v39  ;;  %v6326_v21 = vrot.slane %v2571_v57, %v4775_v39 }
 0x19a   : > { %v6296_v22 = vrot.slane %v2618_v56, %v4775_v39  ;;  %v6299_v29 = vrot.slane %v2602_v46, %v4775_v39  ;;  %v6313_v32 = vrot.slane %v2619_v41, %v4775_v39  ;;  %v6316_v27 = vrot.slane %v2603_v5, %v4775_v39 }
 0x19b   : > { %3262 = vrot.lane.b32.xlu1 %v7755_v45, %s4561_s7  ;;  %3246 = vrot.lane.b32.xlu0 %v7756_v62, %s4561_s7  ;;  %v2481_v15 = vpop.permute.xlu1 %2480  ;;  %v2479_v44 = vpop.permute.xlu0 %2478  ;;  %7759 = vst [vmem:[#allocation49_spill] sm:$0xff] %v6323_v17  ;;  %7760 = vst [vmem:[#allocation50_spill] sm:$0xff] %v6326_v21 }
 0x19c   : > { %7757 = vst [vmem:[#allocation47_spill] sm:$0xff] %v6313_v32  ;;  %7758 = vst [vmem:[#allocation48_spill] sm:$0xff] %v6316_v27  ;;  %v2658_v31 = vcombine.low %v2477_v34, %v2481_v15  ;;  %v2659_v46 = vcombine.high %v2477_v34, %v2481_v15  ;;  %v2642_v55 = vcombine.low %v2475_v16, %v2479_v44 }
 0x19d   : > { %v2643_v6 = vcombine.high %v2475_v16, %v2479_v44 }
 0x19e   : > { %v2666_v41 = vrot.slane %v2658_v31, %v7698_v38  ;;  %v2673_v5 = vrot.slane %v2659_v46, %v7698_v38  ;;  %v2650_v34 = vrot.slane %v2642_v55, %v7698_v38  ;;  %v2638_v46 = vcombine.low %v6293_v35, %v6296_v22 }
 0x19f   : > { %v2657_v16 = vrot.slane %v2643_v6, %v7698_v38  ;;  %3452 = vrot.lane.b32.xlu1 %v2454_v51, %s4564_s18  ;;  %3436 = vrot.lane.b32.xlu0 %v2450_v14, %s4564_s18  ;;  %v2485_v45 = vpop.permute.xlu1 %2484  ;;  %v2483_v62 = vpop.permute.xlu0 %2482  ;;  %v2634_v51 = vcombine.low %v6310_v30, %v6299_v29 }
 0x1a0   : > { %v2707_v44 = vcombine.high %v2650_v34, %v2666_v41  ;;  %v2706_v56 = vcombine.low %v2650_v34, %v2666_v41 }
 0x1a1   : > { %v2723_v31 = vcombine.high %v2657_v16, %v2673_v5  ;;  %v2722_v32 = vcombine.low %v2657_v16, %v2673_v5 }
 0x1a3   : > { %3514 = vrot.lane.b32.xlu1 %v2638_v46, %s4565_s21  ;;  %3498 = vrot.lane.b32.xlu0 %v2634_v51, %s4565_s21  ;;  %v2489_v55 = vpop.permute.xlu1 %2488  ;;  %v2487_v6 = vpop.permute.xlu0 %2486  ;;  %v7761_v46 = vcombine.high %v5304_v54, %v5307_v40  ;;  %v6365_v40 = vrot.slane %v2722_v32, %v4775_v39  ;;  %v6368_v54 = vrot.slane %v2706_v56, %v4775_v39 }
 0x1a4   : > { %v2690_v57 = vcombine.low %v2485_v45, %v2489_v55  ;;  %v2691_v15 = vcombine.high %v2485_v45, %v2489_v55  ;;  %v2674_v23 = vcombine.low %v2483_v62, %v2487_v6  ;;  %v2675_v24 = vcombine.high %v2483_v62, %v2487_v6 }
 0x1a5   : > { %v7762_v45 = vcombine.high %v5329_v11, %v5332_v9 }
 0x1a6   : > { %v2698_v17 = vrot.slane %v2690_v57, %v7698_v38  ;;  %v2705_v37 = vrot.slane %v2691_v15, %v7698_v38  ;;  %v2682_v8 = vrot.slane %v2674_v23, %v7698_v38  ;;  %v2689_v14 = vrot.slane %v2675_v24, %v7698_v38 }
 0x1a7   : > { %3264 = vrot.lane.b32.xlu1 %v7761_v46, %s4561_s7  ;;  %3248 = vrot.lane.b32.xlu0 %v7762_v45, %s4561_s7  ;;  %v2781_v41 = vpop.permute.xlu1 %2780  ;;  %v2779_v57 = vpop.permute.xlu0 %2778  ;;  %v1662_v23 = vcombine.high %v6089_v4, %v6071_v20  ;;  %v1658_v24 = vcombine.high %v6092_v3, %v6074_v50  ;;  %v6385_v4 = vrot.slane %v2723_v31, %v4775_v39 }
 0x1a8   : > { %v2738_v5 = vcombine.low %v2682_v8, %v2698_v17  ;;  %v2739_v34 = vcombine.high %v2682_v8, %v2698_v17  ;;  %v2754_v16 = vcombine.low %v2689_v14, %v2705_v37  ;;  %v2755_v62 = vcombine.high %v2689_v14, %v2705_v37 }
 0x1a9   : > { %7765 = vst [vmem:[#allocation54_spill] sm:$0xff] %v6385_v4  ;;  %v6388_v3 = vrot.slane %v2707_v44, %v4775_v39 }
 0x1aa   : > { %v6371_v9 = vrot.slane %v2754_v16, %v4775_v39  ;;  %v6374_v11 = vrot.slane %v2738_v5, %v4775_v39  ;;  %v6377_v8 = vrot.slane %v2755_v62, %v4775_v39  ;;  %v6380_v20 = vrot.slane %v2739_v34, %v4775_v39 }
 0x1ab   : > { %3326 = vrot.lane.b32.xlu1 %v1662_v23, %s4562_s8  ;;  %3310 = vrot.lane.b32.xlu0 %v1658_v24, %s4562_s8  ;;  %v2785_v50 = vpop.permute.xlu1 %2784  ;;  %7766 = vst [vmem:[#allocation58_spill] sm:$0xff] %v6388_v3  ;;  %v2783_v56 = vpop.permute.xlu0 %2782  ;;  %v7772_v3 = vld [vmem:[#allocation19_spill] sm:$0xff] }
 0x1ac   : > { %7763 = vst [vmem:[#allocation51_spill] sm:$0xff] %v6377_v8  ;;  %7764 = vst [vmem:[#allocation53_spill] sm:$0xff] %v6380_v20  ;;  %v2842_v37 = vcombine.low %v2781_v41, %v2785_v50  ;;  %v2843_v32 = vcombine.high %v2781_v41, %v2785_v50  ;;  %v2774_v17 = vcombine.low %v6365_v40, %v6371_v9 }
 0x1ad   : > { %v2770_v15 = vcombine.low %v6368_v54, %v6374_v11  ;;  %v2826_v51 = vcombine.low %v2779_v57, %v2783_v56  ;;  %v2827_v14 = vcombine.high %v2779_v57, %v2783_v56 }
 0x1ae   : > { %v2850_v44 = vrot.slane %v2842_v37, %v7698_v38  ;;  %v2857_v6 = vrot.slane %v2843_v32, %v7698_v38 }
 0x1af   : > { %v2834_v41 = vrot.slane %v2826_v51, %v7698_v38  ;;  %v2841_v5 = vrot.slane %v2827_v14, %v7698_v38  ;;  %3516 = vrot.lane.b32.xlu1 %v2774_v17, %s4565_s21  ;;  %3500 = vrot.lane.b32.xlu0 %v2770_v15, %s4565_s21  ;;  %v2789_v34 = vpop.permute.xlu1 %2788  ;;  %v2787_v62 = vpop.permute.xlu0 %2786 }
 0x1b1   : > { %v2891_v23 = vcombine.high %v2834_v41, %v2850_v44  ;;  %v2907_v24 = vcombine.high %v2841_v5, %v2857_v6  ;;  %v2906_v37 = vcombine.low %v2841_v5, %v2857_v6  ;;  %v2890_v17 = vcombine.low %v2834_v41, %v2850_v44  ;;  %v3750_v6 = vld [vmem:[%s7350_s1 + $0x20] sm:$0xf] }
 0x1b2   : > { %4274 = vmatprep.subr.msk.mxu0 %vm3800_vm2, %v3750_v6  ;;  %4308 = vmatprep.subr.msk.mxu1 %vm3800_vm2, %v3750_v6 }
 0x1b3   : > { %v2793_v50 = vpop.permute.xlu1 %2792  ;;  %v2791_v51 = vpop.permute.xlu0 %2790  ;;  %v6417_v20 = vrot.slane %v2906_v37, %v4775_v39  ;;  %4275 = vmatpush3.msk.msra.mxu0 %vm3800_vm2, %v3750_v6  ;;  %v6432_v37 = vrot.slane %v2891_v23, %v4775_v39  ;;  %4313 = vmatpush3.msk.msra.mxu1 %vm3800_vm2, %v3750_v6  ;;  %v3748_v23 = vld [vmem:[%s7350_s1 + $0x10] sm:$0xff] }
 0x1b4   : > { %v2874_v32 = vcombine.low %v2789_v34, %v2793_v50  ;;  %v2875_v56 = vcombine.high %v2789_v34, %v2793_v50  ;;  %v2858_v14 = vcombine.low %v2787_v62, %v2791_v51  ;;  %v2859_v45 = vcombine.high %v2787_v62, %v2791_v51 }
 0x1b5   : > { %v6423_v62 = vrot.slane %v2890_v17, %v4775_v39  ;;  %v6429_v50 = vrot.slane %v2907_v24, %v4775_v39  ;;  %7768 = vst [vmem:[#allocation59_spill] sm:$0xff] %v6432_v37 }
 0x1b6   : > { %v2882_v15 = vrot.slane %v2874_v32, %v7698_v38  ;;  %v2889_v46 = vrot.slane %v2875_v56, %v7698_v38  ;;  %v2866_v16 = vrot.slane %v2858_v14, %v7698_v38  ;;  %v2873_v31 = vrot.slane %v2859_v45, %v7698_v38  ;;  %v3749_v45 = vld [vmem:[%s7350_s1 + $0x18] sm:$0xff] }
 0x1b7   : > { %v2797_v55 = vpop.permute.xlu1 %2796  ;;  %v2795_v57 = vpop.permute.xlu0 %2794  ;;  %7767 = vst [vmem:[#allocation55_spill] sm:$0xff] %v6429_v50  ;;  %4276 = vmatprep.subr.mxu0 %v3749_v45  ;;  %4309 = vmatprep.subr.mxu1 %v3749_v45 }
 0x1b8   : > { %v2922_v5 = vcombine.low %v2866_v16, %v2882_v15  ;;  %v2923_v44 = vcombine.high %v2866_v16, %v2882_v15  ;;  %v2938_v41 = vcombine.low %v2873_v31, %v2889_v46  ;;  %v2939_v34 = vcombine.high %v2873_v31, %v2889_v46  ;;  %4277 = vmatpush3.msra.mxu0 %v3749_v45 }
 0x1b9   : > { %4314 = vmatpush3.msra.mxu1 %v3749_v45  ;;  %4278 = vmatprep.subr.mxu0 %v3748_v23 }
 0x1ba   : > { %v6435_v16 = vrot.slane %v2938_v41, %v4775_v39  ;;  %v6438_v31 = vrot.slane %v2922_v5, %v4775_v39  ;;  %v6441_v46 = vrot.slane %v2939_v34, %v4775_v39  ;;  %v6447_v24 = vrot.slane %v2923_v44, %v4775_v39  ;;  %4310 = vmatprep.subr.mxu1 %v3748_v23  ;;  %v7771_v34 = vld [vmem:[#allocation20_spill] sm:$0xff] }
 0x1bb   : > { %v2801_v32 = vpop.permute.xlu1 %2800  ;;  %v2799_v14 = vpop.permute.xlu0 %2798  ;;  %4279 = vmatpush3.msra.mxu0 %v3748_v23  ;;  %4315 = vmatpush3.msra.mxu1 %v3748_v23 }
 0x1bc   : > { %7769 = vst [vmem:[#allocation73_spill] sm:$0xff] %v6441_v46  ;;  %v2978_v56 = vcombine.low %v2797_v55, %v2801_v32  ;;  %v2979_v51 = vcombine.high %v2797_v55, %v2801_v32  ;;  %7770 = vst [vmem:[#allocation74_spill] sm:$0xff] %v6447_v24  ;;  %v2962_v17 = vcombine.low %v2795_v57, %v2799_v14  ;;  %v7775_v46 = vld [vmem:[#allocation5_spill] sm:$0xff] }
 0x1bd   : > { %v2963_v15 = vcombine.high %v2795_v57, %v2799_v14  ;;  %v2958_v6 = vcombine.low %v6417_v20, %v6435_v16  ;;  %v2954_v5 = vcombine.low %v6423_v62, %v6438_v31 }
 0x1be   : > { %v6454_v55 = vrot.slane %v2978_v56, %v7698_v38  ;;  %v2993_v41 = vrot.slane %v2979_v51, %v7698_v38  ;;  %v2970_v57 = vrot.slane %v2962_v17, %v7698_v38  ;;  %v3747_v56 = vld [vmem:[%s7350_s1 + $0x8] sm:$0xff]  ;;  %v3746_v51 = vld [vmem:[%s7350_s1] sm:$0xff]  ;;  %v7773_v17 = vcombine.low %v7771_v34, %v7772_v3 }
 0x1bf   : > { %v2977_v32 = vrot.slane %v2963_v15, %v7698_v38  ;;  %3578 = vrot.lane.b32.xlu1 %v2958_v6, %s4566_s3  ;;  %3562 = vrot.lane.b32.xlu0 %v2954_v5, %s4566_s3  ;;  %v2805_v45 = vpop.permute.xlu1 %2804  ;;  %v2803_v14 = vpop.permute.xlu0 %2802  ;;  %v7774_v15 = vld [vmem:[#allocation21_spill] sm:$0xff] }
 0x1c0   : > { %v3027_v5 = vcombine.high %v2970_v57, %v6454_v55  ;;  %4280 = vmatprep.subr.mxu0 %v3747_v56  ;;  %4311 = vmatprep.subr.mxu1 %v3747_v56  ;;  %v7776_v50 = vcombine.low %v7774_v15, %v7775_v46  ;;  %v3026_v8 = vcombine.low %v2970_v57, %v6454_v55 }
 0x1c1   : > { %v3043_v44 = vcombine.high %v2977_v32, %v2993_v41  ;;  %4281 = vmatpush3.msra.mxu0 %v3747_v56  ;;  %4316 = vmatpush3.msra.mxu1 %v3747_v56  ;;  %v3042_v21 = vcombine.low %v2977_v32, %v2993_v41  ;;  %v7777_v56 = vcombine.high %v6113_v36, %v6107_v43 }
 0x1c2   : > { %4282 = vmatprep.subr.mxu0 %v3746_v51  ;;  %4312 = vmatprep.subr.mxu1 %v3746_v51  ;;  %v7778_v55 = vcombine.high %v6116_v26, %v6110_v12  ;;  %v7779_v43 = vcombine.high %v6165_v13, %v6168_v59  ;;  %v7780_v12 = vcombine.high %v6171_v7, %v6174_v42 }
 0x1c3   : > { %3138 = vrot.lane.b32.xlu1 %v7773_v17, %s4559_s0  ;;  %3122 = vrot.lane.b32.xlu0 %v7776_v50, %s4559_s0  ;;  %v2809_v6 = vpop.permute.xlu1 %2808  ;;  %v2807_v23 = vpop.permute.xlu0 %2806  ;;  %v6533_v13 = vrot.slane %v3043_v44, %v4775_v39  ;;  %v6536_v59 = vrot.slane %v3027_v5, %v4775_v39  ;;  %v7807_v44 = vld [vmem:[#allocation65_spill] sm:$0xff] }
 0x1c4   : > { %v3010_v24 = vcombine.low %v2805_v45, %v2809_v6  ;;  %v3011_v37 = vcombine.high %v2805_v45, %v2809_v6  ;;  %v2994_v4 = vcombine.low %v2803_v14, %v2807_v23  ;;  %v2995_v27 = vcombine.high %v2803_v14, %v2807_v23  ;;  %4283 = vmatpush3.msra.mxu0 %v3746_v51 }
 0x1c5   : > { %4317 = vmatpush3.msra.mxu1 %v3746_v51  ;;  %7782 = vst [vmem:[#allocation21_spill] sm:$0xff] %v6533_v13  ;;  %7783 = vst [vmem:[#allocation5_spill] sm:$0xff] %v6536_v59  ;;  %v7824_v59 = vld [vmem:[#allocation9_spill] sm:$0xff] }
 0x1c6   : > { %v3018_v17 = vrot.slane %v3010_v24, %v7698_v38  ;;  %v3025_v3 = vrot.slane %v3011_v37, %v7698_v38  ;;  %v3002_v50 = vrot.slane %v2994_v4, %v7698_v38  ;;  %v3009_v45 = vrot.slane %v2995_v27, %v7698_v38 }
 0x1c7   : > { %3328 = vrot.lane.b32.xlu1 %v7777_v56, %s4562_s8  ;;  %3312 = vrot.lane.b32.xlu0 %v7778_v55, %s4562_s8  ;;  %v6501_v41 = vpop.permute.xlu1 %3130  ;;  %v6503_v24 = vpop.permute.xlu0 %3114  ;;  %v6506_v38 = vrot.slane %v3042_v21, %v4775_v39  ;;  %v6509_v27 = vrot.slane %v3026_v8, %v4775_v39  ;;  %v7786_v56 = vld [vmem:[#allocation25_spill] sm:$0xff] }
 0x1c8   : > { %v3058_v37 = vcombine.low %v3002_v50, %v3018_v17  ;;  %v3059_v57 = vcombine.high %v3002_v50, %v3018_v17  ;;  %v3074_v32 = vcombine.low %v3009_v45, %v3025_v3  ;;  %v3075_v4 = vcombine.high %v3009_v45, %v3025_v3 }
 0x1c9   : > { %v7785_v45 = vcombine.low %v5753_v53, %v5741_v28  ;;  %v7787_v55 = vcombine.low %v5756_v63, %v7786_v56 }
 0x1ca   : > { %v6522_v26 = vrot.slane %v3074_v32, %v4775_v39  ;;  %v6525_v21 = vrot.slane %v3058_v37, %v4775_v39  ;;  %v6528_v8 = vrot.slane %v3075_v4, %v4775_v39  ;;  %v6539_v7 = vrot.slane %v3059_v57, %v4775_v39  ;;  %v7789_v4 = vld [vmem:[#allocation29_spill] sm:$0xff] }
 0x1cb   : > { %3390 = vrot.lane.b32.xlu1 %v7779_v43, %s4563_s17  ;;  %3374 = vrot.lane.b32.xlu0 %v7780_v12, %s4563_s17  ;;  %v6519_v36 = vpop.permute.xlu1 %3132  ;;  %v6530_v3 = vpop.permute.xlu0 %3116  ;;  %v7788_v32 = vcombine.low %v5799_v18, %v5793_v0  ;;  %v7790_v43 = vld [vmem:[#allocation26_spill] sm:$0xff]  ;;  %v7795_v39 = vcombine.high %v7750_v58, %v5358_v33  ;;  %v7804_v58 = vld [vmem:[#allocation63_spill] sm:$0xff] }
 0x1cc   : > { %7781 = vst [vmem:[#allocation20_spill] sm:$0xff] %v6528_v8  ;;  %7784 = vst [vmem:[#allocation75_spill] sm:$0xff] %v6539_v7  ;;  %v3094_v42 = vcombine.low %v6506_v38, %v6522_v26  ;;  %v3090_v51 = vcombine.low %v6509_v27, %v6525_v21  ;;  %v7791_v12 = vcombine.low %v7789_v4, %v7790_v43  ;;  %v7803_v33 = vld [vmem:[#allocation62_spill] sm:$0xff] }
 0x1cf   : > { %3580 = vrot.lane.b32.xlu1 %v3094_v42, %s4566_s3  ;;  %3564 = vrot.lane.b32.xlu0 %v3090_v51, %s4566_s3  ;;  %v6557_v23 = vpop.permute.xlu1 %3194  ;;  %v6561_v50 = vpop.permute.xlu0 %3178 }
 0x1d3   : > { %3140 = vrot.lane.b32.xlu1 %v7785_v45, %s4559_s0  ;;  %3124 = vrot.lane.b32.xlu0 %v7787_v55, %s4559_s0  ;;  %v6571_v37 = vpop.permute.xlu1 %3196  ;;  %v6573_v57 = vpop.permute.xlu0 %3180  ;;  %v7792_v45 = vcombine.high %v6227_v1, %v6230_v2  ;;  %v7793_v55 = vcombine.high %v6233_v19, %v6236_v10  ;;  %v7796_v19 = vld [vmem:[#allocation30_spill] sm:$0xff] }
 0x1d4   : > { %v7797_v10 = vcombine.low %v5913_v48, %v7796_v19 }
 0x1d7   : > { %3202 = vrot.lane.b32.xlu1 %v7788_v32, %s4560_s6  ;;  %3186 = vrot.lane.b32.xlu0 %v7791_v12, %s4560_s6  ;;  %v6583_v42 = vpop.permute.xlu1 %3258  ;;  %v7794_v12 = vcombine.high %v5375_v61, %v5355_v49 }
 0x1d9   : > { %v6585_v51 = vpop.permute.xlu0 %3242 }
 0x1db   : > { %3392 = vrot.lane.b32.xlu1 %v7792_v45, %s4563_s17  ;;  %3376 = vrot.lane.b32.xlu0 %v7793_v55, %s4563_s17  ;;  %v6595_v32 = vpop.permute.xlu1 %3260  ;;  %v7798_v45 = vld [vmem:[#allocation8_spill] sm:$0xff]  ;;  %v7799_v55 = vld [vmem:[#allocation6_spill] sm:$0xff] }
 0x1dc   : > { %v7800_v5 = vcombine.low %v7798_v45, %v7799_v55 }
 0x1dd   : > { %v6597_v17 = vpop.permute.xlu0 %3244 }
 0x1df   : > { %3454 = vrot.lane.b32.xlu1 %v7794_v12, %s4564_s18  ;;  %3438 = vrot.lane.b32.xlu0 %v7795_v39, %s4564_s18  ;;  %v6607_v1 = vpop.permute.xlu1 %3322  ;;  %v7805_v39 = vcombine.low %v7803_v33, %v7804_v58  ;;  %v7806_v12 = vld [vmem:[#allocation64_spill] sm:$0xff] }
 0x1e0   : > { %v7808_v6 = vcombine.low %v7806_v12, %v7807_v44 }
 0x1e1   : > { %v6609_v2 = vpop.permute.xlu0 %3306 }
 0x1e3   : > { %3204 = vrot.lane.b32.xlu1 %v7797_v10, %s4560_s6  ;;  %3188 = vrot.lane.b32.xlu0 %v7800_v5, %s4560_s6  ;;  %v6619_v49 = vpop.permute.xlu1 %3134  ;;  %v7809_v10 = vcombine.high %v7752_v52, %v7751_v25  ;;  %v7810_v5 = vcombine.high %v7754_v60, %v7753_v47  ;;  %v7813_v47 = vld [vmem:[#allocation37_spill] sm:$0xff]  ;;  %v7814_v60 = vld [vmem:[#allocation66_spill] sm:$0xff] }
 0x1e4   : > { %7801 = vst [vmem:[#allocation25_spill] sm:$0xff] %v6619_v49  ;;  %v7817_v49 = vld [vmem:[#allocation68_spill] sm:$0xff] }
 0x1e5   : > { %v6621_v61 = vpop.permute.xlu0 %3118 }
 0x1e6   : > { %7802 = vst [vmem:[#allocation29_spill] sm:$0xff] %v6621_v61 }
 0x1e7   : > { %3266 = vrot.lane.b32.xlu1 %v7805_v39, %s4561_s7  ;;  %3250 = vrot.lane.b32.xlu0 %v7808_v6, %s4561_s7  ;;  %v6639_v14 = vpop.permute.xlu1 %3324  ;;  %v7811_v39 = vcombine.high %v6293_v35, %v6296_v22  ;;  %v7812_v6 = vcombine.high %v6310_v30, %v6299_v29  ;;  %v7820_v29 = vld [vmem:[#allocation23_spill] sm:$0xff]  ;;  %v7821_v30 = vld [vmem:[#allocation22_spill] sm:$0xff] }
 0x1e9   : > { %v6641_v61 = vpop.permute.xlu0 %3308 }
 0x1eb   : > { %3456 = vrot.lane.b32.xlu1 %v7809_v10, %s4564_s18  ;;  %3440 = vrot.lane.b32.xlu0 %v7810_v5, %s4564_s18  ;;  %v7815_v10 = vcombine.low %v7813_v47, %v7814_v60  ;;  %v7816_v5 = vld [vmem:[#allocation67_spill] sm:$0xff] }
 0x1ec   : > { %v7818_v7 = vcombine.low %v7816_v5, %v7817_v49 }
 0x1ef   : > { %3518 = vrot.lane.b32.xlu1 %v7811_v39, %s4565_s21  ;;  %3502 = vrot.lane.b32.xlu0 %v7812_v6, %s4565_s21  ;;  %v7822_v39 = vcombine.low %v7820_v29, %v7821_v30  ;;  %v7823_v6 = vld [vmem:[#allocation24_spill] sm:$0xff] }
 0x1f0   : > { %v7825_v8 = vcombine.low %v7823_v6, %v7824_v59 }
 0x1f1   : > { %v6651_v25 = vpop.permute.xlu1 %3386  ;;  %v6653_v52 = vpop.permute.xlu0 %3370 }
 0x1f3   : > { %3268 = vrot.lane.b32.xlu1 %v7815_v10, %s4561_s7  ;;  %3252 = vrot.lane.b32.xlu0 %v7818_v7, %s4561_s7  ;;  %v7826_v10 = vcombine.high %v6365_v40, %v6371_v9  ;;  %v7827_v7 = vcombine.high %v6368_v54, %v6374_v11  ;;  %v7833_v54 = vld [vmem:[#allocation19_spill] sm:$0xff] }
 0x1f4   : > { %v7834_v11 = vcombine.high %v7771_v34, %v7833_v54  ;;  %v7843_v54 = vld [vmem:[#allocation33_spill] sm:$0xff] }
 0x1f5   : > { %v6663_v35 = vpop.permute.xlu1 %3136  ;;  %v6665_v22 = vpop.permute.xlu0 %3120 }
 0x1f6   : > { %7819 = vst [vmem:[#allocation26_spill] sm:$0xff] %v6665_v22 }
 0x1f7   : > { %3330 = vrot.lane.b32.xlu1 %v7822_v39, %s4562_s8  ;;  %3314 = vrot.lane.b32.xlu0 %v7825_v8, %s4562_s8  ;;  %v7830_v39 = vcombine.high %v6417_v20, %v6435_v16  ;;  %v7831_v8 = vcombine.high %v6423_v62, %v6438_v31  ;;  %v7837_v62 = vld [vmem:[#allocation27_spill] sm:$0xff] }
 0x1f9   : > { %v6683_v22 = vpop.permute.xlu1 %3198  ;;  %v6685_v13 = vpop.permute.xlu0 %3182 }
 0x1fa   : > { %7828 = vst [vmem:[#allocation30_spill] sm:$0xff] %v6683_v22  ;;  %7829 = vst [vmem:[#allocation8_spill] sm:$0xff] %v6685_v13 }
 0x1fb   : > { %3520 = vrot.lane.b32.xlu1 %v7826_v10, %s4565_s21  ;;  %3504 = vrot.lane.b32.xlu0 %v7827_v7, %s4565_s21  ;;  %v7835_v10 = vcombine.high %v7774_v15, %v7775_v46  ;;  %v7836_v7 = vld [vmem:[#allocation31_spill] sm:$0xff]  ;;  %v7844_v46 = vld [vmem:[#allocation36_spill] sm:$0xff] }
 0x1fc   : > { %v7838_v31 = vcombine.low %v7836_v7, %v7837_v62  ;;  %v7845_v15 = vcombine.low %v7843_v54, %v7844_v46 }
 0x1ff   : > { %3582 = vrot.lane.b32.xlu1 %v7830_v39, %s4566_s3  ;;  %3566 = vrot.lane.b32.xlu0 %v7831_v8, %s4566_s3  ;;  %v7839_v39 = vld [vmem:[#allocation32_spill] sm:$0xff] }
 0x200   : > { %v7840_v8 = vld [vmem:[#allocation28_spill] sm:$0xff] }
 0x201   : > { %v6695_v40 = vpop.permute.xlu1 %3388  ;;  %v6697_v9 = vpop.permute.xlu0 %3372  ;;  %v7841_v13 = vcombine.low %v7839_v39, %v7840_v8 }
 0x202   : > { %7832 = vst [vmem:[#allocation6_spill] sm:$0xff] %v6697_v9 }
 0x203   : > { %3142 = vrot.lane.b32.xlu1 %v7834_v11, %s4559_s0  ;;  %3126 = vrot.lane.b32.xlu0 %v7835_v10, %s4559_s0  ;;  %v7846_v11 = vld [vmem:[#allocation38_spill] sm:$0xff]  ;;  %v7847_v10 = vld [vmem:[#allocation39_spill] sm:$0xff] }
 0x204   : > { %v7848_v9 = vcombine.low %v7846_v11, %v7847_v10 }
 0x205   : > { %v3451_v20 = vpop.permute.xlu1 %3450  ;;  %v3435_v16 = vpop.permute.xlu0 %3434 }
 0x207   : > { %3332 = vrot.lane.b32.xlu1 %v7838_v31, %s4562_s8  ;;  %3316 = vrot.lane.b32.xlu0 %v7841_v13, %s4562_s8  ;;  %v7851_v13 = vcombine.high %v6506_v38, %v6522_v26  ;;  %v7855_v38 = vcombine.high %v5799_v18, %v5793_v0  ;;  %v7857_v26 = vld [vmem:[#allocation42_spill] sm:$0xff]  ;;  %v7864_v0 = vld [vmem:[#allocation35_spill] sm:$0xff] }
 0x208   : > { %v7863_v18 = vld [vmem:[#allocation34_spill] sm:$0xff] }
 0x209   : > { %v6715_v22 = vpop.permute.xlu1 %3200  ;;  %v6717_v34 = vpop.permute.xlu0 %3184 }
 0x20a   : > { %7842 = vst [vmem:[#allocation62_spill] sm:$0xff] %v6717_v34  ;;  %v7852_v34 = vcombine.high %v6509_v27, %v6525_v21  ;;  %v7856_v27 = vcombine.high %v7789_v4, %v7790_v43  ;;  %v7866_v4 = vld [vmem:[#allocation40_spill] sm:$0xff]  ;;  %v7867_v43 = vld [vmem:[#allocation41_spill] sm:$0xff] }
 0x20b   : > { %3394 = vrot.lane.b32.xlu1 %v7845_v15, %s4563_s17  ;;  %3378 = vrot.lane.b32.xlu0 %v7848_v9, %s4563_s17  ;;  %v7853_v15 = vcombine.high %v5753_v53, %v5741_v28  ;;  %v7854_v9 = vcombine.high %v5756_v63, %v7786_v56  ;;  %v7858_v63 = vld [vmem:[#allocation43_spill] sm:$0xff] }
 0x20c   : > { %v7859_v21 = vcombine.low %v7857_v26, %v7858_v63  ;;  %v7860_v56 = vld [vmem:[#allocation7_spill] sm:$0xff] }
 0x20d   : > { %v6727_v31 = vpop.permute.xlu1 %3262  ;;  %v6729_v62 = vpop.permute.xlu0 %3246 }
 0x20e   : > { %7849 = vst [vmem:[#allocation63_spill] sm:$0xff] %v6727_v31  ;;  %7850 = vst [vmem:[#allocation64_spill] sm:$0xff] %v6729_v62 }
 0x20f   : > { %3584 = vrot.lane.b32.xlu1 %v7851_v13, %s4566_s3  ;;  %3568 = vrot.lane.b32.xlu0 %v7852_v34, %s4566_s3  ;;  %v7861_v34 = vld [vmem:[#allocation46_spill] sm:$0xff] }
 0x210   : > { %v7862_v13 = vcombine.low %v7860_v56, %v7861_v34 }
 0x211   : > { %v6747_v62 = vpop.permute.xlu1 %3452  ;;  %v6749_v31 = vpop.permute.xlu0 %3436 }
 0x213   : > { %3144 = vrot.lane.b32.xlu1 %v7853_v15, %s4559_s0  ;;  %3128 = vrot.lane.b32.xlu0 %v7854_v9, %s4559_s0  ;;  %v7865_v15 = vcombine.low %v7863_v18, %v7864_v0  ;;  %v7868_v9 = vcombine.low %v7866_v4, %v7867_v43  ;;  %s148_s0 = sand.u32 1, %s4516_s10  }
 0x214   : > { %s7297_s30 = scalar_lea.sflag [#allocation3], %s148_s0 }
 0x215   : > { %v3515_v28 = vpop.permute.xlu1 %3514  ;;  %v3499_v53 = vpop.permute.xlu0 %3498 }
 0x217   : > { %3206 = vrot.lane.b32.xlu1 %v7855_v38, %s4560_s6  ;;  %3190 = vrot.lane.b32.xlu0 %v7856_v27, %s4560_s6 }
 0x219   : > { %v3265_v38 = vpop.permute.xlu1 %3264  ;;  %v6775_v27 = vpop.permute.xlu0 %3248 }
 0x21a   : > { %7869 = vst [vmem:[#allocation65_spill] sm:$0xff] %v6775_v27  ;;  %v7875_v27 = vcombine.high %v7806_v12, %v7807_v44  ;;  %v7881_v44 = vld [vmem:[#allocation44_spill] sm:$0xff] }
 0x21b   : > { %3396 = vrot.lane.b32.xlu1 %v7859_v21, %s4563_s17  ;;  %3380 = vrot.lane.b32.xlu0 %v7862_v13, %s4563_s17  ;;  %v7870_v21 = vcombine.high %v5913_v48, %v7796_v19  ;;  %v7871_v13 = vcombine.high %v7798_v45, %v7799_v55  ;;  %v7876_v48 = vld [vmem:[#allocation12_spill] sm:$0xff]  ;;  %v7877_v19 = vld [vmem:[#allocation10_spill] sm:$0xff]  ;;  %v7878_v45 = vld [vmem:[#allocation13_spill] sm:$0xff] }
 0x21c   : > { %v7879_v55 = vld [vmem:[#allocation11_spill] sm:$0xff] }
 0x21d   : > { %v6785_v0 = vpop.permute.xlu1 %3326 }
 0x21e   : > { %7872 = vst [vmem:[#allocation37_spill] sm:$0xff] %v6785_v0 }
 0x21f   : > { %3458 = vrot.lane.b32.xlu1 %v7865_v15, %s4564_s18  ;;  %3442 = vrot.lane.b32.xlu0 %v7868_v9, %s4564_s18  ;;  %v6787_v15 = vpop.permute.xlu0 %3310  ;;  %v7874_v9 = vcombine.high %v7803_v33, %v7804_v58  ;;  %v7880_v58 = vld [vmem:[#allocation69_spill] sm:$0xff] }
 0x220   : > { %7873 = vst [vmem:[#allocation66_spill] sm:$0xff] %v6787_v15  ;;  %v7882_v12 = vcombine.low %v7880_v58, %v7881_v44 }
 0x223   : > { %3208 = vrot.lane.b32.xlu1 %v7870_v21, %s4560_s6  ;;  %3192 = vrot.lane.b32.xlu0 %v7871_v13, %s4560_s6  ;;  %v339_v21 = vcombine.low %v7877_v19, %v7876_v48  ;;  %v335_v13 = vcombine.low %v7879_v55, %v7878_v45 }
 0x225   : > { %v3619_v15 = vsel %vm3610_vm3, %v339_v21, %v6501_v41  ;;  %v3611_v33 = vsel %vm3610_vm3, %v335_v13, %v6503_v24  ;;  %v3517_v13 = vpop.permute.xlu1 %3516 }
 0x226   : > { %v3636_v45 = vsel %vm3627_vm4, %v3619_v15, %v6557_v23  ;;  %v3628_v41 = vsel %vm3627_vm4, %v3611_v33, %v6561_v50  ;;  %v7887_v15 = vld [vmem:[#allocation47_spill] sm:$0xff]  ;;  %v7890_v33 = vld [vmem:[#allocation48_spill] sm:$0xff] }
 0x227   : > { %3270 = vrot.lane.b32.xlu1 %v7874_v9, %s4561_s7  ;;  %3254 = vrot.lane.b32.xlu0 %v7875_v27, %s4561_s7  ;;  %v7883_v27 = vld [vmem:[#allocation45_spill] sm:$0xff]  ;;  %v7884_v9 = vld [vmem:[#allocation70_spill] sm:$0xff]  ;;  %v3653_v24 = vsel %vm3644_vm5, %v3636_v45, %v6583_v42  ;;  %v3645_v21 = vsel %vm3644_vm5, %v3628_v41, %v6585_v51 }
 0x228   : > { %v7885_v0 = vcombine.low %v7883_v27, %v7884_v9  ;;  %v3670_v55 = vsel %vm3661_vm6, %v3653_v24, %v6607_v1  ;;  %v7886_v42 = vld [vmem:[#allocation49_spill] sm:$0xff]  ;;  %v7889_v45 = vld [vmem:[#allocation50_spill] sm:$0xff] }
 0x229   : > { %v3687_v23 = vsel %vm3678_vm7, %v3670_v55, %v6651_v25  ;;  %v7888_v51 = vcombine.low %v7886_v42, %v7887_v15  ;;  %v7891_v41 = vcombine.low %v7889_v45, %v7890_v33 }
 0x22a   : > { %v3704_v1 = vsel %vm3695_vm8, %v3687_v23, %v3451_v20  ;;  %v7893_v20 = vcombine.high %v7816_v5, %v7817_v49  ;;  %v7895_v23 = vld [vmem:[#allocation16_spill] sm:$0xff]  ;;  %v7900_v49 = vcombine.high %v7820_v29, %v7821_v30  ;;  %v7904_v30 = vld [vmem:[#allocation54_spill] sm:$0xff] }
 0x22b   : > { %3460 = vrot.lane.b32.xlu1 %v7882_v12, %s4564_s18  ;;  %3444 = vrot.lane.b32.xlu0 %v7885_v0, %s4564_s18  ;;  %v3501_v12 = vpop.permute.xlu0 %3500  ;;  %v3662_v0 = vsel %vm3661_vm6, %v3645_v21, %v6609_v2  ;;  %v3721_v25 = vsel %vm3712_vm9, %v3704_v1, %v3515_v28  ;;  %v7897_v1 = vld [vmem:[#allocation18_spill] sm:$0xff] }
 0x22c   : > { %v3679_v50 = vsel %vm3678_vm7, %v3662_v0, %v6653_v52 }
 0x22d   : > { %v3696_v2 = vsel %vm3695_vm8, %v3679_v50, %v3435_v16 }
 0x22e   : > { %v3713_v52 = vsel %vm3712_vm9, %v3696_v2, %v3499_v53  ;;  %v7894_v53 = vld [vmem:[#allocation14_spill] sm:$0xff] }
 0x22f   : > { %3522 = vrot.lane.b32.xlu1 %v7888_v51, %s4565_s21  ;;  %3506 = vrot.lane.b32.xlu0 %v7891_v41, %s4565_s21  ;;  %v7892_v51 = vcombine.high %v7813_v47, %v7814_v60  ;;  %v7896_v50 = vcombine.low %v7894_v53, %v7895_v23  ;;  %v7898_v47 = vld [vmem:[#allocation60_spill] sm:$0xff] }
 0x230   : > { %v7899_v60 = vcombine.high %v7897_v1, %v7898_v47 }
 0x231   : > { %v3579_v55 = vpop.permute.xlu1 %3578  ;;  %v3563_v24 = vpop.permute.xlu0 %3562 }
 0x232   : > { %v3738_v21 = vsel %vm3729_vm10, %v3721_v25, %v3579_v55  ;;  %v3730_v0 = vsel %vm3729_vm10, %v3713_v52, %v3563_v24  ;;  %v3622_v2 = vsel %vm3610_vm3, %v7899_v60, %v6663_v35  ;;  %v7901_v25 = vcombine.high %v7823_v6, %v7824_v59  ;;  %v7902_v55 = vld [vmem:[#allocation61_spill] sm:$0xff]  ;;  %v7903_v24 = vld [vmem:[#allocation52_spill] sm:$0xff]  ;;  %v7905_v6 = vld [vmem:[#allocation51_spill] sm:$0xff] }
 0x233   : > { %3272 = vrot.lane.b32.xlu1 %v7892_v51, %s4561_s7  ;;  %4296 = vmatprep.mubr.msk.f32.mxu1 %vm3751_vm11, %v3738_v21  ;;  %v3639_v5 = vsel %vm3627_vm4, %v3622_v2, %v6715_v22  ;;  %v475_v52 = vcombine.low %v7897_v1, %v7898_v47  ;;  %v471_v21 = vcombine.low %v7903_v24, %v7902_v55  ;;  %v7908_v1 = vld [vmem:[#allocation53_spill] sm:$0xff] }
 0x234   : > { %3256 = vrot.lane.b32.xlu0 %v7893_v20, %s4561_s7  ;;  %4284 = vmatprep.mubr.msk.f32.mxu0 %vm3751_vm11, %v3730_v0  ;;  %v3656_v35 = vsel %vm3644_vm5, %v3639_v5, %v3265_v38  ;;  %v7906_v20 = vcombine.low %v7904_v30, %v7905_v6  ;;  %v7910_v5 = vld [vmem:[#allocation6_spill] sm:$0xff]  ;;  %s4225_s7 = sshll.u32 %s148_s0, 7 }
 0x235   : > { %v3139_v16 = vpop.permute.xlu1 %3138  ;;  %v3123_v28 = vpop.permute.xlu0 %3122  ;;  %v3620_v22 = vsel %vm3610_vm3, %v475_v52, %v6519_v36  ;;  %v3612_v59 = vsel %vm3610_vm3, %v471_v21, %v6530_v3  ;;  %v7912_v52 = vld [vmem:[#allocation73_spill] sm:$0xff] }
 0x236   : > { %v3623_v41 = vsel %vm3610_vm3, %v7896_v50, %v3139_v16  ;;  %v3637_v38 = vsel %vm3627_vm4, %v3620_v22, %v6571_v37  ;;  %v3629_v16 = vsel %vm3627_vm4, %v3612_v59, %v6573_v57  ;;  %v7907_v50 = vld [vmem:[#allocation58_spill] sm:$0xff] }
 0x237   : > { %3334 = vrot.lane.b32.xlu1 %v7900_v49, %s4562_s8  ;;  %v7909_v47 = vcombine.low %v7907_v50, %v7908_v1  ;;  %v3654_v36 = vsel %vm3644_vm5, %v3637_v38, %v6595_v32  ;;  %v3646_v3 = vsel %vm3644_vm5, %v3629_v16, %v6597_v17  ;;  %v7911_v32 = vld [vmem:[#allocation55_spill] sm:$0xff] }
 0x238   : > { %3318 = vrot.lane.b32.xlu0 %v7901_v25, %s4562_s8  ;;  %v3671_v37 = vsel %vm3661_vm6, %v3654_v36, %v6639_v14  ;;  %v3663_v57 = vsel %vm3661_vm6, %v3646_v3, %v6641_v61  ;;  %v7913_v17 = vcombine.low %v7911_v32, %v7912_v52  ;;  %v7915_v61 = vld [vmem:[#allocation74_spill] sm:$0xff]  ;;  %v7920_v36 = vld [vmem:[#allocation56_spill] sm:$0xff]  ;;  %v7921_v3 = vld [vmem:[#allocation71_spill] sm:$0xff] }
 0x239   : > { %v3329_v0 = vpop.permute.xlu1 %3328  ;;  %v6877_v51 = vpop.permute.xlu0 %3312  ;;  %v3688_v49 = vsel %vm3678_vm7, %v3671_v37, %v6695_v40  ;;  %v3680_v25 = vsel %vm3678_vm7, %v3663_v57, %v7910_v5  ;;  %v7922_v37 = vcombine.low %v7920_v36, %v7921_v3  ;;  %v7924_v5 = vld [vmem:[#allocation72_spill] sm:$0xff] }
 0x23a   : > { %v6880_v29 = vsel %vm3661_vm6, %v3656_v35, %v3329_v0  ;;  %v3705_v21 = vsel %vm3695_vm8, %v3688_v49, %v6747_v62  ;;  %v3697_v14 = vsel %vm3695_vm8, %v3680_v25, %v6749_v31  ;;  %v7914_v35 = vld [vmem:[#allocation59_spill] sm:$0xff]  ;;  %v7919_v31 = vcombine.high %v7839_v39, %v7840_v8  ;;  %v7923_v49 = vld [vmem:[#allocation57_spill] sm:$0xff] }
 0x23b   : > { %3524 = vrot.lane.b32.xlu1 %v7906_v20, %s4565_s21  ;;  %v7916_v0 = vcombine.low %v7914_v35, %v7915_v61  ;;  %v3722_v40 = vsel %vm3712_vm9, %v3705_v21, %v3517_v13  ;;  %v3714_v22 = vsel %vm3712_vm9, %v3697_v14, %v3501_v12  ;;  %v7917_v62 = vld [vmem:[#allocation27_spill] sm:$0xff]  ;;  %v7927_v39 = vcombine.high %v7846_v11, %v7847_v10  ;;  %v7929_v21 = vld [vmem:[#allocation17_spill] sm:$0xff] }
 0x23c   : > { %3508 = vrot.lane.b32.xlu0 %v7909_v47, %s4565_s21  ;;  %v7918_v47 = vcombine.high %v7836_v7, %v7917_v62  ;;  %v7925_v7 = vcombine.low %v7923_v49, %v7924_v5  ;;  %v7928_v8 = vld [vmem:[#allocation15_spill] sm:$0xff] }
 0x23d   : > { %v6902_v60 = vpop.permute.xlu1 %3390  ;;  %v6904_v2 = vpop.permute.xlu0 %3374  ;;  %v7930_v14 = vcombine.low %v7928_v8, %v7929_v21  ;;  %v7935_v11 = vld [vmem:[#allocation75_spill] sm:$0xff] }
 0x23f   : > { %3586 = vrot.lane.b32.xlu1 %v7913_v17, %s4566_s3  ;;  %v7926_v17 = vcombine.high %v7843_v54, %v7844_v46  ;;  %v7932_v54 = vld [vmem:[#allocation20_spill] sm:$0xff] }
 0x240   : > { %3570 = vrot.lane.b32.xlu0 %v7916_v0, %s4566_s3  ;;  %v3615_v0 = vsel %vm3610_vm3, %v7930_v14, %v3123_v28  ;;  %v7937_v28 = vcombine.high %v7857_v26, %v7858_v63 }
 0x241   : > { %v3581_v59 = vpop.permute.xlu1 %3580  ;;  %v3565_v20 = vpop.permute.xlu0 %3564 }
 0x242   : > { %v3739_v38 = vsel %vm3729_vm10, %v3722_v40, %v3581_v59  ;;  %v3731_v16 = vsel %vm3729_vm10, %v3714_v22, %v3565_v20 }
 0x243   : > { %3336 = vrot.lane.b32.xlu1 %v7918_v47, %s4562_s8  ;;  %4297 = vmatmul.mubr.msk.f32.vlgmr.msra.gmra.mxu1 %vm3751_vm11, %v3739_v38  ;;  %v7931_v38 = vld [vmem:[#allocation21_spill] sm:$0xff] }
 0x244   : > { %3320 = vrot.lane.b32.xlu0 %v7919_v31, %s4562_s8  ;;  %4285 = vmatmul.mubr.msk.f32.vlgmr.msra.gmra.mxu0 %vm3751_vm11, %v3731_v16  ;;  %v7933_v46 = vcombine.low %v7931_v38, %v7932_v54  ;;  %v7934_v16 = vld [vmem:[#allocation5_spill] sm:$0xff]  ;;  %s7253_s8 = scalar_lea.vmem [#allocation2], %s4225_s7 }
 0x245   : > { %v3141_v13 = vpop.permute.xlu1 %3140  ;;  %v3125_v12 = vpop.permute.xlu0 %3124  ;;  %v7936_v10 = vcombine.low %v7934_v16, %v7935_v11  ;;  %s4142_s26 = sshll.u32 %s7253_s8, 4  ;;  %s7285_s26 = int_to_ptr.vmem [resolvable:$true] %s4142_s26 }
 0x246   : > { %v3624_v57 = vsel %vm3610_vm3, %v7922_v37, %v3141_v13  ;;  %v3616_v25 = vsel %vm3610_vm3, %v7925_v7, %v3125_v12  ;;  %v7939_v12 = vld [vmem:[#allocation35_spill] sm:$0xff]  ;;  %v7941_v7 = vcombine.high %v7866_v4, %v7867_v43  ;;  %p4455_p2 = scmp.lt.s32.totalorder %s7285_s26, %s4453_s5 }
 0x247   : > { %3398 = vrot.lane.b32.xlu1 %v7926_v17, %s4563_s17  ;;  %v7940_v37 = vcombine.high %v7863_v18, %v7939_v12 }
 0x248   : > { %3382 = vrot.lane.b32.xlu0 %v7927_v39, %s4563_s17 }
 0x249   : > { %v3203_v40 = vpop.permute.xlu1 %3202  ;;  %v3187_v22 = vpop.permute.xlu0 %3186 }
 0x24a   : > { %v3640_v59 = vsel %vm3627_vm4, %v3623_v41, %v3203_v40  ;;  %v3632_v20 = vsel %vm3627_vm4, %v3615_v0, %v3187_v22  ;;  %v7938_v41 = vcombine.high %v7860_v56, %v7861_v34  ;;  %v7942_v56 = vcombine.high %v7880_v58, %v7881_v44  ;;  %v7952_v22 = vld [vmem:[#allocation25_spill] sm:$0xff] }
 0x24b   : > { %3588 = vrot.lane.b32.xlu1 %v7933_v46, %s4566_s3  ;;  %v7943_v34 = vcombine.high %v7883_v27, %v7884_v9  ;;  %v7945_v58 = vcombine.high %v7889_v45, %v7890_v33  ;;  %v7946_v27 = vcombine.high %v7904_v30, %v7905_v6  ;;  %v7947_v9 = vcombine.high %v7907_v50, %v7908_v1  ;;  %v7956_v46 = vld [vmem:[#allocation13_spill] sm:$0xff] }
 0x24c   : > { %3572 = vrot.lane.b32.xlu0 %v7936_v10, %s4566_s3  ;;  %v7949_v45 = vcombine.high %v7914_v35, %v7915_v61  ;;  %v7950_v50 = vcombine.high %v7931_v38, %v7932_v54  ;;  %v7951_v1 = vcombine.high %v7934_v16, %v7935_v11  ;;  %v7954_v38 = vld [vmem:[#allocation29_spill] sm:$0xff]  ;;  %v7955_v54 = vld [vmem:[#allocation11_spill] sm:$0xff]  ;;  %v7958_v11 = vld [vmem:[#allocation30_spill] sm:$0xff] }
 0x24d   : > { %v6970_v62 = vpop.permute.xlu1 %3392  ;;  %v6972_v47 = vpop.permute.xlu0 %3376  ;;  %v7957_v10 = vcombine.high %v7955_v54, %v7956_v46 }
 0x24f   : > { %3400 = vrot.lane.b32.xlu1 %v7937_v28, %s4563_s17  ;;  %v3613_v16 = vsel %vm3610_vm3, %v7957_v10, %v7954_v38 }
 0x250   : > { %3384 = vrot.lane.b32.xlu0 %v7938_v41, %s4563_s17  ;;  %v7959_v41 = vld [vmem:[#allocation8_spill] sm:$0xff]  ;;  %s4252_s17 = sshll.u32 %s4524_s12, 4 }
 0x251   : > { %v3455_v31 = vpop.permute.xlu1 %3454  ;;  %v3439_v13 = vpop.permute.xlu0 %3438  ;;  %v3630_v12 = vsel %vm3627_vm4, %v3613_v16, %v7959_v41 }
 0x253   : > { %3462 = vrot.lane.b32.xlu1 %v7940_v37, %s4564_s18  ;;  %v7960_v37 = vld [vmem:[#allocation63_spill] sm:$0xff] }
 0x254   : > { %3446 = vrot.lane.b32.xlu0 %v7941_v7, %s4564_s18 }
 0x255   : > { %v3205_v17 = vpop.permute.xlu1 %3204  ;;  %v3189_v26 = vpop.permute.xlu0 %3188 }
 0x256   : > { %v3641_v63 = vsel %vm3627_vm4, %v3624_v57, %v3205_v17  ;;  %v3633_v39 = vsel %vm3627_vm4, %v3616_v25, %v3189_v26  ;;  %v7944_v57 = vcombine.high %v7886_v42, %v7887_v15  ;;  %v7948_v15 = vcombine.high %v7911_v32, %v7912_v52  ;;  %v7961_v17 = vld [vmem:[#allocation64_spill] sm:$0xff] }
 0x257   : > { %3464 = vrot.lane.b32.xlu1 %v7942_v56, %s4564_s18  ;;  %v7963_v56 = vld [vmem:[#allocation66_spill] sm:$0xff] }
 0x258   : > { %3448 = vrot.lane.b32.xlu0 %v7943_v34, %s4564_s18  ;;  %s4248_s18 = sshll.u32 %s4528_s13, 5 }
 0x259   : > { %v3267_v18 = vpop.permute.xlu1 %3266  ;;  %v3251_v14 = vpop.permute.xlu0 %3250 }
 0x25a   : > { %v3657_v4 = vsel %vm3644_vm5, %v3640_v59, %v3267_v18  ;;  %v3649_v43 = vsel %vm3644_vm5, %v3632_v20, %v3251_v14  ;;  %v7953_v59 = vcombine.high %v7877_v19, %v7876_v48  ;;  %v3647_v48 = vsel %vm3644_vm5, %v3630_v12, %v7961_v17 }
 0x25b   : > { %3526 = vrot.lane.b32.xlu1 %v7944_v57, %s4565_s21  ;;  %v3664_v34 = vsel %vm3661_vm6, %v3647_v48, %v7963_v56 }
 0x25c   : > { %3510 = vrot.lane.b32.xlu0 %v7945_v58, %s4565_s21  ;;  %v3621_v20 = vsel %vm3610_vm3, %v7953_v59, %v7952_v22  ;;  %v3681_v14 = vsel %vm3678_vm7, %v3664_v34, %v6904_v2 }
 0x25d   : > { %v3457_v44 = vpop.permute.xlu1 %3456  ;;  %v3441_v25 = vpop.permute.xlu0 %3440  ;;  %v3638_v28 = vsel %vm3627_vm4, %v3621_v20, %v7958_v11 }
 0x25e   : > { %v3655_v7 = vsel %vm3644_vm5, %v3638_v28, %v7960_v37 }
 0x25f   : > { %3528 = vrot.lane.b32.xlu1 %v7946_v27, %s4565_s21 }
 0x260   : > { %3512 = vrot.lane.b32.xlu0 %v7947_v9, %s4565_s21  ;;  %s4139_s21 = sadd.s32 %s4252_s17, %s4248_s18 }
 0x261   : > { %v3519_v0 = vpop.permute.xlu1 %3518  ;;  %v3503_v42 = vpop.permute.xlu0 %3502  ;;  %s4249_s28 = sshll.u32 %s4139_s21, 7 }
 0x262   : > { %s7292_s29 = scalar_lea.hbm %s7351_s2, %s4249_s28 }
 0x263   : > { %3590 = vrot.lane.b32.xlu1 %v7948_v15, %s4566_s3 }
 0x264   : > { %3574 = vrot.lane.b32.xlu0 %v7949_v45, %s4566_s3 }
 0x265   : > { %v3269_v33 = vpop.permute.xlu1 %3268  ;;  %v3253_v30 = vpop.permute.xlu0 %3252 }
 0x266   : > { %v3658_v6 = vsel %vm3644_vm5, %v3641_v63, %v3269_v33  ;;  %v3650_v40 = vsel %vm3644_vm5, %v3633_v39, %v3253_v30  ;;  %v7962_v63 = vld [vmem:[#allocation37_spill] sm:$0xff] }
 0x267   : > { %3592 = vrot.lane.b32.xlu1 %v7950_v50, %s4566_s3  ;;  %v3672_v39 = vsel %vm3661_vm6, %v3655_v7, %v7962_v63 }
 0x268   : > { %3576 = vrot.lane.b32.xlu0 %v7951_v1, %s4566_s3  ;;  %v3689_v18 = vsel %vm3678_vm7, %v3672_v39, %v6902_v60  ;;  %s4448_s3 = scalar_lea.vmem %s7285_s26, 2048 }
 0x269   : > { %v3331_v32 = vpop.permute.xlu1 %3330  ;;  %v3315_v52 = vpop.permute.xlu0 %3314  ;;  %p4449_p13 = scmp.ne.s32.totalorder %s7285_s26, %s4448_s3  ;;  %p4456_p4 = scmp.lt.s32.totalorder %s4454_s24, %s4448_s3 }
 0x26a   : > { %v7037_v35 = vsel %vm3661_vm6, %v3657_v4, %v3331_v32  ;;  %v7040_v61 = vsel %vm3661_vm6, %v3649_v43, %v3315_v52  ;;  %v3706_v4 = vsel %vm3695_vm8, %v3689_v18, %v3455_v31  ;;  %v3698_v43 = vsel %vm3695_vm8, %v3681_v14, %v3439_v13  ;;  %v7966_v32 = vld [vmem:[#allocation26_spill] sm:$0xff] }
 0x26b   : > { %v3723_v57 = vsel %vm3712_vm9, %v3706_v4, %v3519_v0  ;;  %v3715_v58 = vsel %vm3712_vm9, %v3698_v43, %v3503_v42  ;;  %v7964_v31 = vcombine.high %v7894_v53, %v7895_v23  ;;  %v7965_v0 = vcombine.high %v7928_v8, %v7929_v21  ;;  %v7968_v23 = vld [vmem:[#allocation62_spill] sm:$0xff]  ;;  %v7969_v8 = vld [vmem:[#allocation65_spill] sm:$0xff]  ;;  %p4450_p0 = pnand %p4449_p13, %p4635_p3  ;;  %p4457_p5 = por %p4456_p4, %p4455_p2 }
 0x26c   : > { %v7967_v52 = vcombine.high %v7903_v24, %v7902_v55 }
 0x26d   : > { %v3521_v19 = vpop.permute.xlu1 %3520  ;;  %v3505_v26 = vpop.permute.xlu0 %3504  ;;  %p4451_p1 = pneg %p4450_p0 }
 0x26e   : > { %v3614_v53 = vsel %vm3610_vm3, %v7967_v52, %v7966_v32 }
 0x26f   : > { %v3631_v22 = vsel %vm3627_vm4, %v3614_v53, %v7968_v23  ;;  %p4458_p6 = pnand %p4457_p5, %p4451_p1 }
 0x270   : > { %v3648_v21 = vsel %vm3644_vm5, %v3631_v22, %v7969_v8 }
 0x271   : > { %v3583_v27 = vpop.permute.xlu1 %3582  ;;  %v3567_v9 = vpop.permute.xlu0 %3566 }
 0x272   : > { %v3740_v15 = vsel %vm3729_vm10, %v3723_v57, %v3583_v27  ;;  %v3732_v45 = vsel %vm3729_vm10, %v3715_v58, %v3567_v9 }
 0x273   : > { %4287 = vmatprep.mubr.msk.f32.mxu0 %vm3751_vm11, %v3732_v45  ;;  %4299 = vmatprep.mubr.msk.f32.mxu1 %vm3751_vm11, %v3740_v15 }
 0x275   : > { %v3143_v60 = vpop.permute.xlu1 %3142  ;;  %v3127_v2 = vpop.permute.xlu0 %3126 }
 0x276   : > { %v3625_v13 = vsel %vm3610_vm3, %v7964_v31, %v3143_v60  ;;  %v3617_v42 = vsel %vm3610_vm3, %v7965_v0, %v3127_v2 }
 0x279   : > { %v3333_v33 = vpop.permute.xlu1 %3332  ;;  %v3317_v30 = vpop.permute.xlu0 %3316 }
 0x27a   : > { %v7085_v50 = vsel %vm3661_vm6, %v3658_v6, %v3333_v33  ;;  %v7088_v1 = vsel %vm3661_vm6, %v3650_v40, %v3317_v30  ;;  %v3665_v6 = vsel %vm3661_vm6, %v3648_v21, %v6877_v51  ;;  %v3690_v40 = vsel %vm3678_vm7, %v6880_v29, %v6970_v62 }
 0x27b   : > { %v3682_v55 = vsel %vm3678_vm7, %v3665_v6, %v6972_v47  ;;  %v3707_v24 = vsel %vm3695_vm8, %v3690_v40, %v3457_v44  ;;  %v7970_v47 = vcombine.high %v7920_v36, %v7921_v3 }
 0x27c   : > { %v3699_v38 = vsel %vm3695_vm8, %v3682_v55, %v3441_v25  ;;  %v3724_v54 = vsel %vm3712_vm9, %v3707_v24, %v3521_v19  ;;  %v7971_v25 = vcombine.high %v7923_v49, %v7924_v5 }
 0x27d   : > { %v3395_v59 = vpop.permute.xlu1 %3394  ;;  %v3379_v20 = vpop.permute.xlu0 %3378  ;;  %v3716_v46 = vsel %vm3712_vm9, %v3699_v38, %v3505_v26 }
 0x27e   : > { %v3691_v27 = vsel %vm3678_vm7, %v7037_v35, %v3395_v59  ;;  %v3683_v9 = vsel %vm3678_vm7, %v7040_v61, %v3379_v20 }
 0x281   : > { %v3585_v10 = vpop.permute.xlu1 %3584  ;;  %v3569_v16 = vpop.permute.xlu0 %3568 }
 0x282   : > { %v3741_v11 = vsel %vm3729_vm10, %v3724_v54, %v3585_v10  ;;  %v3733_v51 = vsel %vm3729_vm10, %v3716_v46, %v3569_v16 }
 0x283   : > { %4288 = vmatmul.mubr.msk.f32.gmra.mxu0 %vm3751_vm11, %v3733_v51  ;;  %4300 = vmatmul.mubr.msk.f32.gmra.mxu1 %vm3751_vm11, %v3741_v11 }
 0x285   : > { %v3145_v29 = vpop.permute.xlu1 %3144  ;;  %v3129_v62 = vpop.permute.xlu0 %3128 }
 0x286   : > { %v7118_v44 = vsel %vm3610_vm3, %v7970_v47, %v3145_v29  ;;  %v7124_v28 = vsel %vm3610_vm3, %v7971_v25, %v3129_v62 }
 0x289   : > { %v3207_v41 = vpop.permute.xlu1 %3206  ;;  %v3191_v12 = vpop.permute.xlu0 %3190 }
 0x28a   : > { %v3642_v37 = vsel %vm3627_vm4, %v3625_v13, %v3207_v41  ;;  %v3634_v7 = vsel %vm3627_vm4, %v3617_v42, %v3191_v12 }
 0x28d   : > { %v3397_v17 = vpop.permute.xlu1 %3396  ;;  %v3381_v48 = vpop.permute.xlu0 %3380 }
 0x28e   : > { %v3692_v32 = vsel %vm3678_vm7, %v7085_v50, %v3397_v17  ;;  %v3684_v52 = vsel %vm3678_vm7, %v7088_v1, %v3381_v48 }
 0x291   : > { %v3459_v19 = vpop.permute.xlu1 %3458  ;;  %v3443_v26 = vpop.permute.xlu0 %3442 }
 0x292   : > { %v3708_v15 = vsel %vm3695_vm8, %v3691_v27, %v3459_v19  ;;  %v3700_v45 = vsel %vm3695_vm8, %v3683_v9, %v3443_v26 }
 0x295   : > { %v3209_v36 = vpop.permute.xlu1 %3208  ;;  %v3193_v3 = vpop.permute.xlu0 %3192 }
 0x296   : > { %v3643_v25 = vsel %vm3627_vm4, %v7118_v44, %v3209_v36 }
 0x299   : > { %v3271_v63 = vpop.permute.xlu1 %3270  ;;  %v3255_v39 = vpop.permute.xlu0 %3254 }
 0x29a   : > { %v3659_v10 = vsel %vm3644_vm5, %v3642_v37, %v3271_v63  ;;  %v3651_v11 = vsel %vm3644_vm5, %v3634_v7, %v3255_v39  ;;  %v3635_v37 = vsel %vm3627_vm4, %v7124_v28, %v3193_v3 }
 0x29d   : > { %v3461_v56 = vpop.permute.xlu1 %3460  ;;  %v3445_v34 = vpop.permute.xlu0 %3444 }
 0x29e   : > { %v3709_v53 = vsel %vm3695_vm8, %v3692_v32, %v3461_v56  ;;  %v3701_v23 = vsel %vm3695_vm8, %v3684_v52, %v3445_v34 }
 0x2a1   : > { %v3523_v49 = vpop.permute.xlu1 %3522  ;;  %v3507_v5 = vpop.permute.xlu0 %3506 }
 0x2a2   : > { %v3725_v60 = vsel %vm3712_vm9, %v3708_v15, %v3523_v49  ;;  %v3717_v31 = vsel %vm3712_vm9, %v3700_v45, %v3507_v5 }
 0x2a5   : > { %v3273_v18 = vpop.permute.xlu1 %3272 }
 0x2a6   : > { %v3257_v14 = vpop.permute.xlu0 %3256  ;;  %v3660_v17 = vsel %vm3644_vm5, %v3643_v25, %v3273_v18 }
 0x2a7   : > { %v3652_v26 = vsel %vm3644_vm5, %v3635_v37, %v3257_v14 }
 0x2a9   : > { %v3335_v4 = vpop.permute.xlu1 %3334 }
 0x2aa   : > { %v3319_v43 = vpop.permute.xlu0 %3318  ;;  %v3676_v51 = vsel %vm3661_vm6, %v3659_v10, %v3335_v4 }
 0x2ab   : > { %v3668_v62 = vsel %vm3661_vm6, %v3651_v11, %v3319_v43 }
 0x2ad   : > { %v3525_v57 = vpop.permute.xlu1 %3524 }
 0x2ae   : > { %v3509_v58 = vpop.permute.xlu0 %3508  ;;  %v3726_v22 = vsel %vm3712_vm9, %v3709_v53, %v3525_v57 }
 0x2af   : > { %v3718_v21 = vsel %vm3712_vm9, %v3701_v23, %v3509_v58 }
 0x2b1   : > { %v3587_v2 = vpop.permute.xlu1 %3586 }
 0x2b2   : > { %v3742_v13 = vsel %vm3729_vm10, %v3725_v60, %v3587_v2  ;;  %v3571_v0 = vpop.permute.xlu0 %3570 }
 0x2b3   : > { %v3734_v42 = vsel %vm3729_vm10, %v3717_v31, %v3571_v0  ;;  %4302 = vmatprep.mubr.msk.f32.mxu1 %vm3751_vm11, %v3742_v13 }
 0x2b4   : > { %4290 = vmatprep.mubr.msk.f32.mxu0 %vm3751_vm11, %v3734_v42 }
 0x2b5   : > { %v3337_v35 = vpop.permute.xlu1 %3336 }
 0x2b6   : > { %v3321_v61 = vpop.permute.xlu0 %3320  ;;  %v3677_v63 = vsel %vm3661_vm6, %v3660_v17, %v3337_v35 }
 0x2b7   : > { %v3669_v56 = vsel %vm3661_vm6, %v3652_v26, %v3321_v61 }
 0x2b9   : > { %v3399_v33 = vpop.permute.xlu1 %3398 }
 0x2ba   : > { %v3383_v30 = vpop.permute.xlu0 %3382  ;;  %v3693_v47 = vsel %vm3678_vm7, %v3676_v51, %v3399_v33 }
 0x2bb   : > { %v3685_v41 = vsel %vm3678_vm7, %v3668_v62, %v3383_v30 }
 0x2bd   : > { %v3589_v8 = vpop.permute.xlu1 %3588 }
 0x2be   : > { %v3743_v59 = vsel %vm3729_vm10, %v3726_v22, %v3589_v8  ;;  %v3573_v20 = vpop.permute.xlu0 %3572 }
 0x2bf   : > { %v3735_v6 = vsel %vm3729_vm10, %v3718_v21, %v3573_v20  ;;  %4303 = vmatmul.mubr.msk.f32.gmra.mxu1 %vm3751_vm11, %v3743_v59 }
 0x2c0   : > { %4291 = vmatmul.mubr.msk.f32.gmra.mxu0 %vm3751_vm11, %v3735_v6 }
 0x2c1   : > { %v3401_v50 = vpop.permute.xlu1 %3400 }
 0x2c2   : > { %v3385_v1 = vpop.permute.xlu0 %3384  ;;  %v3694_v28 = vsel %vm3678_vm7, %v3677_v63, %v3401_v50 }
 0x2c3   : > { %v3686_v34 = vsel %vm3678_vm7, %v3669_v56, %v3385_v1 }
 0x2c5   : > { %v3463_v40 = vpop.permute.xlu1 %3462 }
 0x2c6   : > { %v3447_v55 = vpop.permute.xlu0 %3446  ;;  %v3710_v12 = vsel %vm3695_vm8, %v3693_v47, %v3463_v40 }
 0x2c7   : > { %v3702_v7 = vsel %vm3695_vm8, %v3685_v41, %v3447_v55 }
 0x2c9   : > { %v3465_v24 = vpop.permute.xlu1 %3464 }
 0x2ca   : > { %v3449_v38 = vpop.permute.xlu0 %3448  ;;  %v3711_v49 = vsel %vm3695_vm8, %v3694_v28, %v3465_v24 }
 0x2cb   : > { %v3703_v5 = vsel %vm3695_vm8, %v3686_v34, %v3449_v38 }
 0x2cd   : > { %v3527_v54 = vpop.permute.xlu1 %3526 }
 0x2ce   : > { %v3511_v46 = vpop.permute.xlu0 %3510  ;;  %v3727_v48 = vsel %vm3712_vm9, %v3710_v12, %v3527_v54 }
 0x2cf   : > { %v3719_v44 = vsel %vm3712_vm9, %v3702_v7, %v3511_v46 }
 0x2d1   : > { %v3529_v16 = vpop.permute.xlu1 %3528 }
 0x2d2   : > { %v3513_v29 = vpop.permute.xlu0 %3512  ;;  %v3728_v18 = vsel %vm3712_vm9, %v3711_v49, %v3529_v16 }
 0x2d3   : > { %v3720_v4 = vsel %vm3712_vm9, %v3703_v5, %v3513_v29 }
 0x2d5   : > { %v3591_v19 = vpop.permute.xlu1 %3590 }
 0x2d6   : > { %v3744_v36 = vsel %vm3729_vm10, %v3727_v48, %v3591_v19  ;;  %v3575_v39 = vpop.permute.xlu0 %3574 }
 0x2d7   : > { %v3736_v3 = vsel %vm3729_vm10, %v3719_v44, %v3575_v39  ;;  %4305 = vmatprep.mubr.msk.f32.mxu1 %vm3751_vm11, %v3744_v36 }
 0x2d8   : > { %4293 = vmatprep.mubr.msk.f32.mxu0 %vm3751_vm11, %v3736_v3 }
 0x2d9   : > { %v3593_v14 = vpop.permute.xlu1 %3592 }
 0x2da   : > { %v3745_v43 = vsel %vm3729_vm10, %v3728_v18, %v3593_v14  ;;  %v3577_v57 = vpop.permute.xlu0 %3576 }
 0x2db   : > { %v3737_v58 = vsel %vm3729_vm10, %v3720_v4, %v3577_v57  ;;  %4306 = vmatmul.mubr.msk.f32.gmra.mxu1 %vm3751_vm11, %v3745_v43 }
 0x2dc   : > { %4294 = vmatmul.mubr.msk.f32.gmra.mxu0 %vm3751_vm11, %v3737_v58 }
 0x303   : > { %v4298_v27 = vpop.f32.mrf.mxu1 }
 0x304   : > { %v4286_v9 = vpop.f32.mrf.mxu0  ;;  %vm3958_vm12 = vcmp.ge.f32.partialorder %v4298_v27, 0.0  ;;  %v3974_v15 = vmul.f32 0.2, %v4298_v27 }
 0x305   : > { %vm3950_vm13 = vcmp.ge.f32.partialorder %v4286_v9, 0.0  ;;  %v3966_v45 = vmul.f32 0.2, %v4286_v9  ;;  %v3910_v60 = vpop.f32.mrf.mxu1 }
 0x306   : > { %v7184_v2 = vsel %vm3958_vm12, %v4298_v27, %v3974_v15  ;;  %v3870_v31 = vpop.f32.mrf.mxu0  ;;  %vm3957_vm14 = vcmp.ge.f32.partialorder %v3910_v60, 0.0  ;;  %v3973_v13 = vmul.f32 0.2, %v3910_v60 }
 0x307   : > { %v7186_v0 = vsel %vm3950_vm13, %v4286_v9, %v3966_v45  ;;  %vm3949_vm15 = vcmp.ge.f32.partialorder %v3870_v31, 0.0  ;;  %v3965_v42 = vmul.f32 0.2, %v3870_v31  ;;  %v4006_v35 = vmul.f32 %v7184_v2, %v7184_v2 }
 0x308   : > { %v3998_v61 = vmul.f32 %v7186_v0, %v7186_v0  ;;  %v7194_v30 = vsel %vm3957_vm14, %v3910_v60, %v3973_v13 }
 0x309   : > { %v7192_v33 = vsel %vm3949_vm15, %v3870_v31, %v3965_v42  ;;  %4031 = vadd.xlane.f32.xlu0 %v4006_v35  ;;  %v4005_v52 = vmul.f32 %v7194_v30, %v7194_v30 }
 0x30a   : > { %4015 = vadd.xlane.f32.xlu1 %v3998_v61  ;;  %v3997_v32 = vmul.f32 %v7192_v33, %v7192_v33 }
 0x30d   : > { %4013 = vadd.xlane.f32.xlu0 %v3997_v32 }
 0x30e   : > { %4029 = vadd.xlane.f32.xlu1 %v4005_v52 }
 0x343   : > { %v4289_v53 = vpop.f32.mrf.mxu0  ;;  %v4301_v23 = vpop.f32.mrf.mxu1 }
 0x344   : > { %vm3952_vm0 = vcmp.ge.f32.partialorder %v4289_v53, 0.0  ;;  %v3968_v22 = vmul.f32 0.2, %v4289_v53  ;;  %v3976_v8 = vmul.f32 0.2, %v4301_v23  ;;  %vm3960_vm1 = vcmp.ge.f32.partialorder %v4301_v23, 0.0 }
 0x345   : > { %v3880_v21 = vpop.f32.mrf.mxu0  ;;  %v3920_v59 = vpop.f32.mrf.mxu1 }
 0x346   : > { %v7200_v20 = vsel %vm3952_vm0, %v4289_v53, %v3968_v22  ;;  %vm3959_vm2 = vcmp.ge.f32.partialorder %v3920_v59, 0.0  ;;  %v3975_v6 = vmul.f32 0.2, %v3920_v59  ;;  %v7204_v1 = vsel %vm3960_vm1, %v4301_v23, %v3976_v8 }
 0x347   : > { %v4000_v50 = vmul.f32 %v7200_v20, %v7200_v20  ;;  %v3967_v40 = vmul.f32 0.2, %v3880_v21  ;;  %vm3951_vm3 = vcmp.ge.f32.partialorder %v3880_v21, 0.0  ;;  %v4008_v38 = vmul.f32 %v7204_v1, %v7204_v1 }
 0x348   : > { %v7206_v55 = vsel %vm3959_vm2, %v3920_v59, %v3975_v6 }
 0x349   : > { %4019 = vadd.xlane.f32.xlu0 %v4000_v50  ;;  %v4007_v24 = vmul.f32 %v7206_v55, %v7206_v55  ;;  %v7212_v54 = vsel %vm3951_vm3, %v3880_v21, %v3967_v40 }
 0x34a   : > { %v3999_v46 = vmul.f32 %v7212_v54, %v7212_v54 }
 0x34b   : > { %4033 = vadd.xlane.f32.xlu1 %v4007_v24 }
 0x34d   : > { %4035 = vadd.xlane.f32.xlu0 %v4008_v38 }
 0x351   : > { %4017 = vadd.xlane.f32.xlu0 %v3999_v46 }
 0x37f   : > { %v4304_v10 = vpop.f32.mrf.mxu1 }
 0x380   : > { %v4292_v16 = vpop.f32.mrf.mxu0  ;;  %v3978_v51 = vmul.f32 0.2, %v4304_v10  ;;  %vm3962_vm5 = vcmp.ge.f32.partialorder %v4304_v10, 0.0 }
 0x381   : > { %vm3954_vm4 = vcmp.ge.f32.partialorder %v4292_v16, 0.0  ;;  %v3970_v11 = vmul.f32 0.2, %v4292_v16  ;;  %v3930_v29 = vpop.f32.mrf.mxu1 }
 0x382   : > { %v3890_v62 = vpop.f32.mrf.mxu0  ;;  %v3977_v41 = vmul.f32 0.2, %v3930_v29  ;;  %vm3961_vm7 = vcmp.ge.f32.partialorder %v3930_v29, 0.0  ;;  %v7220_v37 = vsel %vm3962_vm5, %v4304_v10, %v3978_v51 }
 0x383   : > { %v7216_v47 = vsel %vm3954_vm4, %v4292_v16, %v3970_v11  ;;  %vm3953_vm6 = vcmp.ge.f32.partialorder %v3890_v62, 0.0  ;;  %v3969_v25 = vmul.f32 0.2, %v3890_v62  ;;  %v4010_v19 = vmul.f32 %v7220_v37, %v7220_v37 }
 0x384   : > { %v4002_v12 = vmul.f32 %v7216_v47, %v7216_v47  ;;  %v7226_v48 = vsel %vm3961_vm7, %v3930_v29, %v3977_v41 }
 0x385   : > { %v7222_v17 = vsel %vm3953_vm6, %v3890_v62, %v3969_v25  ;;  %v4009_v26 = vmul.f32 %v7226_v48, %v7226_v48 }
 0x386   : > { %4023 = vadd.xlane.f32.xlu0 %v4002_v12  ;;  %v4001_v7 = vmul.f32 %v7222_v17, %v7222_v17 }
 0x388   : > { %4021 = vadd.xlane.f32.xlu1 %v4001_v7 }
 0x38a   : > { %4039 = vadd.xlane.f32.xlu0 %v4010_v19 }
 0x38c   : > { %4037 = vadd.xlane.f32.xlu1 %v4009_v26 }
 0x392   : > { %v4032_v63 = vpop.xlane.xlu0 %4031 }
 0x393   : > { %v4016_v44 = vpop.xlane.xlu1 %4015  ;;  %v4054_v36 = vmul.f32 0.125, %v4032_v63 }
 0x394   : > { %v4046_v39 = vmul.f32 0.125, %v4016_v44 }
 0x395   : > { %v4070_v56 = vadd.f32 1e-08, %v4054_v36 }
 0x396   : > { %v4062_v28 = vadd.f32 1e-08, %v4046_v39  ;;  %v4014_v3 = vpop.xlane.xlu0 %4013 }
 0x397   : > { %4416 = vrsqrt.f32 %v4070_v56  ;;  %v4030_v34 = vpop.xlane.xlu1 %4029  ;;  %v4045_v49 = vmul.f32 0.125, %v4014_v3 }
 0x398   : > { %4418 = vrsqrt.f32 %v4062_v28  ;;  %v4053_v5 = vmul.f32 0.125, %v4030_v34 }
 0x399   : > { %v4061_v18 = vadd.f32 1e-08, %v4045_v49 }
 0x39a   : > { %v4069_v14 = vadd.f32 1e-08, %v4053_v5 }
 0x39b   : > { %4420 = vrsqrt.f32 %v4061_v18  ;;  %v4307_v4 = vpop.f32.mrf.mxu1 }
 0x39c   : > { %4422 = vrsqrt.f32 %v4069_v14  ;;  %v4295_v43 = vpop.f32.mrf.mxu0  ;;  %v3980_v58 = vmul.f32 0.2, %v4307_v4  ;;  %vm3964_vm9 = vcmp.ge.f32.partialorder %v4307_v4, 0.0 }
 0x39d   : > { %vm3956_vm8 = vcmp.ge.f32.partialorder %v4295_v43, 0.0  ;;  %v3972_v57 = vmul.f32 0.2, %v4295_v43  ;;  %v3940_v27 = vpop.f32.mrf.mxu1 }
 0x39e   : > { %v3900_v9 = vpop.f32.mrf.mxu0  ;;  %v3979_v60 = vmul.f32 0.2, %v3940_v27  ;;  %vm3963_vm11 = vcmp.ge.f32.partialorder %v3940_v27, 0.0  ;;  %v7239_v13 = vsel %vm3964_vm9, %v4307_v4, %v3980_v58 }
 0x39f   : > { %v7233_v15 = vsel %vm3956_vm8, %v4295_v43, %v3972_v57  ;;  %vm3955_vm10 = vcmp.ge.f32.partialorder %v3900_v9, 0.0  ;;  %v3971_v45 = vmul.f32 0.2, %v3900_v9  ;;  %v4012_v52 = vmul.f32 %v7239_v13, %v7239_v13 }
 0x3a0   : > { %v4004_v31 = vmul.f32 %v7233_v15, %v7233_v15  ;;  %v7245_v61 = vsel %vm3963_vm11, %v3940_v27, %v3979_v60 }
 0x3a1   : > { %v7241_v42 = vsel %vm3955_vm10, %v3900_v9, %v3971_v45  ;;  %v4011_v8 = vmul.f32 %v7245_v61, %v7245_v61 }
 0x3a2   : > { %v4003_v35 = vmul.f32 %v7241_v42, %v7241_v42  ;;  %4027 = vadd.xlane.f32.xlu0 %v4004_v31 }
 0x3a4   : > { %v4417_v32 = vpop.eup %4416  ;;  %4025 = vadd.xlane.f32.xlu1 %v4003_v35 }
 0x3a5   : > { %v4419_v53 = vpop.eup %4418  ;;  %v4102_v23 = vmul.f32 %v4417_v32, %v7184_v2 }
 0x3a6   : > { %v4094_v22 = vmul.f32 %v4419_v53, %v7186_v0  ;;  %4043 = vadd.xlane.f32.xlu0 %v4012_v52 }
 0x3a7   : > { %4118 = vst [vmem:[%s7253_s8 + $0x48] sm:$0xff] %v4102_v23 }
 0x3a8   : > { %v4421_v21 = vpop.eup %4420  ;;  %4110 = vst [vmem:[%s7253_s8 + $0x8] sm:$0xff] %v4094_v22  ;;  %4041 = vadd.xlane.f32.xlu1 %v4011_v8 }
 0x3a9   : > { %v4423_v59 = vpop.eup %4422  ;;  %v4093_v6 = vmul.f32 %v4421_v21, %v7192_v33 }
 0x3aa   : > { %v4101_v2 = vmul.f32 %v4423_v59, %v7194_v30 }
 0x3ab   : > { %4109 = vst [vmem:[%s7253_s8] sm:$0xff] %v4093_v6 }
 0x3ac   : > { %4117 = vst [vmem:[%s7253_s8 + $0x40] sm:$0xff] %v4101_v2 }
 0x3d2   : > { %v4020_v0 = vpop.xlane.xlu0 %4019 }
 0x3d3   : > { %v4048_v50 = vmul.f32 0.125, %v4020_v0 }
 0x3d4   : > { %v4034_v24 = vpop.xlane.xlu1 %4033 }
 0x3d5   : > { %v4064_v40 = vadd.f32 1e-08, %v4048_v50  ;;  %v4055_v38 = vmul.f32 0.125, %v4034_v24 }
 0x3d6   : > { %v4036_v46 = vpop.xlane.xlu0 %4035 }
 0x3d7   : > { %4424 = vrsqrt.f32 %v4064_v40  ;;  %v4056_v10 = vmul.f32 0.125, %v4036_v46  ;;  %v4071_v16 = vadd.f32 1e-08, %v4055_v38 }
 0x3d9   : > { %v4072_v11 = vadd.f32 1e-08, %v4056_v10  ;;  %4426 = vrsqrt.f32 %v4071_v16 }
 0x3da   : > { %v4018_v51 = vpop.xlane.xlu0 %4017 }
 0x3db   : > { %4428 = vrsqrt.f32 %v4072_v11  ;;  %v4047_v33 = vmul.f32 0.125, %v4018_v51 }
 0x3dd   : > { %v4063_v30 = vadd.f32 1e-08, %v4047_v33 }
 0x3df   : > { %4430 = vrsqrt.f32 %v4063_v30 }
 0x3e4   : > { %v4425_v29 = vpop.eup %4424 }
 0x3e5   : > { %v4096_v62 = vmul.f32 %v4425_v29, %v7200_v20 }
 0x3e6   : > { %v4427_v25 = vpop.eup %4426 }
 0x3e7   : > { %4112 = vst [vmem:[%s7253_s8 + $0x18] sm:$0xff] %v4096_v62  ;;  %v4103_v12 = vmul.f32 %v4427_v25, %v7206_v55 }
 0x3e8   : > { %v4429_v41 = vpop.eup %4428 }
 0x3e9   : > { %v4104_v7 = vmul.f32 %v4429_v41, %v7204_v1  ;;  %4119 = vst [vmem:[%s7253_s8 + $0x50] sm:$0xff] %v4103_v12 }
 0x3eb   : > { %4120 = vst [vmem:[%s7253_s8 + $0x58] sm:$0xff] %v4104_v7 }
 0x3ec   : > { %v4431_v19 = vpop.eup %4430 }
 0x3ed   : > { %v4095_v26 = vmul.f32 %v4431_v19, %v7212_v54 }
 0x3ef   : > { %4111 = vst [vmem:[%s7253_s8 + $0x10] sm:$0xff] %v4095_v26 }
 0x40f   : > { %v4024_v63 = vpop.xlane.xlu0 %4023 }
 0x410   : > { %v4050_v44 = vmul.f32 0.125, %v4024_v63 }
 0x411   : > { %v4022_v36 = vpop.xlane.xlu1 %4021 }
 0x412   : > { %v4066_v39 = vadd.f32 1e-08, %v4050_v44  ;;  %v4049_v56 = vmul.f32 0.125, %v4022_v36 }
 0x413   : > { %v4040_v20 = vpop.xlane.xlu0 %4039 }
 0x414   : > { %4432 = vrsqrt.f32 %v4066_v39  ;;  %v4065_v28 = vadd.f32 1e-08, %v4049_v56  ;;  %v4058_v3 = vmul.f32 0.125, %v4040_v20 }
 0x415   : > { %v4038_v55 = vpop.xlane.xlu1 %4037 }
 0x416   : > { %4434 = vrsqrt.f32 %v4065_v28  ;;  %v4074_v1 = vadd.f32 1e-08, %v4058_v3  ;;  %v4057_v34 = vmul.f32 0.125, %v4038_v55 }
 0x418   : > { %4436 = vrsqrt.f32 %v4074_v1  ;;  %v4073_v54 = vadd.f32 1e-08, %v4057_v34 }
 0x41a   : > { %4438 = vrsqrt.f32 %v4073_v54 }
 0x421   : > { %v4433_v49 = vpop.eup %4432 }
 0x422   : > { %v4098_v5 = vmul.f32 %v4433_v49, %v7216_v47 }
 0x423   : > { %v4435_v18 = vpop.eup %4434 }
 0x424   : > { %4114 = vst [vmem:[%s7253_s8 + $0x28] sm:$0xff] %v4098_v5  ;;  %v4097_v14 = vmul.f32 %v4435_v18, %v7222_v17 }
 0x425   : > { %v4437_v4 = vpop.eup %4436 }
 0x426   : > { %4113 = vst [vmem:[%s7253_s8 + $0x20] sm:$0xff] %v4097_v14  ;;  %v4106_v43 = vmul.f32 %v4437_v4, %v7220_v37 }
 0x427   : > { %v4439_v57 = vpop.eup %4438 }
 0x428   : > { %4122 = vst [vmem:[%s7253_s8 + $0x68] sm:$0xff] %v4106_v43  ;;  %v4105_v58 = vmul.f32 %v4439_v57, %v7226_v48 }
 0x42a   : > { %4121 = vst [vmem:[%s7253_s8 + $0x60] sm:$0xff] %v4105_v58 }
 0x42b   : > { %v4028_v27 = vpop.xlane.xlu0 %4027 }
 0x42c   : > { %v4052_v9 = vmul.f32 0.125, %v4028_v27 }
 0x42d   : > { %v4026_v45 = vpop.xlane.xlu1 %4025 }
 0x42e   : > { %v4068_v60 = vadd.f32 1e-08, %v4052_v9  ;;  %v4051_v47 = vmul.f32 0.125, %v4026_v45 }
 0x42f   : > { %v4044_v31 = vpop.xlane.xlu0 %4043 }
 0x430   : > { %4440 = vrsqrt.f32 %v4068_v60  ;;  %v4067_v17 = vadd.f32 1e-08, %v4051_v47  ;;  %v4060_v35 = vmul.f32 0.125, %v4044_v31 }
 0x431   : > { %v4042_v32 = vpop.xlane.xlu1 %4041 }
 0x432   : > { %4442 = vrsqrt.f32 %v4067_v17  ;;  %v4076_v37 = vadd.f32 1e-08, %v4060_v35  ;;  %v4059_v52 = vmul.f32 0.125, %v4042_v32 }
 0x434   : > { %4444 = vrsqrt.f32 %v4076_v37  ;;  %v4075_v48 = vadd.f32 1e-08, %v4059_v52 }
 0x436   : > { %4446 = vrsqrt.f32 %v4075_v48 }
 0x43d   : > { %v4441_v53 = vpop.eup %4440 }
 0x43e   : > { %v4100_v23 = vmul.f32 %v4441_v53, %v7233_v15 }
 0x43f   : > { %v4443_v22 = vpop.eup %4442 }
 0x440   : > { %4116 = vst [vmem:[%s7253_s8 + $0x38] sm:$0xff] %v4100_v23  ;;  %v4099_v8 = vmul.f32 %v4443_v22, %v7241_v42 }
 0x441   : > { %v4445_v21 = vpop.eup %4444 }
 0x442   : > { %4115 = vst [vmem:[%s7253_s8 + $0x30] sm:$0xff] %v4099_v8  ;;  %v4108_v59 = vmul.f32 %v4445_v21, %v7239_v13 }
 0x443   : > { %v4447_v6 = vpop.eup %4446 }
 0x444   : > { %4124 = vst [vmem:[%s7253_s8 + $0x78] sm:$0xff] %v4108_v59  ;;  %v4107_v15 = vmul.f32 %v4447_v6, %v7245_v61 }
 0x446   : > { %4123 = vst [vmem:[%s7253_s8 + $0x70] sm:$0xff] %v4107_v15 }
 0x447   : > { %4461 = shalt.err (!%p4458_p6)
}
 0x448   : > { %s4462_s25 = scalar_lea.hbm %s7292_s29, 2048  ;;  %s4466_s8 = scalar_lea.hbm %s7351_s2, 8192 }
 0x449   : > { %p4463_p7 = scmp.ne.s32.totalorder %s7292_s29, %s4462_s25  ;;  %p4467_p11 = scmp.lt.s32.totalorder %s7292_s29, %s7351_s2 }
 0x44a   : > { %p4468_p12 = scmp.lt.s32.totalorder %s4466_s8, %s4462_s25 }
 0x44b   : > { %p4464_p9 = pnand %p4463_p7, %p4635_p3 }
 0x44c   : > { %p4469_p13 = por %p4468_p12, %p4467_p11 }
 0x44d   : > { %p4465_p10 = pneg %p4464_p9 }
 0x44f   : > { %p4470_p0 = pnand %p4469_p13, %p4465_p10 }
 0x451   : > { %4473 = shalt.err (!%p4470_p0)
}
 0x452   : > { %s4568_s21 = smov 128  }
 0x453   : > { %4319 = dma.vmem_to_hbm [thread:$0]  (%p4635_p3), %s7285_s26, 2048, %s7292_s29, %s7297_s30, %s4568_s21, %s4568_s21, %s4560_s6  }
 0x454 PF: > { %p4325_p1 = scmp.ge.s32.totalorder %s4540_s16, 2  ;;  %s4157_s28 = sand.u32 1, %s4512_s9  }
 0x455   : > { %s4158_s12 = scalar_lea.sflag [#allocation3], %s4157_s28 }
 0x456   : > { %p4322_p2 = pnand %p4325_p1, %p4644_p8 }
 0x458   : > { %p4323_p4 = pneg %p4322_p2 }
 0x45a   : > { %4507 = dma.done.wait (%p4323_p4), %s4158_s12, 2048  }
 0x45b   : > { %4509 = vsyncadd (%p4323_p4), %s4158_s12, 4294965248  ;;  %s15_s16 = sadd.s32 1, %s4540_s16   ;;  %s7972_s9 = smov %s4516_s10 }
 0x45c   : > { %p12_p5 = scmp.ge.s32.totalorder %s15_s16, 6   ;;  %s7973_s10 = smov %s4520_s11 }
 0x45d   : > { %s7974_s11 = smov %s4653_s27  ;;  %s7975_s12 = smov %s4532_s14 }
 0x45e   : > { %s7976_s13 = smov %s4536_s15  ;;  %s7977_s14 = smov %s7980_s19 }
 0x45f   : > { %s7978_s15 = smov %s7984_s20  ;;  %14 = sbr.rel (!%p12_p5) target bundleno = 7 (0x7), region = 64 }
 0x464   :  { %4163 = vsyncpa [#allocation3], 1 }
 0x465   :  { %4165 = vsyncpa [#allocation3 + $0x1], 1 }

</bundles_post_ra>
